<compile_context>
chip_gen: v7x
topology: tpu7x:2x2x1
jax: 0.10.0
libtpu: 0.0.40
codegen_flags: <defaults>
</compile_context>

<pallas_src>
import jax
import jax.numpy as jnp
from jax import lax
from jax.experimental import pallas as pl
from jax.experimental.pallas import tpu as pltpu

# ----- logical model dimensions (base_net = 'resnet18') -----
FEAT_DIM = 512        # backbone output_num()
BOTTLENECK = 1000     # 'resnet' in base_net -> 1000
HIDDEN = 500
N_CLASSES = 31
N_DOMAINS = 2

# ----- padded (lane-dense) dimensions used inside the kernel -----
BNECK_PAD = 1024      # 1000 -> 1024
HIDDEN_PAD = 512      # 500  -> 512
LOGIT_PAD = 128       # 31 / 2 -> 128-wide output slabs
TK = 512              # K-tile for the stem matmul
SUB = 8               # sublane multiple for the batch dim


def _round_up(x, m):
    return (x + m - 1) // m * m


def _masked_log_softmax(logits, n_valid):
    """log_softmax along axis=1 over the first n_valid lanes (rest = -inf)."""
    lane = lax.broadcasted_iota(jnp.int32, logits.shape, 1)
    lg = jnp.where(lane < n_valid, logits, -jnp.inf)
    m = jnp.max(lg, axis=1, keepdims=True)
    z = lg - m
    lse = jnp.log(jnp.sum(jnp.exp(z), axis=1, keepdims=True))
    return z - lse


def dann_kernel(x_ref, ws_ref, bs_ref,          # stem (K-tiled)
                wb_ref, bb_ref,                  # bottleneck
                wcd1_ref, bcd1_ref,              # fused class|domain fc1
                wcd2_ref, bcd2_ref,              # fused block-diag fc2
                class_out_ref, domain_out_ref,
                acc_ref):
    k = pl.program_id(0)

    @pl.when(k == 0)
    def _():
        acc_ref[...] = jnp.zeros_like(acc_ref)

    # stem partial matmul: bf16 operands on the MXU, f32 accumulation
    acc_ref[...] += jnp.dot(x_ref[...], ws_ref[...],
                            preferred_element_type=jnp.float32)

    @pl.when(k == pl.num_programs(0) - 1)
    def _():
        # synthetic backbone features
        feat = jnp.maximum(acc_ref[...] + bs_ref[...], 0.0)

        # bottleneck: Linear(FEAT_DIM, 1000) + ReLU   (padded to 1024)
        h = jnp.dot(feat.astype(jnp.bfloat16), wb_ref[...],
                    preferred_element_type=jnp.float32) + bb_ref[...]
        h = jnp.maximum(h, 0.0)

        # fused head fc1: [class_hidden | domain_hidden]  (one N=1024 matmul)
        cd = jnp.dot(h.astype(jnp.bfloat16), wcd1_ref[...],
                     preferred_element_type=jnp.float32) + bcd1_ref[...]
        cd = jnp.maximum(cd, 0.0)

        # fused block-diagonal fc2: [class_logits | domain_logits] (N=256)
        logits = jnp.dot(cd.astype(jnp.bfloat16), wcd2_ref[...],
                         preferred_element_type=jnp.float32) + bcd2_ref[...]

        class_out_ref[...] = _masked_log_softmax(logits[:, :LOGIT_PAD],
                                                 N_CLASSES)
        domain_out_ref[...] = _masked_log_softmax(logits[:, LOGIT_PAD:],
                                                  N_DOMAINS)


def dann_office_forward(x_nchw, params, alpha):
    """x_nchw: [B, C, H, W] float32. alpha only affects gradients (unused fwd).

    `params` must be the padded/fused dict produced by `prepare_params`.
    """
    del alpha  # ReverseLayerF gradient scaling; identity in the forward pass
    B = x_nchw.shape[0]
    x_flat = x_nchw.reshape(B, -1)
    in_dim = x_flat.shape[1]

    B_pad = _round_up(max(B, SUB), SUB)
    K_pad = _round_up(max(in_dim, TK), TK)
    n_k = K_pad // TK

    x_p = jnp.zeros((B_pad, K_pad), jnp.bfloat16)
    x_p = x_p.at[:B, :in_dim].set(x_flat.astype(jnp.bfloat16))

    grid_spec = pltpu.PrefetchScalarGridSpec(
        num_scalar_prefetch=0,
        grid=(n_k,),
        in_specs=[
            pl.BlockSpec((B_pad, TK), lambda k: (0, k)),            # x (K-tiled)
            pl.BlockSpec((TK, FEAT_DIM), lambda k: (k, 0)),         # w_stem
            pl.BlockSpec((1, FEAT_DIM), lambda k: (0, 0)),          # b_stem
            pl.BlockSpec((FEAT_DIM, BNECK_PAD), lambda k: (0, 0)),  # w_bneck
            pl.BlockSpec((1, BNECK_PAD), lambda k: (0, 0)),         # b_bneck
            pl.BlockSpec((BNECK_PAD, 2 * HIDDEN_PAD), lambda k: (0, 0)),
            pl.BlockSpec((1, 2 * HIDDEN_PAD), lambda k: (0, 0)),
            pl.BlockSpec((2 * HIDDEN_PAD, 2 * LOGIT_PAD), lambda k: (0, 0)),
            pl.BlockSpec((1, 2 * LOGIT_PAD), lambda k: (0, 0)),
        ],
        out_specs=(
            pl.BlockSpec((B_pad, LOGIT_PAD), lambda k: (0, 0)),
            pl.BlockSpec((B_pad, LOGIT_PAD), lambda k: (0, 0)),
        ),
        scratch_shapes=[pltpu.VMEM((B_pad, FEAT_DIM), jnp.float32)],
    )

    cls_pad, dom_pad = pl.pallas_call(
        dann_kernel,
        grid_spec=grid_spec,
        out_shape=(
            jax.ShapeDtypeStruct((B_pad, LOGIT_PAD), jnp.float32),
            jax.ShapeDtypeStruct((B_pad, LOGIT_PAD), jnp.float32),
        ),
        compiler_params=pltpu.CompilerParams(
            dimension_semantics=("arbitrary",),   # K axis carries accumulator
            vmem_limit_bytes=48 << 20,            # fits v7x's 64 MiB VMEM
        ),
    )(x_p,
      params["w_stem"], params["b_stem"],
      params["w_bneck"], params["b_bneck"],
      params["w_cd1"], params["b_cd1"],
      params["w_cd2"], params["b_cd2"])

    return cls_pad[:B, :N_CLASSES], dom_pad[:B, :N_DOMAINS]


# ----------------------------- parameters -----------------------------------

def _linear_params(key, fan_in, fan_out):
    """PyTorch nn.Linear default init; weight stored pre-transposed [in, out]."""
    kw, kb = jax.random.split(key)
    bound = 1.0 / (fan_in ** 0.5)
    w_t = jax.random.uniform(kw, (fan_in, fan_out), jnp.float32, -bound, bound)
    b = jax.random.uniform(kb, (fan_out,), jnp.float32, -bound, bound)
    return w_t, b


def make_params(key, in_dim):
    """Raw (unpadded, f32) parameters matching the PyTorch module layers."""
    keys = jax.random.split(key, 6)
    p = {}
    p["w_stem"], p["b_stem"] = _linear_params(keys[0], in_dim, FEAT_DIM)
    p["w_bneck"], p["b_bneck"] = _linear_params(keys[1], FEAT_DIM, BOTTLENECK)
    p["w_c1"], p["b_c1"] = _linear_params(keys[2], BOTTLENECK, HIDDEN)
    p["w_c2"], p["b_c2"] = _linear_params(keys[3], HIDDEN, N_CLASSES)
    p["w_d1"], p["b_d1"] = _linear_params(keys[4], BOTTLENECK, HIDDEN)
    p["w_d2"], p["b_d2"] = _linear_params(keys[5], HIDDEN, N_DOMAINS)
    return p


def prepare_params(raw, in_dim):
    """Zero-pad to lane-dense shapes, fuse the two heads, cast weights to bf16."""
    K_pad = _round_up(max(in_dim, TK), TK)

    def pad_w(w, r, c):
        return jnp.zeros((r, c), jnp.float32).at[:w.shape[0], :w.shape[1]].set(w)

    def pad_b(b, c):
        return jnp.zeros((1, c), jnp.float32).at[0, :b.shape[0]].set(b)

    p = {}
    p["w_stem"] = pad_w(raw["w_stem"], K_pad, FEAT_DIM).astype(jnp.bfloat16)
    p["b_stem"] = pad_b(raw["b_stem"], FEAT_DIM)
    p["w_bneck"] = pad_w(raw["w_bneck"], FEAT_DIM, BNECK_PAD).astype(jnp.bfloat16)
    p["b_bneck"] = pad_b(raw["b_bneck"], BNECK_PAD)

    # fused head fc1: columns [0:512) = class, [512:1024) = domain
    w_cd1 = jnp.zeros((BNECK_PAD, 2 * HIDDEN_PAD), jnp.float32)
    w_cd1 = w_cd1.at[:BOTTLENECK, :HIDDEN].set(raw["w_c1"])
    w_cd1 = w_cd1.at[:BOTTLENECK,
                     HIDDEN_PAD:HIDDEN_PAD + HIDDEN].set(raw["w_d1"])
    p["w_cd1"] = w_cd1.astype(jnp.bfloat16)
    b_cd1 = jnp.zeros((1, 2 * HIDDEN_PAD), jnp.float32)
    b_cd1 = b_cd1.at[0, :HIDDEN].set(raw["b_c1"])
    b_cd1 = b_cd1.at[0, HIDDEN_PAD:HIDDEN_PAD + HIDDEN].set(raw["b_d1"])
    p["b_cd1"] = b_cd1

    # fused block-diagonal head fc2: out columns [0:128) class, [128:256) domain
    w_cd2 = jnp.zeros((2 * HIDDEN_PAD, 2 * LOGIT_PAD), jnp.float32)
    w_cd2 = w_cd2.at[:HIDDEN, :N_CLASSES].set(raw["w_c2"])
    w_cd2 = w_cd2.at[HIDDEN_PAD:HIDDEN_PAD + HIDDEN,
                     LOGIT_PAD:LOGIT_PAD + N_DOMAINS].set(raw["w_d2"])
    p["w_cd2"] = w_cd2.astype(jnp.bfloat16)
    b_cd2 = jnp.zeros((1, 2 * LOGIT_PAD), jnp.float32)
    b_cd2 = b_cd2.at[0, :N_CLASSES].set(raw["b_c2"])
    b_cd2 = b_cd2.at[0, LOGIT_PAD:LOGIT_PAD + N_DOMAINS].set(raw["b_d2"])
    p["b_cd2"] = b_cd2
    return p


def reference_forward(x_nchw, raw):
    """Pure-JAX reference mirroring the kernel math (bf16 weights/activations,
    f32 accumulation), in the original unfused/unpadded layout."""
    B = x_nchw.shape[0]
    xf = x_nchw.reshape(B, -1)

    def lin(a, w, b):
        return jnp.dot(a.astype(jnp.bfloat16), w.astype(jnp.bfloat16),
                       preferred_element_type=jnp.float32) + b

    feat = jax.nn.relu(lin(xf, raw["w_stem"], raw["b_stem"]))
    h = jax.nn.relu(lin(feat, raw["w_bneck"], raw["b_bneck"]))
    c = jax.nn.relu(lin(h, raw["w_c1"], raw["b_c1"]))
    c = jax.nn.log_softmax(lin(c, raw["w_c2"], raw["b_c2"]), axis=1)
    d = jax.nn.relu(lin(h, raw["w_d1"], raw["b_d1"]))   # ReverseLayerF == id fwd
    d = jax.nn.log_softmax(lin(d, raw["w_d2"], raw["b_d2"]), axis=1)
    return c, d


if __name__ == "__main__":
    key = jax.random.PRNGKey(0)
    k_x, k_p = jax.random.split(key)

    B, C, H, W = 2, 4, 16, 16
    x = jax.random.normal(k_x, (B, C, H, W), jnp.float32)
    alpha = 0.5

    raw = make_params(k_p, C * H * W)
    params = prepare_params(raw, C * H * W)

    fwd = jax.jit(dann_office_forward, static_argnums=2)
    class_out, domain_out = fwd(x, params, alpha)
    jax.block_until_ready((class_out, domain_out))

    assert class_out.shape == (B, N_CLASSES)
    assert domain_out.shape == (B, N_DOMAINS)
    # log-softmax rows must sum to ~1 in prob space
    assert jnp.allclose(jnp.sum(jnp.exp(class_out), axis=1), 1.0, atol=1e-4)
    assert jnp.allclose(jnp.sum(jnp.exp(domain_out), axis=1), 1.0, atol=1e-4)

    # compare against a pure-JAX reference of the same (bf16-weight) math
    ref_c, ref_d = jax.jit(reference_forward)(x, raw)
    assert jnp.allclose(class_out, ref_c, atol=2e-2, rtol=2e-2)
    assert jnp.allclose(domain_out, ref_d, atol=2e-2, rtol=2e-2)

    print("KERNEL_OK")
</pallas_src>

<mosaic_0001>
module attributes {stable_mosaic.version = 11 : i64} {
  func.func @dann_kernel(%arg0: i32, %arg1: memref<8x512xbf16, #tpu.memory_space<vmem>>, %arg2: memref<512x512xbf16, #tpu.memory_space<vmem>>, %arg3: memref<1x512xf32, #tpu.memory_space<vmem>>, %arg4: memref<512x1024xbf16, #tpu.memory_space<vmem>>, %arg5: memref<1x1024xf32, #tpu.memory_space<vmem>>, %arg6: memref<1024x1024xbf16, #tpu.memory_space<vmem>>, %arg7: memref<1x1024xf32, #tpu.memory_space<vmem>>, %arg8: memref<1024x256xbf16, #tpu.memory_space<vmem>>, %arg9: memref<1x256xf32, #tpu.memory_space<vmem>>, %arg10: memref<8x128xf32, #tpu.memory_space<vmem>>, %arg11: memref<8x128xf32, #tpu.memory_space<vmem>>, %arg12: memref<8x512xf32, #tpu.memory_space<vmem>>) attributes {dimension_semantics = [#tpu.dimension_semantics<arbitrary>], iteration_bounds = array<i64: 2>, scalar_prefetch = 0 : i64, scratch_operands = 1 : i64, tpu.core_type = #tpu.core_type<tc>, window_params = [{transform_indices = @transform_0, window_bounds = array<i64: 8, 512>}, {transform_indices = @transform_1, window_bounds = array<i64: 512, 512>}, {pipeline_mode = #tpu.pipeline_mode<synchronous>, transform_indices = @transform_2, window_bounds = array<i64: 1, 512>}, {pipeline_mode = #tpu.pipeline_mode<synchronous>, transform_indices = @transform_3, window_bounds = array<i64: 512, 1024>}, {pipeline_mode = #tpu.pipeline_mode<synchronous>, transform_indices = @transform_4, window_bounds = array<i64: 1, 1024>}, {pipeline_mode = #tpu.pipeline_mode<synchronous>, transform_indices = @transform_5, window_bounds = array<i64: 1024, 1024>}, {pipeline_mode = #tpu.pipeline_mode<synchronous>, transform_indices = @transform_6, window_bounds = array<i64: 1, 1024>}, {pipeline_mode = #tpu.pipeline_mode<synchronous>, transform_indices = @transform_7, window_bounds = array<i64: 1024, 256>}, {pipeline_mode = #tpu.pipeline_mode<synchronous>, transform_indices = @transform_8, window_bounds = array<i64: 1, 256>}, {pipeline_mode = #tpu.pipeline_mode<synchronous>, transform_indices = @transform_9, window_bounds = array<i64: 8, 128>}, {pipeline_mode = #tpu.pipeline_mode<synchronous>, transform_indices = @transform_10, window_bounds = array<i64: 8, 128>}]} {
    %c0_i32 = arith.constant 0 : i32
    %0 = arith.cmpi eq, %arg0, %c0_i32 : i32
    %1 = arith.extui %0 : i1 to i32
    %c0_i32_0 = arith.constant 0 : i32
    %2 = arith.cmpi ne, %1, %c0_i32_0 : i32
    scf.if %2 {
      %cst_9 = arith.constant 0.000000e+00 : f32
      %12 = vector.broadcast %cst_9 : f32 to vector<8x512xf32>
      %c0_10 = arith.constant 0 : index
      %c0_11 = arith.constant 0 : index
      %13 = vector.load %arg12[%c0_10, %c0_11] : memref<8x512xf32, #tpu.memory_space<vmem>>, vector<8x512xf32>
      tpu.vector_store %arg12[%c0_10, %c0_11], %12 {strides = array<i32>} : memref<8x512xf32, #tpu.memory_space<vmem>>, vector<8x512xf32>,
    } else {
    }
    %c0 = arith.constant 0 : index
    %c0_1 = arith.constant 0 : index
    %3 = vector.load %arg12[%c0, %c0_1] : memref<8x512xf32, #tpu.memory_space<vmem>>, vector<8x512xf32>
    %c0_2 = arith.constant 0 : index
    %c0_3 = arith.constant 0 : index
    %4 = vector.load %arg1[%c0_2, %c0_3] : memref<8x512xbf16, #tpu.memory_space<vmem>>, vector<8x512xbf16>
    %c0_4 = arith.constant 0 : index
    %c0_5 = arith.constant 0 : index
    %5 = vector.load %arg2[%c0_4, %c0_5] : memref<512x512xbf16, #tpu.memory_space<vmem>>, vector<512x512xbf16>
    %cst = arith.constant dense<0.000000e+00> : vector<8x512xf32>
    %6 = tpu.matmul %4, %5, %cst {dimension_numbers = #tpu.dot_dimension_numbers<[1], [0], [0], [1], [0, 0, 1, 1], [], []>} : vector<8x512xbf16>, vector<512x512xbf16>, vector<8x512xf32> -> vector<8x512xf32>
    %7 = arith.addf %3, %6 : vector<8x512xf32>
    %c0_6 = arith.constant 0 : index
    %c0_7 = arith.constant 0 : index
    %8 = vector.load %arg12[%c0_6, %c0_7] : memref<8x512xf32, #tpu.memory_space<vmem>>, vector<8x512xf32>
    tpu.vector_store %arg12[%c0_6, %c0_7], %7 {strides = array<i32>} : memref<8x512xf32, #tpu.memory_space<vmem>>, vector<8x512xf32>,
    %c1_i32 = arith.constant 1 : i32
    %9 = arith.cmpi eq, %arg0, %c1_i32 : i32
    %10 = arith.extui %9 : i1 to i32
    %c0_i32_8 = arith.constant 0 : i32
    %11 = arith.cmpi ne, %10, %c0_i32_8 : i32
    scf.if %11 {
      %c0_9 = arith.constant 0 : index
      %c0_10 = arith.constant 0 : index
      %12 = vector.load %arg12[%c0_9, %c0_10] : memref<8x512xf32, #tpu.memory_space<vmem>>, vector<8x512xf32>
      %c0_11 = arith.constant 0 : index
      %c0_12 = arith.constant 0 : index
      %13 = vector.load %arg3[%c0_11, %c0_12] : memref<1x512xf32, #tpu.memory_space<vmem>>, vector<1x512xf32>
      %14 = vector.broadcast %13 : vector<1x512xf32> to vector<8x512xf32>
      %15 = arith.addf %12, %14 : vector<8x512xf32>
      %cst_13 = arith.constant 0.000000e+00 : f32
      %16 = vector.broadcast %cst_13 : f32 to vector<8x512xf32>
      %17 = arith.maximumf %15, %16 : vector<8x512xf32>
      %18 = arith.truncf %17 : vector<8x512xf32> to vector<8x512xbf16>
      %c0_14 = arith.constant 0 : index
      %c0_15 = arith.constant 0 : index
      %19 = vector.load %arg4[%c0_14, %c0_15] : memref<512x1024xbf16, #tpu.memory_space<vmem>>, vector<512x1024xbf16>
      %cst_16 = arith.constant dense<0.000000e+00> : vector<8x1024xf32>
      %20 = tpu.matmul %18, %19, %cst_16 {dimension_numbers = #tpu.dot_dimension_numbers<[1], [0], [0], [1], [0, 0, 1, 1], [], []>} : vector<8x512xbf16>, vector<512x1024xbf16>, vector<8x1024xf32> -> vector<8x1024xf32>
      %c0_17 = arith.constant 0 : index
      %c0_18 = arith.constant 0 : index
      %21 = vector.load %arg5[%c0_17, %c0_18] : memref<1x1024xf32, #tpu.memory_space<vmem>>, vector<1x1024xf32>
      %22 = vector.broadcast %21 : vector<1x1024xf32> to vector<8x1024xf32>
      %23 = arith.addf %20, %22 : vector<8x1024xf32>
      %cst_19 = arith.constant 0.000000e+00 : f32
      %24 = vector.broadcast %cst_19 : f32 to vector<8x1024xf32>
      %25 = arith.maximumf %23, %24 : vector<8x1024xf32>
      %26 = arith.truncf %25 : vector<8x1024xf32> to vector<8x1024xbf16>
      %c0_20 = arith.constant 0 : index
      %c0_21 = arith.constant 0 : index
      %27 = vector.load %arg6[%c0_20, %c0_21] : memref<1024x1024xbf16, #tpu.memory_space<vmem>>, vector<1024x1024xbf16>
      %cst_22 = arith.constant dense<0.000000e+00> : vector<8x1024xf32>
      %28 = tpu.matmul %26, %27, %cst_22 {dimension_numbers = #tpu.dot_dimension_numbers<[1], [0], [0], [1], [0, 0, 1, 1], [], []>} : vector<8x1024xbf16>, vector<1024x1024xbf16>, vector<8x1024xf32> -> vector<8x1024xf32>
      %c0_23 = arith.constant 0 : index
      %c0_24 = arith.constant 0 : index
      %29 = vector.load %arg7[%c0_23, %c0_24] : memref<1x1024xf32, #tpu.memory_space<vmem>>, vector<1x1024xf32>
      %30 = vector.broadcast %29 : vector<1x1024xf32> to vector<8x1024xf32>
      %31 = arith.addf %28, %30 : vector<8x1024xf32>
      %cst_25 = arith.constant 0.000000e+00 : f32
      %32 = vector.broadcast %cst_25 : f32 to vector<8x1024xf32>
      %33 = arith.maximumf %31, %32 : vector<8x1024xf32>
      %34 = arith.truncf %33 : vector<8x1024xf32> to vector<8x1024xbf16>
      %c0_26 = arith.constant 0 : index
      %c0_27 = arith.constant 0 : index
      %35 = vector.load %arg8[%c0_26, %c0_27] : memref<1024x256xbf16, #tpu.memory_space<vmem>>, vector<1024x256xbf16>
      %cst_28 = arith.constant dense<0.000000e+00> : vector<8x256xf32>
      %36 = tpu.matmul %34, %35, %cst_28 {dimension_numbers = #tpu.dot_dimension_numbers<[1], [0], [0], [1], [0, 0, 1, 1], [], []>} : vector<8x1024xbf16>, vector<1024x256xbf16>, vector<8x256xf32> -> vector<8x256xf32>
      %c0_29 = arith.constant 0 : index
      %c0_30 = arith.constant 0 : index
      %37 = vector.load %arg9[%c0_29, %c0_30] : memref<1x256xf32, #tpu.memory_space<vmem>>, vector<1x256xf32>
      %38 = vector.broadcast %37 : vector<1x256xf32> to vector<8x256xf32>
      %39 = arith.addf %36, %38 : vector<8x256xf32>
      %40 = vector.extract_strided_slice %39 {offsets = [0, 0], sizes = [8, 128], strides = [1, 1]} : vector<8x256xf32> to vector<8x128xf32>
      %41 = tpu.iota {dimensions = array<i32: 1>} : vector<8x128xi32>
      %c31_i32 = arith.constant 31 : i32
      %42 = vector.broadcast %c31_i32 : i32 to vector<8x128xi32>
      %43 = arith.cmpi slt, %41, %42 : vector<8x128xi32>
      %cst_31 = arith.constant 0xFF800000 : f32
      %44 = vector.broadcast %cst_31 : f32 to vector<8x128xf32>
      %45 = arith.select %43, %40, %44 : vector<8x128xi1>, vector<8x128xf32>
      %cst_32 = arith.constant dense<0xFF800000> : vector<8xf32>
      %46 = vector.multi_reduction <maximumf>, %45, %cst_32 [1] : vector<8x128xf32> to vector<8xf32>
      %47 = vector.shape_cast %46 : vector<8xf32> to vector<8x1xf32>
      %48 = vector.broadcast %47 : vector<8x1xf32> to vector<8x128xf32>
      %49 = arith.subf %45, %48 : vector<8x128xf32>
      %50 = math.exp %49 : vector<8x128xf32>
      %cst_33 = arith.constant dense<0.000000e+00> : vector<8xf32>
      %51 = vector.multi_reduction <add>, %50, %cst_33 [1] : vector<8x128xf32> to vector<8xf32>
      %52 = vector.shape_cast %51 : vector<8xf32> to vector<8x1xf32>
      %53 = math.log %52 : vector<8x1xf32>
      %54 = vector.broadcast %53 : vector<8x1xf32> to vector<8x128xf32>
      %55 = arith.subf %49, %54 : vector<8x128xf32>
      %c0_34 = arith.constant 0 : index
      %c0_35 = arith.constant 0 : index
      %56 = vector.load %arg10[%c0_34, %c0_35] : memref<8x128xf32, #tpu.memory_space<vmem>>, vector<8x128xf32>
      tpu.vector_store %arg10[%c0_34, %c0_35], %55 {strides = array<i32>} : memref<8x128xf32, #tpu.memory_space<vmem>>, vector<8x128xf32>,
      %57 = vector.extract_strided_slice %39 {offsets = [0, 128], sizes = [8, 128], strides = [1, 1]} : vector<8x256xf32> to vector<8x128xf32>
      %58 = tpu.iota {dimensions = array<i32: 1>} : vector<8x128xi32>
      %c2_i32 = arith.constant 2 : i32
      %59 = vector.broadcast %c2_i32 : i32 to vector<8x128xi32>
      %60 = arith.cmpi slt, %58, %59 : vector<8x128xi32>
      %cst_36 = arith.constant 0xFF800000 : f32
      %61 = vector.broadcast %cst_36 : f32 to vector<8x128xf32>
      %62 = arith.select %60, %57, %61 : vector<8x128xi1>, vector<8x128xf32>
      %cst_37 = arith.constant dense<0xFF800000> : vector<8xf32>
      %63 = vector.multi_reduction <maximumf>, %62, %cst_37 [1] : vector<8x128xf32> to vector<8xf32>
      %64 = vector.shape_cast %63 : vector<8xf32> to vector<8x1xf32>
      %65 = vector.broadcast %64 : vector<8x1xf32> to vector<8x128xf32>
      %66 = arith.subf %62, %65 : vector<8x128xf32>
      %67 = math.exp %66 : vector<8x128xf32>
      %cst_38 = arith.constant dense<0.000000e+00> : vector<8xf32>
      %68 = vector.multi_reduction <add>, %67, %cst_38 [1] : vector<8x128xf32> to vector<8xf32>
      %69 = vector.shape_cast %68 : vector<8xf32> to vector<8x1xf32>
      %70 = math.log %69 : vector<8x1xf32>
      %71 = vector.broadcast %70 : vector<8x1xf32> to vector<8x128xf32>
      %72 = arith.subf %66, %71 : vector<8x128xf32>
      %c0_39 = arith.constant 0 : index
      %c0_40 = arith.constant 0 : index
      %73 = vector.load %arg11[%c0_39, %c0_40] : memref<8x128xf32, #tpu.memory_space<vmem>>, vector<8x128xf32>
      tpu.vector_store %arg11[%c0_39, %c0_40], %72 {strides = array<i32>} : memref<8x128xf32, #tpu.memory_space<vmem>>, vector<8x128xf32>,
    } else {
    }
    return
  }
  func.func @transform_0(%arg0: i32) -> (i32, i32) {
    %c0_i32 = arith.constant 0 : i32
    %c0_i32_0 = arith.constant 0 : i32
    return %c0_i32, %arg0 : i32, i32
  }
  func.func @transform_1(%arg0: i32) -> (i32, i32) {
    %c0_i32 = arith.constant 0 : i32
    %c0_i32_0 = arith.constant 0 : i32
    return %arg0, %c0_i32 : i32, i32
  }
  func.func @transform_2(%arg0: i32) -> (i32, i32) {
    %c0_i32 = arith.constant 0 : i32
    %c0_i32_0 = arith.constant 0 : i32
    %c0_i32_1 = arith.constant 0 : i32
    return %c0_i32, %c0_i32_0 : i32, i32
  }
  func.func @transform_3(%arg0: i32) -> (i32, i32) {
    %c0_i32 = arith.constant 0 : i32
    %c0_i32_0 = arith.constant 0 : i32
    %c0_i32_1 = arith.constant 0 : i32
    return %c0_i32, %c0_i32_0 : i32, i32
  }
  func.func @transform_4(%arg0: i32) -> (i32, i32) {
    %c0_i32 = arith.constant 0 : i32
    %c0_i32_0 = arith.constant 0 : i32
    %c0_i32_1 = arith.constant 0 : i32
    return %c0_i32, %c0_i32_0 : i32, i32
  }
  func.func @transform_5(%arg0: i32) -> (i32, i32) {
    %c0_i32 = arith.constant 0 : i32
    %c0_i32_0 = arith.constant 0 : i32
    %c0_i32_1 = arith.constant 0 : i32
    return %c0_i32, %c0_i32_0 : i32, i32
  }
  func.func @transform_6(%arg0: i32) -> (i32, i32) {
    %c0_i32 = arith.constant 0 : i32
    %c0_i32_0 = arith.constant 0 : i32
    %c0_i32_1 = arith.constant 0 : i32
    return %c0_i32, %c0_i32_0 : i32, i32
  }
  func.func @transform_7(%arg0: i32) -> (i32, i32) {
    %c0_i32 = arith.constant 0 : i32
    %c0_i32_0 = arith.constant 0 : i32
    %c0_i32_1 = arith.constant 0 : i32
    return %c0_i32, %c0_i32_0 : i32, i32
  }
  func.func @transform_8(%arg0: i32) -> (i32, i32) {
    %c0_i32 = arith.constant 0 : i32
    %c0_i32_0 = arith.constant 0 : i32
    %c0_i32_1 = arith.constant 0 : i32
    return %c0_i32, %c0_i32_0 : i32, i32
  }
  func.func @transform_9(%arg0: i32) -> (i32, i32) {
    %c0_i32 = arith.constant 0 : i32
    %c0_i32_0 = arith.constant 0 : i32
    %c0_i32_1 = arith.constant 0 : i32
    return %c0_i32, %c0_i32_0 : i32, i32
  }
  func.func @transform_10(%arg0: i32) -> (i32, i32) {
    %c0_i32 = arith.constant 0 : i32
    %c0_i32_0 = arith.constant 0 : i32
    %c0_i32_1 = arith.constant 0 : i32
    return %c0_i32, %c0_i32_0 : i32, i32
  }
}

</mosaic_0001>

<bundles_post_ra>
// kernel: dann_office_forward.1
= control target key start
LH: loop header
LB: loop body
LE: loop exit
PB: predicated region body
PF: predicated region fallthrough
CT: control target
= control target key end

     0   :  { %s10955_s0 = inlined_call_operand.vmem [shape: bf16[8,1024], index: 0, kind: input, shape index: {}]   ;;  %s10956_s1 = inlined_call_operand.hbm [shape: bf16[1024,512], index: 1, kind: input, shape index: {}]   ;;  %s10957_s2 = inlined_call_operand.hbm [shape: f32[1,512], index: 2, kind: input, shape index: {}]   ;;  %s10958_s3 = inlined_call_operand.hbm [shape: bf16[512,1024], index: 3, kind: input, shape index: {}]   ;;  %s10959_s4 = inlined_call_operand.hbm [shape: f32[1,1024], index: 4, kind: input, shape index: {}]   ;;  %s10960_s5 = inlined_call_operand.hbm [shape: bf16[1024,1024], index: 5, kind: input, shape index: {}]   ;;  %s10961_s6 = inlined_call_operand.hbm [shape: f32[1,1024], index: 6, kind: input, shape index: {}]   ;;  %s10962_s7 = inlined_call_operand.hbm [shape: bf16[1024,256], index: 7, kind: input, shape index: {}]   ;;  %s10963_s8 = inlined_call_operand.hbm [shape: f32[1,256], index: 8, kind: input, shape index: {}]   ;;  %s10964_s9 = inlined_call_operand.vmem [shape: f32[8,128], index: 9, kind: output, shape index: {0}]   ;;  %s10965_s10 = inlined_call_operand.vmem [shape: f32[8,128], index: 10, kind: output, shape index: {1}]  }
   0x1   :  { %10968 = sst [smem:[#allocation21_spill]] %s10957_s2 }
   0x2   :  { %10969 = sst [smem:[#allocation22_spill]] %s10965_s10 }
   0x3   :  { %16 = vsyncpa [#allocation4], 0 }
   0x4   :  { %18 = vsyncpa [#allocation4 + $0x1], 0 }
   0x5   :  { %19 = vsyncpa [#allocation6], 0 }
   0x6   :  { %20 = vsyncpa [#allocation9], 0 }
   0x7   :  { %21 = vsyncpa [#allocation12], 0 }
   0x8   :  { %22 = vsyncpa [#allocation15], 0  ;;  %s10310_s13 = smov 0   ;;  %s10312_s14 = smov 0  }
   0x9   :  { %s10314_s15 = smov 0   ;;  %s10316_s16 = smov 0  }
   0xa LB: > { %s10240_s17 = smov [#allocation5]   ;;  %s10331_s19 = sadd.s32 4294967295, %s10238_s16   ;;  %s10238_s16 = sphi %s10316_s16, %s10991_s16   ;;  %s10234_s15 = sphi %s10314_s15, %s10990_s15   ;;  %s10230_s14 = sphi %s10312_s14, %s10989_s14   ;;  %s10226_s13 = sphi %s10310_s13, %s10988_s13  }
   0xb   : > { %s287_s18 = sshll.u32 %s10240_s17, 4  ;;  %p8296_p0 = scmp.ge.s32.totalorder %s10238_s16, 1  ;;  %s10337_s18 = int_to_ptr.vmem [resolvable:$true] %s287_s18 }
   0xc   : > { %p10966_p1 = scmp.eq.s32.totalorder %s10331_s19, 0  ;;  %p274_p2 = scmp.lt.s32.totalorder %s10238_s16, 3 }
   0xd   : > { %s10241_s21 = smov [#allocation8]   ;;  %s10242_s23 = smov [#allocation11]  }
   0xe   : > { %p10339_p4 = pnand %p8296_p0, %p274_p2  ;;  %s311_s22 = sshll.u32 %s10241_s21, 4  ;;  %s10345_s22 = int_to_ptr.vmem [resolvable:$true] %s311_s22 }
   0xf   : > { %s335_s24 = sshll.u32 %s10242_s23, 4  ;;  %s10243_s26 = smov [#allocation7]   ;;  %s10353_s24 = int_to_ptr.vmem [resolvable:$true] %s335_s24 }
  0x10   : > { %s10970_s20 = scalar_select %p10339_p4, 1, 0 }
  0x11   : > { %p9478_p5 = pneg %p10339_p4  ;;  %s10355_s27 = sshll.u32 %s10243_s26, 4  ;;  %s298_s27 = int_to_ptr.vmem [resolvable:$true] %s10355_s27 }
  0x12   : > { %s10972_s2 = sld [smem:[#allocation21_spill]] }
  0x13   : > { %p10349_p6 = pnand %p9478_p5, %p10966_p1 }
  0x15   : > { %p10365_p8 = pneg %p10349_p6 }
  0x18   : > { %s9962_s30 = scalar_lea.hbm %s10972_s2, 64 }
  0x19   : > { %p9963_p7 = scmp.ne.s32.totalorder %s10972_s2, %s9962_s30  ;;  %p9969_p11 = scmp.lt.u32.totalorder %s9962_s30, %s10972_s2 }
  0x1b   : > { %p9965_p9 = pnand %p10365_p8, %p9963_p7 }
  0x1d   : > { %p9966_p10 = pneg %p9965_p9 }
  0x1f   : > { %p9971_p12 = pnand %p9969_p11, %p9966_p10 }
  0x21   : > { %9974 = shalt.err (!%p9971_p12)
}
  0x22   : > { %s9975_s26 = scalar_lea.vmem %s10337_s18, 64  ;;  %p9983_p5 = scmp.lt.s32.totalorder %s10337_s18, %s10337_s18 }
  0x23   : > { %p9976_p13 = scmp.ne.s32.totalorder %s10337_s18, %s9975_s26  ;;  %p9984_p3 = scmp.lt.s32.totalorder %s9975_s26, %s9975_s26 }
  0x25   : > { %p9978_p0 = pnand %p9976_p13, %p10365_p8  ;;  %p9985_p7 = por %p9984_p3, %p9983_p5 }
  0x27   : > { %p9979_p2 = pneg %p9978_p0 }
  0x29   : > { %p9986_p9 = pnand %p9985_p7, %p9979_p2 }
  0x2b   : > { %9989 = shalt.err (!%p9986_p9)
}
  0x2c   : > { %9481 = dma.hbm_to_vmem [thread:$0]  (!%p10349_p6), %s10972_s2, 64, %s10337_s18, [#allocation6]  }
  0x2d   : > { %s9990_s12 = scalar_lea.hbm %s10959_s4, 128 }
  0x2e   : > { %p9991_p10 = scmp.ne.s32.totalorder %s10959_s4, %s9990_s12  ;;  %p9997_p12 = scmp.lt.u32.totalorder %s9990_s12, %s10959_s4 }
  0x30   : > { %p9993_p3 = pnand %p9991_p10, %p10365_p8 }
  0x32   : > { %p9994_p11 = pneg %p9993_p3 }
  0x34   : > { %p9999_p13 = pnand %p9997_p12, %p9994_p11 }
  0x36   : > { %10002 = shalt.err (!%p9999_p13)
}
  0x37   : > { %s10003_s18 = scalar_lea.vmem %s10345_s22, 128  ;;  %p10011_p7 = scmp.lt.s32.totalorder %s10345_s22, %s10345_s22 }
  0x38   : > { %p10004_p0 = scmp.ne.s32.totalorder %s10345_s22, %s10003_s18  ;;  %p10012_p9 = scmp.lt.s32.totalorder %s10003_s18, %s10003_s18 }
  0x3a   : > { %p10006_p2 = pnand %p10004_p0, %p10365_p8  ;;  %p10013_p10 = por %p10012_p9, %p10011_p7 }
  0x3c   : > { %p10007_p5 = pneg %p10006_p2 }
  0x3e   : > { %p10014_p3 = pnand %p10013_p10, %p10007_p5 }
  0x40   : > { %10017 = shalt.err (!%p10014_p3)
}
  0x41   : > { %9487 = dma.hbm_to_vmem [thread:$0]  (!%p10349_p6), %s10959_s4, 128, %s10345_s22, [#allocation9]  }
  0x42   : > { %s10018_s11 = scalar_lea.hbm %s10961_s6, 128 }
  0x43   : > { %p10019_p11 = scmp.ne.s32.totalorder %s10961_s6, %s10018_s11  ;;  %p10025_p0 = scmp.lt.u32.totalorder %s10018_s11, %s10961_s6 }
  0x45   : > { %p10021_p12 = pnand %p10019_p11, %p10365_p8 }
  0x47   : > { %p10022_p13 = pneg %p10021_p12 }
  0x49   : > { %p10027_p2 = pnand %p10025_p0, %p10022_p13 }
  0x4b   : > { %10030 = shalt.err (!%p10027_p2)
}
  0x4c   : > { %s10031_s22 = scalar_lea.vmem %s10353_s24, 128  ;;  %p10039_p10 = scmp.lt.s32.totalorder %s10353_s24, %s10353_s24 }
  0x4d   : > { %p10032_p5 = scmp.ne.s32.totalorder %s10353_s24, %s10031_s22  ;;  %p10040_p3 = scmp.lt.s32.totalorder %s10031_s22, %s10031_s22 }
  0x4f   : > { %p10034_p7 = pnand %p10032_p5, %p10365_p8  ;;  %p10041_p11 = por %p10040_p3, %p10039_p10 }
  0x51   : > { %p10035_p9 = pneg %p10034_p7 }
  0x53   : > { %p10042_p12 = pnand %p10041_p11, %p10035_p9 }
  0x55   : > { %10045 = shalt.err (!%p10042_p12)
}
  0x56   : > { %9493 = dma.hbm_to_vmem [thread:$0]  (!%p10349_p6), %s10961_s6, 128, %s10353_s24, [#allocation12]  }
  0x57   : > { %s10046_s30 = scalar_lea.hbm %s10958_s3, 32768 }
  0x58   : > { %p10047_p13 = scmp.ne.s32.totalorder %s10958_s3, %s10046_s30  ;;  %p10053_p5 = scmp.lt.u32.totalorder %s10046_s30, %s10958_s3 }
  0x5a   : > { %p10049_p0 = pnand %p10047_p13, %p10365_p8 }
  0x5c   : > { %p10050_p2 = pneg %p10049_p0 }
  0x5e   : > { %p10055_p7 = pnand %p10053_p5, %p10050_p2 }
  0x60   : > { %10058 = shalt.err (!%p10055_p7)
}
  0x61   : > { %s10059_s26 = scalar_lea.vmem %s298_s27, 32768  ;;  %p10067_p11 = scmp.lt.s32.totalorder %s298_s27, %s298_s27 }
  0x62   : > { %p10060_p9 = scmp.ne.s32.totalorder %s298_s27, %s10059_s26  ;;  %p10068_p12 = scmp.lt.s32.totalorder %s10059_s26, %s10059_s26 }
  0x64   : > { %p10062_p10 = pnand %p10060_p9, %p10365_p8  ;;  %p10069_p1 = por %p10068_p12, %p10067_p11 }
  0x66   : > { %p10063_p3 = pneg %p10062_p10 }
  0x68   : > { %p10070_p4 = pnand %p10069_p1, %p10063_p3 }
  0x6a   : > { %10073 = shalt.err (!%p10070_p4)
}
  0x6b   : > { %s10244_s24 = smov 512   ;;  %s10245_s22 = smov 32  }
  0x6c   : > { %9484 = dma.hbm_to_vmem [thread:$0]  (!%p10349_p6), %s10958_s3, 32768, %s298_s27, [#allocation6], %s10244_s24, %s10244_s24, %s10245_s22  }
  0x6d   : > { %s10246_s28 = smov [#allocation10]   ;;  %s10247_s30 = smov [#allocation13]  }
  0x6e   : > { %s321_s29 = sshll.u32 %s10246_s28, 4  ;;  %s345_s11 = sshll.u32 %s10247_s30, 4  ;;  %s322_s29 = int_to_ptr.vmem [resolvable:$true] %s321_s29  ;;  %s10451_s11 = int_to_ptr.vmem [resolvable:$true] %s345_s11 }
  0x6f   : > { %s10074_s23 = scalar_lea.hbm %s10960_s5, 65536 }
  0x70   : > { %p10075_p1 = scmp.ne.s32.totalorder %s10960_s5, %s10074_s23  ;;  %p10081_p0 = scmp.lt.u32.totalorder %s10074_s23, %s10960_s5 }
  0x72   : > { %p10077_p4 = pnand %p10075_p1, %p10365_p8 }
  0x74   : > { %p10078_p13 = pneg %p10077_p4 }
  0x76   : > { %p10083_p2 = pnand %p10081_p0, %p10078_p13 }
  0x78   : > { %10086 = shalt.err (!%p10083_p2)
}
  0x79   : > { %s10087_s10 = scalar_lea.vmem %s322_s29, 65536  ;;  %p10095_p10 = scmp.lt.s32.totalorder %s322_s29, %s322_s29 }
  0x7a   : > { %p10088_p5 = scmp.ne.s32.totalorder %s322_s29, %s10087_s10  ;;  %p10096_p3 = scmp.lt.s32.totalorder %s10087_s10, %s10087_s10 }
  0x7c   : > { %p10090_p7 = pnand %p10088_p5, %p10365_p8  ;;  %p10097_p11 = por %p10096_p3, %p10095_p10 }
  0x7e   : > { %p10091_p9 = pneg %p10090_p7 }
  0x80   : > { %p10098_p12 = pnand %p10097_p11, %p10091_p9 }
  0x82   : > { %10101 = shalt.err (!%p10098_p12)
}
  0x83   : > { %9490 = dma.hbm_to_vmem [thread:$0]  (!%p10349_p6), %s10960_s5, 65536, %s322_s29, [#allocation9], %s10244_s24, %s10244_s24, %s10245_s22  }
  0x84   : > { %s10102_s21 = scalar_lea.hbm %s10962_s7, 16384 }
  0x85   : > { %p10103_p1 = scmp.ne.s32.totalorder %s10962_s7, %s10102_s21  ;;  %p10109_p0 = scmp.lt.u32.totalorder %s10102_s21, %s10962_s7 }
  0x87   : > { %p10105_p4 = pnand %p10103_p1, %p10365_p8 }
  0x89   : > { %p10106_p13 = pneg %p10105_p4 }
  0x8b   : > { %p10111_p2 = pnand %p10109_p0, %p10106_p13 }
  0x8d   : > { %10114 = shalt.err (!%p10111_p2)
}
  0x8e   : > { %s10115_s24 = scalar_lea.vmem %s10451_s11, 16384  ;;  %p10123_p10 = scmp.lt.s32.totalorder %s10451_s11, %s10451_s11 }
  0x8f   : > { %p10116_p5 = scmp.ne.s32.totalorder %s10451_s11, %s10115_s24  ;;  %p10124_p3 = scmp.lt.s32.totalorder %s10115_s24, %s10115_s24 }
  0x91   : > { %p10118_p7 = pnand %p10116_p5, %p10365_p8  ;;  %p10125_p11 = por %p10124_p3, %p10123_p10 }
  0x93   : > { %p10119_p9 = pneg %p10118_p7 }
  0x95   : > { %p10126_p12 = pnand %p10125_p11, %p10119_p9 }
  0x97   : > { %10129 = shalt.err (!%p10126_p12)
}
  0x98   : > { %s10248_s22 = smov 128   ;;  %s10249_s29 = smov 8  }
  0x99   : > { %9496 = dma.hbm_to_vmem [thread:$0]  (!%p10349_p6), %s10962_s7, 16384, %s10451_s11, [#allocation12], %s10248_s22, %s10248_s22, %s10249_s29  }
  0x9a   : > { %s10250_s28 = smov [#allocation14]   ;;  %s10130_s23 = scalar_lea.hbm %s10963_s8, 32 }
  0x9b   : > { %s359_s30 = sshll.u32 %s10250_s28, 4  ;;  %p10131_p1 = scmp.ne.s32.totalorder %s10963_s8, %s10130_s23  ;;  %s360_s30 = int_to_ptr.vmem [resolvable:$true] %s359_s30 }
  0x9c   : > { %p10137_p0 = scmp.lt.u32.totalorder %s10130_s23, %s10963_s8 }
  0x9d   : > { %p10133_p4 = pnand %p10131_p1, %p10365_p8 }
  0x9f   : > { %p10134_p13 = pneg %p10133_p4 }
  0xa1   : > { %p10139_p2 = pnand %p10137_p0, %p10134_p13 }
  0xa3   : > { %10142 = shalt.err (!%p10139_p2)
}
  0xa4   : > { %s10143_s11 = scalar_lea.vmem %s360_s30, 32  ;;  %p10151_p10 = scmp.lt.s32.totalorder %s360_s30, %s360_s30 }
  0xa5   : > { %p10144_p5 = scmp.ne.s32.totalorder %s360_s30, %s10143_s11  ;;  %p10152_p3 = scmp.lt.s32.totalorder %s10143_s11, %s10143_s11 }
  0xa7   : > { %p10146_p7 = pnand %p10144_p5, %p10365_p8  ;;  %p10153_p11 = por %p10152_p3, %p10151_p10 }
  0xa9   : > { %p10147_p9 = pneg %p10146_p7 }
  0xab   : > { %p10154_p12 = pnand %p10153_p11, %p10147_p9 }
  0xad   : > { %10157 = shalt.err (!%p10154_p12)
}
  0xae   : > { %9499 = dma.hbm_to_vmem [thread:$0]  (!%p10349_p6), %s10963_s8, 32, %s360_s30, [#allocation15]  }
  0xaf   : > { %s10513_s17 = sadd.s32 1, %s10238_s16   ;;  %s61_s10 = sadd.s32 1, %s10234_s15 }
  0xb0   : > { %s58_s25 = ssub.s32 %s10238_s16, %s10513_s17  ;;  %p68_p1 = scmp.ne.s32.totalorder %s10234_s15, %s10230_s14 }
  0xb1   : > { %p59_p8 = scmp.eq.s32.totalorder %s58_s25, 0  ;;  %p69_p4 = scmp.eq.s32.totalorder %s10238_s16, 0 }
  0xb2   : > { %p74_p13 = scmp.ne.s32.totalorder %s10230_s14, %s10226_s13  ;;  %p10974_p2 = scmp.eq.s32.totalorder %s10331_s19, 0 }
  0xb3   : > { %s10524_s2 = scalar_select %p59_p8, %s10234_s15, %s61_s10  }
  0xb4   : > { %p70_p0 = por %p69_p4, %p68_p1  ;;  %p10528_p5 = por %p10974_p2, %p74_p13 }
  0xb5   : > { %p9511_p7 = scmp.lt.s32.totalorder %s10238_s16, 2  ;;  %s379_s12 = sand.u32 1, %s10234_s15  }
  0xb6   : > { %s8305_s30 = sshll.u32 %s379_s12, 10  ;;  %s9353_s21 = sshll.u32 %s10238_s16, 14 }
  0xb7   : > { %s10538_s18 = scalar_lea.hbm %s10956_s1, %s9353_s21  ;;  %s383_s13 = scalar_lea.vmem [#allocation3], %s8305_s30 }
  0xb8   : > { %s391_s27 = sshll.u32 %s383_s13, 4  ;;  %p10542_p6 = pnand %p9511_p7, %p70_p0  ;;  %s10540_s27 = int_to_ptr.vmem [resolvable:$true] %s391_s27 }
  0xb9   : > { %s10546_s16 = scalar_lea.sflag [#allocation4], %s379_s12  ;;  %s10158_s11 = scalar_lea.hbm %s10538_s18, 16384 }
  0xba   : > { %p10159_p9 = scmp.ne.s32.totalorder %s10538_s18, %s10158_s11  ;;  %p10160_p10 = pneg %p10542_p6 }
  0xbb   : > { %s10163_s25 = scalar_lea.hbm %s10956_s1, 32768  ;;  %p10164_p12 = scmp.lt.u32.totalorder %s10538_s18, %s10956_s1 }
  0xbc   : > { %p10161_p3 = pnand %p10160_p10, %p10159_p9  ;;  %p10165_p8 = scmp.lt.u32.totalorder %s10163_s25, %s10158_s11 }
  0xbd   : > { %p10167_p4 = scmp.lt.u32.totalorder %s10158_s11, %s10538_s18 }
  0xbe   : > { %p10162_p11 = pneg %p10161_p3  ;;  %p10166_p1 = por %p10165_p8, %p10164_p12 }
  0xc0   : > { %p10168_p13 = por %p10167_p4, %p10166_p1 }
  0xc2   : > { %p10169_p0 = pnand %p10168_p13, %p10162_p11 }
  0xc4   : > { %10172 = shalt.err (!%p10169_p0)
}
  0xc5   : > { %s10173_s12 = scalar_lea.vmem %s10540_s27, 16384  ;;  %s10251_s21 = smov [#allocation3]  }
  0xc6   : > { %p10174_p2 = scmp.ne.s32.totalorder %s10540_s27, %s10173_s12  ;;  %s10178_s23 = sshll.u32 %s10251_s21, 4  ;;  %s10179_s23 = int_to_ptr.vmem [resolvable:$false] %s10178_s23 }
  0xc7   : > { %s10180_s26 = scalar_lea.vmem %s10179_s23, 32768  ;;  %p10181_p3 = scmp.lt.s32.totalorder %s10540_s27, %s10179_s23 }
  0xc8   : > { %p10176_p7 = pnand %p10174_p2, %p10160_p10  ;;  %p10182_p12 = scmp.lt.s32.totalorder %s10180_s26, %s10173_s12 }
  0xca   : > { %p10177_p9 = pneg %p10176_p7  ;;  %p10183_p8 = por %p10182_p12, %p10181_p3 }
  0xcc   : > { %p10184_p1 = pnand %p10183_p8, %p10177_p9 }
  0xce   : > { %10187 = shalt.err (!%p10184_p1)
}
  0xcf   : > { %s10252_s13 = smov 256   ;;  %s10253_s11 = smov 16  }
  0xd0   : > { %9503 = dma.hbm_to_vmem [thread:$0]  (!%p10542_p6), %s10538_s18, 16384, %s10540_s27, %s10546_s16, %s10252_s13, %s10252_s13, %s10253_s11  }
  0xd1   : > { %p10977_p10 = scmp.ne.s32.totalorder %s10970_s20, 0 }
  0xd2   : > { %s405_s22 = sand.u32 (!%p10977_p10), 1, %s10230_s14  }
  0xd3   : > { %403 = sbr.rel (%p10977_p10) target bundleno = 2236 (0x8bc), region = 56  ;;  %s8310_s29 = sshll.u32 (!%p10977_p10), %s405_s22, 10 }
  0xd4   : > { %s406_s25 = scalar_lea.sflag (!%p10977_p10), [#allocation4], %s405_s22  ;;  %s10577_s10 = scalar_lea.vmem (!%p10977_p10), [#allocation3], %s8310_s29 }
  0xda   : > { %10205 = dma.done.wait (%p10528_p5), %s406_s25, 16384  }
  0xdb   : > { %10207 = vsyncadd (%p10528_p5), %s406_s25, 4294950912  ;;  %p10978_p11 = scmp.eq.s32.totalorder %s10331_s19, 0 }
  0xdd   : > { %10209 = dma.done.wait (%p10978_p11), [#allocation6], 32832   ;;  %p10979_p6 = pmov %p10978_p11 }
  0xdf   : > { %10211 = vsyncadd (%p10979_p6), [#allocation6], 4294934464  ;;  %p10980_p4 = pmov %p10979_p6 }
  0xe1   : > { %10213 = dma.done.wait (%p10980_p4), [#allocation9], 65664   ;;  %p10981_p13 = pmov %p10980_p4 }
  0xe2   : > { %p10982_p0 = pmov %p10980_p4 }
  0xe3   : > { %10215 = vsyncadd (%p10981_p13), [#allocation9], 4294901632 }
  0xe4   : > { %10217 = dma.done.wait (%p10982_p0), [#allocation12], 16512   ;;  %p10983_p2 = pmov %p10982_p0 }
  0xe5   : > { %p10984_p5 = pmov %p10982_p0 }
  0xe6   : > { %10219 = vsyncadd (%p10983_p2), [#allocation12], 4294950784 }
  0xe7   : > { %10221 = dma.done.wait (%p10984_p5), [#allocation15], 32   ;;  %p10985_p7 = pmov %p10982_p0 }
  0xe8   : > { %s8318_s20 = sshll.u32 %s10331_s19, 2  ;;  %p10986_p3 = scmp.ne.s32.totalorder %s10331_s19, 0 }
  0xe9   : > { %10223 = vsyncadd (%p10985_p7), [#allocation15], 4294967264  ;;  %p475_p9 = scmp.lt.s32.totalorder %s8318_s20, 7  ;;  %v10254_v0 = vmov (!%p10986_p3), 0.0  }
  0xea   : > { %484 = sbr.rel (%p10986_p3) target bundleno = 241 (0xf1), region = 92  ;;  %485 = vst [vmem:[#allocation2] sm:$0xff] (!%p10986_p3), %v10254_v0  ;;  %486 = vst [vmem:[#allocation2 + $0x8] sm:$0xff] (!%p10986_p3), %v10254_v0 }
  0xeb   : > { %s10993_s20 = smov (!%p475_p9, %s8318_s20), 7  ;;  %487 = vst [vmem:[#allocation2 + $0x10] sm:$0xff] (!%p10986_p3), %v10254_v0  ;;  %488 = vst [vmem:[#allocation2 + $0x18] sm:$0xff] (!%p10986_p3), %v10254_v0 }
  0xec   : > { %s8319_s28 = sshll.u32 %s10993_s20, 2 }
  0xed   : > { %s10603_s24 = scalar_lea.vmem %s10955_s0, %s8319_s28 }
  0xf1 PF: > { %v9565_v1 = vld [vmem:[%s10577_s10 + $0x4] ss:$16 sps:$4 sm:$0xff]   ;;  %v9569_v3 = vld [vmem:[%s10577_s10] ss:$16 sps:$4 sm:$0xff]   ;;  %v494_v49 = vld [vmem:[%s10603_s24 + $0x8] sm:$0xff]  ;;  %p8453_p12 = scmp.ne.s32.totalorder %s10331_s19, 1 }
  0xf2   : > { %v9567_v2 = vld [vmem:[%s10577_s10 + $0x204] ss:$16 sps:$4 sm:$0xff]   ;;  %1277 = vmatprep.subr.bf16.mxu0 %v9565_v1  ;;  %v9570_v4 = vld [vmem:[%s10577_s10 + $0x200] ss:$16 sps:$4 sm:$0xff]   ;;  %v8324_v52 = vcombine.high %v494_v49, %v494_v49  ;;  %s10987_s21 = sld [smem:[#allocation22_spill]] (!%p8453_p12) }
  0xf3   : > { %1318 = vmatprep.subr.bf16.mxu1 %v9567_v2  ;;  %v9571_v5 = vld [vmem:[%s10577_s10 + $0x24] ss:$16 sps:$4 sm:$0xff]   ;;  %1278 = vmatpush1.bf16.msra.mxu0 %v9569_v3  ;;  %v9575_v7 = vld [vmem:[%s10577_s10 + $0x20] ss:$16 sps:$4 sm:$0xff]  }
  0xf4   : > { %1319 = vmatpush1.bf16.msra.mxu1 %v9570_v4  ;;  %v9573_v6 = vld [vmem:[%s10577_s10 + $0x224] ss:$16 sps:$4 sm:$0xff]   ;;  %1279 = vmatprep.subr.bf16.mxu0 %v9571_v5  ;;  %v9576_v8 = vld [vmem:[%s10577_s10 + $0x220] ss:$16 sps:$4 sm:$0xff]   ;;  %v9667_v5 = vld [vmem:[%s10577_s10 + $0xc] ss:$16 sps:$4 sm:$0xff]  }
  0xf5   : > { %1320 = vmatprep.subr.bf16.mxu1 %v9573_v6  ;;  %v9577_v9 = vld [vmem:[%s10577_s10 + $0x44] ss:$16 sps:$4 sm:$0xff]   ;;  %v9581_v11 = vld [vmem:[%s10577_s10 + $0x40] ss:$16 sps:$4 sm:$0xff]   ;;  %1350 = vmatprep.mubr.bf16.mxu1 %v8324_v52  ;;  %v9670_v6 = vld [vmem:[%s10577_s10 + $0x20c] ss:$16 sps:$4 sm:$0xff]  }
  0xf6   : > { %v9579_v10 = vld [vmem:[%s10577_s10 + $0x244] ss:$16 sps:$4 sm:$0xff]   ;;  %v9582_v12 = vld [vmem:[%s10577_s10 + $0x240] ss:$16 sps:$4 sm:$0xff]  }
  0xf7   : > { %1280 = vmatpush1.bf16.msra.mxu0 %v9575_v7  ;;  %v9583_v13 = vld [vmem:[%s10577_s10 + $0x64] ss:$16 sps:$4 sm:$0xff]   ;;  %v9587_v15 = vld [vmem:[%s10577_s10 + $0x60] ss:$16 sps:$4 sm:$0xff]  }
  0xf8   : > { %1321 = vmatpush1.bf16.msra.mxu1 %v9576_v8  ;;  %1281 = vmatprep.subr.bf16.mxu0 %v9577_v9  ;;  %v9585_v14 = vld [vmem:[%s10577_s10 + $0x264] ss:$16 sps:$4 sm:$0xff]   ;;  %v9588_v16 = vld [vmem:[%s10577_s10 + $0x260] ss:$16 sps:$4 sm:$0xff]   ;;  %v10680_v8 = vcombine.low %v494_v49, %v494_v49  ;;  %v9665_v9 = vld [vmem:[%s10577_s10 + $0x8] ss:$16 sps:$4 sm:$0xff]  }
  0xf9   : > { %1322 = vmatprep.subr.bf16.mxu1 %v9579_v10  ;;  %v9589_v17 = vld [vmem:[%s10577_s10 + $0x84] ss:$16 sps:$4 sm:$0xff]   ;;  %v9593_v19 = vld [vmem:[%s10577_s10 + $0x80] ss:$16 sps:$4 sm:$0xff]   ;;  %v9668_v10 = vld [vmem:[%s10577_s10 + $0x208] ss:$16 sps:$4 sm:$0xff]  }
  0xfa   : > { %v9591_v18 = vld [vmem:[%s10577_s10 + $0x284] ss:$16 sps:$4 sm:$0xff]   ;;  %v9594_v20 = vld [vmem:[%s10577_s10 + $0x280] ss:$16 sps:$4 sm:$0xff]   ;;  %v9725_v49 = vld [vmem:[%s10577_s10 + $0x148] ss:$16 sps:$4 sm:$0xff]  }
  0xfb   : > { %1282 = vmatpush1.bf16.msra.mxu0 %v9581_v11  ;;  %v9595_v21 = vld [vmem:[%s10577_s10 + $0xa4] ss:$16 sps:$4 sm:$0xff]   ;;  %v9599_v23 = vld [vmem:[%s10577_s10 + $0xa0] ss:$16 sps:$4 sm:$0xff]   ;;  %v9673_v11 = vld [vmem:[%s10577_s10 + $0x2c] ss:$16 sps:$4 sm:$0xff]  }
  0xfc   : > { %1323 = vmatpush1.bf16.msra.mxu1 %v9582_v12  ;;  %1283 = vmatprep.subr.bf16.mxu0 %v9583_v13  ;;  %v9597_v22 = vld [vmem:[%s10577_s10 + $0x2a4] ss:$16 sps:$4 sm:$0xff]   ;;  %v9600_v24 = vld [vmem:[%s10577_s10 + $0x2a0] ss:$16 sps:$4 sm:$0xff]   ;;  %v9676_v12 = vld [vmem:[%s10577_s10 + $0x22c] ss:$16 sps:$4 sm:$0xff]  }
  0xfd   : > { %1324 = vmatprep.subr.bf16.mxu1 %v9585_v14  ;;  %v9601_v25 = vld [vmem:[%s10577_s10 + $0xc4] ss:$16 sps:$4 sm:$0xff]   ;;  %v9605_v27 = vld [vmem:[%s10577_s10 + $0xc0] ss:$16 sps:$4 sm:$0xff]   ;;  %v9671_v13 = vld [vmem:[%s10577_s10 + $0x28] ss:$16 sps:$4 sm:$0xff]  }
  0xfe   : > { %v9603_v26 = vld [vmem:[%s10577_s10 + $0x2c4] ss:$16 sps:$4 sm:$0xff]   ;;  %v9606_v28 = vld [vmem:[%s10577_s10 + $0x2c0] ss:$16 sps:$4 sm:$0xff]   ;;  %v9674_v14 = vld [vmem:[%s10577_s10 + $0x228] ss:$16 sps:$4 sm:$0xff]  }
  0xff   : > { %1284 = vmatpush1.bf16.msra.mxu0 %v9587_v15  ;;  %v9607_v29 = vld [vmem:[%s10577_s10 + $0xe4] ss:$16 sps:$4 sm:$0xff]   ;;  %v9611_v31 = vld [vmem:[%s10577_s10 + $0xe0] ss:$16 sps:$4 sm:$0xff]   ;;  %v9679_v15 = vld [vmem:[%s10577_s10 + $0x4c] ss:$16 sps:$4 sm:$0xff]  }
 0x100   : > { %1325 = vmatpush1.bf16.msra.mxu1 %v9588_v16  ;;  %1285 = vmatprep.subr.bf16.mxu0 %v9589_v17  ;;  %v9609_v30 = vld [vmem:[%s10577_s10 + $0x2e4] ss:$16 sps:$4 sm:$0xff]   ;;  %v9612_v32 = vld [vmem:[%s10577_s10 + $0x2e0] ss:$16 sps:$4 sm:$0xff]   ;;  %v9682_v16 = vld [vmem:[%s10577_s10 + $0x24c] ss:$16 sps:$4 sm:$0xff]  }
 0x101   : > { %1326 = vmatprep.subr.bf16.mxu1 %v9591_v18  ;;  %v9613_v33 = vld [vmem:[%s10577_s10 + $0x104] ss:$16 sps:$4 sm:$0xff]   ;;  %v9617_v35 = vld [vmem:[%s10577_s10 + $0x100] ss:$16 sps:$4 sm:$0xff]   ;;  %v9677_v17 = vld [vmem:[%s10577_s10 + $0x48] ss:$16 sps:$4 sm:$0xff]  }
 0x102   : > { %v9615_v34 = vld [vmem:[%s10577_s10 + $0x304] ss:$16 sps:$4 sm:$0xff]   ;;  %v9618_v36 = vld [vmem:[%s10577_s10 + $0x300] ss:$16 sps:$4 sm:$0xff]   ;;  %v9680_v18 = vld [vmem:[%s10577_s10 + $0x248] ss:$16 sps:$4 sm:$0xff]  }
 0x103   : > { %1286 = vmatpush1.bf16.msra.mxu0 %v9593_v19  ;;  %v9619_v37 = vld [vmem:[%s10577_s10 + $0x124] ss:$16 sps:$4 sm:$0xff]   ;;  %v9623_v39 = vld [vmem:[%s10577_s10 + $0x120] ss:$16 sps:$4 sm:$0xff]   ;;  %v9685_v19 = vld [vmem:[%s10577_s10 + $0x6c] ss:$16 sps:$4 sm:$0xff]  }
 0x104   : > { %1327 = vmatpush1.bf16.msra.mxu1 %v9594_v20  ;;  %1287 = vmatprep.subr.bf16.mxu0 %v9595_v21  ;;  %v9621_v38 = vld [vmem:[%s10577_s10 + $0x324] ss:$16 sps:$4 sm:$0xff]   ;;  %v9624_v40 = vld [vmem:[%s10577_s10 + $0x320] ss:$16 sps:$4 sm:$0xff]   ;;  %v9688_v20 = vld [vmem:[%s10577_s10 + $0x26c] ss:$16 sps:$4 sm:$0xff]  }
 0x105   : > { %1328 = vmatprep.subr.bf16.mxu1 %v9597_v22  ;;  %v9625_v41 = vld [vmem:[%s10577_s10 + $0x144] ss:$16 sps:$4 sm:$0xff]   ;;  %v9629_v43 = vld [vmem:[%s10577_s10 + $0x140] ss:$16 sps:$4 sm:$0xff]   ;;  %v9683_v21 = vld [vmem:[%s10577_s10 + $0x68] ss:$16 sps:$4 sm:$0xff]  }
 0x106   : > { %v9627_v42 = vld [vmem:[%s10577_s10 + $0x344] ss:$16 sps:$4 sm:$0xff]   ;;  %v9630_v44 = vld [vmem:[%s10577_s10 + $0x340] ss:$16 sps:$4 sm:$0xff]   ;;  %v9686_v22 = vld [vmem:[%s10577_s10 + $0x268] ss:$16 sps:$4 sm:$0xff]  }
 0x107   : > { %1288 = vmatpush1.bf16.msra.mxu0 %v9599_v23  ;;  %v9631_v45 = vld [vmem:[%s10577_s10 + $0x164] ss:$16 sps:$4 sm:$0xff]   ;;  %v9635_v50 = vld [vmem:[%s10577_s10 + $0x160] ss:$16 sps:$4 sm:$0xff]   ;;  %v9691_v23 = vld [vmem:[%s10577_s10 + $0x8c] ss:$16 sps:$4 sm:$0xff]  }
 0x108   : > { %1329 = vmatpush1.bf16.msra.mxu1 %v9600_v24  ;;  %1289 = vmatprep.subr.bf16.mxu0 %v9601_v25  ;;  %v9633_v46 = vld [vmem:[%s10577_s10 + $0x364] ss:$16 sps:$4 sm:$0xff]   ;;  %v9636_v51 = vld [vmem:[%s10577_s10 + $0x360] ss:$16 sps:$4 sm:$0xff]   ;;  %v9694_v24 = vld [vmem:[%s10577_s10 + $0x28c] ss:$16 sps:$4 sm:$0xff]  }
 0x109   : > { %1330 = vmatprep.subr.bf16.mxu1 %v9603_v26  ;;  %v493_v47 = vld [vmem:[%s10603_s24] sm:$0xff]  ;;  %v9689_v25 = vld [vmem:[%s10577_s10 + $0x88] ss:$16 sps:$4 sm:$0xff]  }
 0x10a   : > { %v10654_v48 = vcombine.high %v493_v47, %v493_v47  ;;  %v9637_v53 = vld [vmem:[%s10577_s10 + $0x184] ss:$16 sps:$4 sm:$0xff]   ;;  %v9641_v55 = vld [vmem:[%s10577_s10 + $0x180] ss:$16 sps:$4 sm:$0xff]   ;;  %v10678_v7 = vcombine.low %v493_v47, %v493_v47  ;;  %v9692_v26 = vld [vmem:[%s10577_s10 + $0x288] ss:$16 sps:$4 sm:$0xff]  }
 0x10b   : > { %1290 = vmatpush1.bf16.msra.mxu0 %v9605_v27  ;;  %v9639_v54 = vld [vmem:[%s10577_s10 + $0x384] ss:$16 sps:$4 sm:$0xff]   ;;  %v9642_v56 = vld [vmem:[%s10577_s10 + $0x380] ss:$16 sps:$4 sm:$0xff]   ;;  %v9697_v27 = vld [vmem:[%s10577_s10 + $0xac] ss:$16 sps:$4 sm:$0xff]  }
 0x10c   : > { %1331 = vmatpush1.bf16.msra.mxu1 %v9606_v28  ;;  %1291 = vmatprep.subr.bf16.mxu0 %v9607_v29  ;;  %v9643_v57 = vld [vmem:[%s10577_s10 + $0x1a4] ss:$16 sps:$4 sm:$0xff]   ;;  %v9647_v59 = vld [vmem:[%s10577_s10 + $0x1a0] ss:$16 sps:$4 sm:$0xff]   ;;  %v9700_v28 = vld [vmem:[%s10577_s10 + $0x2ac] ss:$16 sps:$4 sm:$0xff]  }
 0x10d   : > { %1332 = vmatprep.subr.bf16.mxu1 %v9609_v30  ;;  %1309 = vmatprep.mubr.bf16.mxu0 %v10654_v48  ;;  %v9645_v58 = vld [vmem:[%s10577_s10 + $0x3a4] ss:$16 sps:$4 sm:$0xff]   ;;  %v9648_v60 = vld [vmem:[%s10577_s10 + $0x3a0] ss:$16 sps:$4 sm:$0xff]   ;;  %v9695_v29 = vld [vmem:[%s10577_s10 + $0xa8] ss:$16 sps:$4 sm:$0xff]  }
 0x10e   : > { %v9649_v61 = vld [vmem:[%s10577_s10 + $0x1c4] ss:$16 sps:$4 sm:$0xff]   ;;  %v9653_v63 = vld [vmem:[%s10577_s10 + $0x1c0] ss:$16 sps:$4 sm:$0xff]   ;;  %v9698_v30 = vld [vmem:[%s10577_s10 + $0x2a8] ss:$16 sps:$4 sm:$0xff]  }
 0x10f   : > { %1292 = vmatpush1.bf16.msra.mxu0 %v9611_v31  ;;  %v9651_v62 = vld [vmem:[%s10577_s10 + $0x3c4] ss:$16 sps:$4 sm:$0xff]   ;;  %v9654_v0 = vld [vmem:[%s10577_s10 + $0x3c0] ss:$16 sps:$4 sm:$0xff]   ;;  %v9703_v31 = vld [vmem:[%s10577_s10 + $0xcc] ss:$16 sps:$4 sm:$0xff]  }
 0x110   : > { %1333 = vmatpush1.bf16.msra.mxu1 %v9612_v32  ;;  %1293 = vmatprep.subr.bf16.mxu0 %v9613_v33  ;;  %v9655_v1 = vld [vmem:[%s10577_s10 + $0x1e4] ss:$16 sps:$4 sm:$0xff]   ;;  %v9659_v3 = vld [vmem:[%s10577_s10 + $0x1e0] ss:$16 sps:$4 sm:$0xff]   ;;  %v9706_v32 = vld [vmem:[%s10577_s10 + $0x2cc] ss:$16 sps:$4 sm:$0xff]  }
 0x111   : > { %1334 = vmatprep.subr.bf16.mxu1 %v9615_v34  ;;  %v9657_v2 = vld [vmem:[%s10577_s10 + $0x3e4] ss:$16 sps:$4 sm:$0xff]   ;;  %v9660_v4 = vld [vmem:[%s10577_s10 + $0x3e0] ss:$16 sps:$4 sm:$0xff]   ;;  %v9701_v33 = vld [vmem:[%s10577_s10 + $0xc8] ss:$16 sps:$4 sm:$0xff]  }
 0x112   : > { %v9704_v34 = vld [vmem:[%s10577_s10 + $0x2c8] ss:$16 sps:$4 sm:$0xff]   ;;  %v9727_v47 = vld [vmem:[%s10577_s10 + $0x14c] ss:$16 sps:$4 sm:$0xff]  }
 0x113   : > { %1294 = vmatpush1.bf16.msra.mxu0 %v9617_v35  ;;  %v9709_v35 = vld [vmem:[%s10577_s10 + $0xec] ss:$16 sps:$4 sm:$0xff]  }
 0x114   : > { %1335 = vmatpush1.bf16.msra.mxu1 %v9618_v36  ;;  %1295 = vmatprep.subr.bf16.mxu0 %v9619_v37  ;;  %v9712_v36 = vld [vmem:[%s10577_s10 + $0x2ec] ss:$16 sps:$4 sm:$0xff]   ;;  %v9707_v37 = vld [vmem:[%s10577_s10 + $0xe8] ss:$16 sps:$4 sm:$0xff]  }
 0x115   : > { %1336 = vmatprep.subr.bf16.mxu1 %v9621_v38  ;;  %v9710_v38 = vld [vmem:[%s10577_s10 + $0x2e8] ss:$16 sps:$4 sm:$0xff]  }
 0x117   : > { %1296 = vmatpush1.bf16.msra.mxu0 %v9623_v39  ;;  %v9715_v39 = vld [vmem:[%s10577_s10 + $0x10c] ss:$16 sps:$4 sm:$0xff]  }
 0x118   : > { %1337 = vmatpush1.bf16.msra.mxu1 %v9624_v40  ;;  %1297 = vmatprep.subr.bf16.mxu0 %v9625_v41  ;;  %v9718_v40 = vld [vmem:[%s10577_s10 + $0x30c] ss:$16 sps:$4 sm:$0xff]   ;;  %v9713_v41 = vld [vmem:[%s10577_s10 + $0x108] ss:$16 sps:$4 sm:$0xff]  }
 0x119   : > { %1338 = vmatprep.subr.bf16.mxu1 %v9627_v42  ;;  %v9716_v42 = vld [vmem:[%s10577_s10 + $0x308] ss:$16 sps:$4 sm:$0xff]  }
 0x11b   : > { %1298 = vmatpush1.bf16.msra.mxu0 %v9629_v43  ;;  %v9721_v43 = vld [vmem:[%s10577_s10 + $0x12c] ss:$16 sps:$4 sm:$0xff]  }
 0x11c   : > { %1339 = vmatpush1.bf16.msra.mxu1 %v9630_v44  ;;  %1299 = vmatprep.subr.bf16.mxu0 %v9631_v45  ;;  %v9724_v44 = vld [vmem:[%s10577_s10 + $0x32c] ss:$16 sps:$4 sm:$0xff]   ;;  %v9719_v45 = vld [vmem:[%s10577_s10 + $0x128] ss:$16 sps:$4 sm:$0xff]  }
 0x11d   : > { %1340 = vmatprep.subr.bf16.mxu1 %v9633_v46  ;;  %v9722_v46 = vld [vmem:[%s10577_s10 + $0x328] ss:$16 sps:$4 sm:$0xff]  }
 0x11f   : > { %1300 = vmatpush1.bf16.msra.mxu0 %v9635_v50  ;;  %v9728_v50 = vld [vmem:[%s10577_s10 + $0x348] ss:$16 sps:$4 sm:$0xff]  }
 0x120   : > { %1341 = vmatpush1.bf16.msra.mxu1 %v9636_v51  ;;  %1301 = vmatprep.subr.bf16.mxu0 %v9637_v53  ;;  %v9733_v51 = vld [vmem:[%s10577_s10 + $0x16c] ss:$16 sps:$4 sm:$0xff]   ;;  %v9731_v53 = vld [vmem:[%s10577_s10 + $0x168] ss:$16 sps:$4 sm:$0xff]  }
 0x121   : > { %1342 = vmatprep.subr.bf16.mxu1 %v9639_v54  ;;  %v9734_v54 = vld [vmem:[%s10577_s10 + $0x368] ss:$16 sps:$4 sm:$0xff]  }
 0x123   : > { %1302 = vmatpush1.bf16.msra.mxu0 %v9641_v55  ;;  %v9739_v55 = vld [vmem:[%s10577_s10 + $0x18c] ss:$16 sps:$4 sm:$0xff]  }
 0x124   : > { %1343 = vmatpush1.bf16.msra.mxu1 %v9642_v56  ;;  %1303 = vmatprep.subr.bf16.mxu0 %v9643_v57  ;;  %v9742_v56 = vld [vmem:[%s10577_s10 + $0x38c] ss:$16 sps:$4 sm:$0xff]   ;;  %v9737_v57 = vld [vmem:[%s10577_s10 + $0x188] ss:$16 sps:$4 sm:$0xff]  }
 0x125   : > { %1344 = vmatprep.subr.bf16.mxu1 %v9645_v58  ;;  %v9740_v58 = vld [vmem:[%s10577_s10 + $0x388] ss:$16 sps:$4 sm:$0xff]  }
 0x127   : > { %1304 = vmatpush1.bf16.msra.mxu0 %v9647_v59  ;;  %v9745_v59 = vld [vmem:[%s10577_s10 + $0x1ac] ss:$16 sps:$4 sm:$0xff]  }
 0x128   : > { %1345 = vmatpush1.bf16.msra.mxu1 %v9648_v60  ;;  %1305 = vmatprep.subr.bf16.mxu0 %v9649_v61  ;;  %v9748_v60 = vld [vmem:[%s10577_s10 + $0x3ac] ss:$16 sps:$4 sm:$0xff]   ;;  %v9743_v61 = vld [vmem:[%s10577_s10 + $0x1a8] ss:$16 sps:$4 sm:$0xff]  }
 0x129   : > { %1346 = vmatprep.subr.bf16.mxu1 %v9651_v62  ;;  %v9746_v62 = vld [vmem:[%s10577_s10 + $0x3a8] ss:$16 sps:$4 sm:$0xff]  }
 0x12b   : > { %1306 = vmatpush1.bf16.msra.mxu0 %v9653_v63  ;;  %v9751_v63 = vld [vmem:[%s10577_s10 + $0x1cc] ss:$16 sps:$4 sm:$0xff]  }
 0x12c   : > { %1347 = vmatpush1.bf16.msra.mxu1 %v9654_v0  ;;  %1307 = vmatprep.subr.bf16.mxu0 %v9655_v1  ;;  %v9754_v0 = vld [vmem:[%s10577_s10 + $0x3cc] ss:$16 sps:$4 sm:$0xff]   ;;  %v9749_v1 = vld [vmem:[%s10577_s10 + $0x1c8] ss:$16 sps:$4 sm:$0xff]  }
 0x12d   : > { %1348 = vmatprep.subr.bf16.mxu1 %v9657_v2  ;;  %v9752_v2 = vld [vmem:[%s10577_s10 + $0x3c8] ss:$16 sps:$4 sm:$0xff]  }
 0x12f   : > { %1308 = vmatpush1.bf16.msra.mxu0 %v9659_v3  ;;  %v9757_v3 = vld [vmem:[%s10577_s10 + $0x1ec] ss:$16 sps:$4 sm:$0xff]  }
 0x130   : > { %1349 = vmatpush1.bf16.msra.mxu1 %v9660_v4  ;;  %1359 = vmatprep.subr.bf16.mxu0 %v9667_v5  ;;  %v9760_v4 = vld [vmem:[%s10577_s10 + $0x3ec] ss:$16 sps:$4 sm:$0xff]   ;;  %v9755_v5 = vld [vmem:[%s10577_s10 + $0x1e8] ss:$16 sps:$4 sm:$0xff]  }
 0x131   : > { %1400 = vmatprep.subr.bf16.mxu1 %v9670_v6  ;;  %v9758_v6 = vld [vmem:[%s10577_s10 + $0x3e8] ss:$16 sps:$4 sm:$0xff]  }
 0x132   : > { %1310 = vmatmul.mubr.bf16.vlgmr.msra.gmra.mrb[0].mxu0 %v10678_v7 }
 0x133   : > { %1351 = vmatmul.mubr.bf16.vlgmr.msra.gmra.mrb[0].mxu1 %v10680_v8  ;;  %1360 = vmatpush1.bf16.msra.mxu0 %v9665_v9 }
 0x134   : > { %1401 = vmatpush1.bf16.msra.mxu1 %v9668_v10  ;;  %1361 = vmatprep.subr.bf16.mxu0 %v9673_v11  ;;  %v489_v10 = vld [vmem:[#allocation2] sm:$0xff] }
 0x135   : > { %1402 = vmatprep.subr.bf16.mxu1 %v9676_v12  ;;  %1391 = vmatprep.mubr.bf16.mxu0 %v10654_v48  ;;  %v9730_v48 = vld [vmem:[%s10577_s10 + $0x34c] ss:$16 sps:$4 sm:$0xff]  }
 0x136   : > { %1432 = vmatprep.mubr.bf16.mxu1 %v8324_v52  ;;  %v9736_v52 = vld [vmem:[%s10577_s10 + $0x36c] ss:$16 sps:$4 sm:$0xff]  }
 0x137   : > { %1362 = vmatpush1.bf16.msra.mxu0 %v9671_v13 }
 0x138   : > { %1403 = vmatpush1.bf16.msra.mxu1 %v9674_v14  ;;  %1363 = vmatprep.subr.bf16.mxu0 %v9679_v15  ;;  %v490_v14 = vld [vmem:[#allocation2 + $0x8] sm:$0xff] }
 0x139   : > { %1404 = vmatprep.subr.bf16.mxu1 %v9682_v16 }
 0x13b   : > { %1364 = vmatpush1.bf16.msra.mxu0 %v9677_v17 }
 0x13c   : > { %1405 = vmatpush1.bf16.msra.mxu1 %v9680_v18  ;;  %1365 = vmatprep.subr.bf16.mxu0 %v9685_v19 }
 0x13d   : > { %1406 = vmatprep.subr.bf16.mxu1 %v9688_v20 }
 0x13f   : > { %1366 = vmatpush1.bf16.msra.mxu0 %v9683_v21 }
 0x140   : > { %1407 = vmatpush1.bf16.msra.mxu1 %v9686_v22  ;;  %1367 = vmatprep.subr.bf16.mxu0 %v9691_v23 }
 0x141   : > { %1408 = vmatprep.subr.bf16.mxu1 %v9694_v24 }
 0x143   : > { %1368 = vmatpush1.bf16.msra.mxu0 %v9689_v25 }
 0x144   : > { %1409 = vmatpush1.bf16.msra.mxu1 %v9692_v26  ;;  %1369 = vmatprep.subr.bf16.mxu0 %v9697_v27  ;;  %v492_v26 = vld [vmem:[#allocation2 + $0x18] sm:$0xff] }
 0x145   : > { %1410 = vmatprep.subr.bf16.mxu1 %v9700_v28 }
 0x147   : > { %1370 = vmatpush1.bf16.msra.mxu0 %v9695_v29 }
 0x148   : > { %1411 = vmatpush1.bf16.msra.mxu1 %v9698_v30  ;;  %1371 = vmatprep.subr.bf16.mxu0 %v9703_v31 }
 0x149   : > { %1412 = vmatprep.subr.bf16.mxu1 %v9706_v32 }
 0x14b   : > { %1372 = vmatpush1.bf16.msra.mxu0 %v9701_v33 }
 0x14c   : > { %1413 = vmatpush1.bf16.msra.mxu1 %v9704_v34  ;;  %1373 = vmatprep.subr.bf16.mxu0 %v9709_v35  ;;  %v1491_v35 = vld [vmem:[#allocation7] sm:$0xff] (!%p8453_p12) }
 0x14d   : > { %1414 = vmatprep.subr.bf16.mxu1 %v9712_v36  ;;  %v1495_v36 = vld [vmem:[#allocation7 + $0x20] sm:$0xff] (!%p8453_p12) }
 0x14f   : > { %1374 = vmatpush1.bf16.msra.mxu0 %v9707_v37  ;;  %v1499_v37 = vld [vmem:[#allocation7 + $0x40] sm:$0xff] (!%p8453_p12) }
 0x150   : > { %1415 = vmatpush1.bf16.msra.mxu1 %v9710_v38  ;;  %1375 = vmatprep.subr.bf16.mxu0 %v9715_v39  ;;  %v1459_v38 = vlaneseq (!%p8453_p12)  ;;  %v8455_v39 = vcombine.high (!%p8453_p12), %v1491_v35, %v1495_v36 }
 0x151   : > { %1416 = vmatprep.subr.bf16.mxu1 %v9718_v40  ;;  %v8454_v40 = vcombine.low (!%p8453_p12), %v1491_v35, %v1495_v36  ;;  %v1571_v36 = vld [vmem:[#allocation7 + $0x280] sm:$0xff] (!%p8453_p12) }
 0x153   : > { %1376 = vmatpush1.bf16.msra.mxu0 %v9713_v41  ;;  %v1503_v41 = vld [vmem:[#allocation7 + $0x60] sm:$0xff] (!%p8453_p12) }
 0x154   : > { %1417 = vmatpush1.bf16.msra.mxu1 %v9716_v42  ;;  %1377 = vmatprep.subr.bf16.mxu0 %v9721_v43  ;;  %v8463_v42 = vcombine.high (!%p8453_p12), %v1499_v37, %v1503_v41  ;;  %v1507_v43 = vld [vmem:[#allocation7 + $0x80] sm:$0xff] (!%p8453_p12) }
 0x155   : > { %1418 = vmatprep.subr.bf16.mxu1 %v9724_v44  ;;  %v1511_v44 = vld [vmem:[#allocation7 + $0xa0] sm:$0xff] (!%p8453_p12) }
 0x157   : > { %1378 = vmatpush1.bf16.msra.mxu0 %v9719_v45  ;;  %v8462_v45 = vcombine.low (!%p8453_p12), %v1499_v37, %v1503_v41  ;;  %v1575_v37 = vld [vmem:[#allocation7 + $0x2a0] sm:$0xff] (!%p8453_p12) }
 0x158   : > { %1419 = vmatpush1.bf16.msra.mxu1 %v9722_v46  ;;  %1379 = vmatprep.subr.bf16.mxu0 %v9727_v47  ;;  %v10751_v46 = vshrl.u32 (!%p8453_p12), %v1459_v38, 7  ;;  %v8471_v47 = vcombine.high (!%p8453_p12), %v1507_v43, %v1511_v44 }
 0x159   : > { %1420 = vmatprep.subr.bf16.mxu1 %v9730_v48  ;;  %v1515_v48 = vld [vmem:[#allocation7 + $0xc0] sm:$0xff] (!%p8453_p12) }
 0x15b   : > { %1380 = vmatpush1.bf16.msra.mxu0 %v9725_v49  ;;  %v1519_v49 = vld [vmem:[#allocation7 + $0xe0] sm:$0xff] (!%p8453_p12) }
 0x15c   : > { %1421 = vmatpush1.bf16.msra.mxu1 %v9728_v50  ;;  %1381 = vmatprep.subr.bf16.mxu0 %v9733_v51  ;;  %v8470_v50 = vcombine.low (!%p8453_p12), %v1507_v43, %v1511_v44  ;;  %v10754_v51 = vsub.s32 (!%p8453_p12), 1, %v10751_v46  ;;  %v1537_v43 = vld [vmem:[#allocation7 + $0x170] sm:$0xff] (!%p8453_p12)  ;;  %v8535_v44 = vcombine.high (!%p8453_p12), %v1571_v36, %v1575_v37 }
 0x15d   : > { %1422 = vmatprep.subr.bf16.mxu1 %v9736_v52  ;;  %v8479_v52 = vcombine.high (!%p8453_p12), %v1515_v48, %v1519_v49 }
 0x15f   : > { %1382 = vmatpush1.bf16.msra.mxu0 %v9731_v53  ;;  %v1523_v53 = vld [vmem:[#allocation7 + $0x100] sm:$0xff] (!%p8453_p12) }
 0x160   : > { %1423 = vmatpush1.bf16.msra.mxu1 %v9734_v54  ;;  %1383 = vmatprep.subr.bf16.mxu0 %v9739_v55  ;;  %v1527_v54 = vld [vmem:[#allocation7 + $0x120] sm:$0xff] (!%p8453_p12) }
 0x161   : > { %1424 = vmatprep.subr.bf16.mxu1 %v9742_v56  ;;  %v10756_v56 = vld [vmem:[#allocation5] sm:$0xf] (!%p8453_p12) }
 0x163   : > { %1384 = vmatpush1.bf16.msra.mxu0 %v9737_v57  ;;  %v8478_v57 = vcombine.low (!%p8453_p12), %v1515_v48, %v1519_v49 }
 0x164   : > { %1425 = vmatpush1.bf16.msra.mxu1 %v9740_v58  ;;  %1385 = vmatprep.subr.bf16.mxu0 %v9745_v59  ;;  %v1466_v58 = vrot.slane (!%p8453_p12), %v10756_v56, %v10754_v51  ;;  %v8487_v59 = vcombine.high (!%p8453_p12), %v1523_v53, %v1527_v54 }
 0x165   : > { %1426 = vmatprep.subr.bf16.mxu1 %v9748_v60  ;;  %v1531_v60 = vld [vmem:[#allocation7 + $0x140] sm:$0xff] (!%p8453_p12) }
 0x167   : > { %1386 = vmatpush1.bf16.msra.mxu0 %v9743_v61  ;;  %v1535_v61 = vld [vmem:[#allocation7 + $0x160] sm:$0xff] (!%p8453_p12) }
 0x168   : > { %1427 = vmatpush1.bf16.msra.mxu1 %v9746_v62  ;;  %1387 = vmatprep.subr.bf16.mxu0 %v9751_v63  ;;  %v8486_v63 = vcombine.low (!%p8453_p12), %v1523_v53, %v1527_v54  ;;  %v1545_v53 = vld [vmem:[#allocation7 + $0x1b0] sm:$0xff] (!%p8453_p12) }
 0x169   : > { %1428 = vmatprep.subr.bf16.mxu1 %v9754_v0 }
 0x16b   : > { %1388 = vmatpush1.bf16.msra.mxu0 %v9749_v1  ;;  %v8495_v1 = vcombine.high (!%p8453_p12), %v1531_v60, %v1535_v61 }
 0x16c   : > { %1429 = vmatpush1.bf16.msra.mxu1 %v9752_v2  ;;  %1389 = vmatprep.subr.bf16.mxu0 %v9757_v3  ;;  %v1539_v2 = vld [vmem:[#allocation7 + $0x180] sm:$0xff] (!%p8453_p12) }
 0x16d   : > { %1430 = vmatprep.subr.bf16.mxu1 %v9760_v4  ;;  %v1543_v3 = vld [vmem:[#allocation7 + $0x1a0] sm:$0xff] (!%p8453_p12) }
 0x16f   : > { %1390 = vmatpush1.bf16.msra.mxu0 %v9755_v5  ;;  %v8494_v5 = vcombine.low (!%p8453_p12), %v1531_v60, %v1535_v61  ;;  %v1549_v61 = vld [vmem:[#allocation7 + $0x1d0] sm:$0xff] (!%p8453_p12) }
 0x170   : > { %1431 = vmatpush1.bf16.msra.mxu1 %v9758_v6  ;;  %v8503_v6 = vcombine.high (!%p8453_p12), %v1539_v2, %v1543_v3 }
 0x171   : > { %3069 = vmatprep.subr.bf16.mxu1 (!%p8453_p12), %v8455_v39 }
 0x172   : > { %1392 = vmatmul.mubr.bf16.vlgmr.msra.gmra.mrb[4].mxu0 %v10678_v7  ;;  %v491_v7 = vld [vmem:[#allocation2 + $0x10] sm:$0xff] }
 0x173   : > { %1433 = vmatmul.mubr.bf16.vlgmr.msra.gmra.mrb[4].mxu1 %v10680_v8 }
 0x174   : > { %3070 = vmatpush1.bf16.msra.mxu1 (!%p8453_p12), %v8454_v40 }
 0x175   : > { %3071 = vmatprep.subr.bf16.mxu1 (!%p8453_p12), %v8463_v42  ;;  %v1533_v42 = vld [vmem:[#allocation7 + $0x150] sm:$0xff] (!%p8453_p12) }
 0x176   : > { %v8499_v49 = vcombine.high (!%p8453_p12), %v1533_v42, %v1537_v43 }
 0x178   : > { %3072 = vmatpush1.bf16.msra.mxu1 (!%p8453_p12), %v8462_v45  ;;  %v1579_v45 = vld [vmem:[#allocation7 + $0x2c0] sm:$0xff] (!%p8453_p12) }
 0x179   : > { %3073 = vmatprep.subr.bf16.mxu1 (!%p8453_p12), %v8471_v47  ;;  %v1583_v47 = vld [vmem:[#allocation7 + $0x2e0] sm:$0xff] (!%p8453_p12) }
 0x17a   : > { %v8543_v54 = vcombine.high (!%p8453_p12), %v1579_v45, %v1583_v47  ;;  %v8542_v60 = vcombine.low (!%p8453_p12), %v1579_v45, %v1583_v47  ;;  %v1631_v45 = vld [vmem:[#allocation7 + $0x460] sm:$0xff] (!%p8453_p12) }
 0x17c   : > { %3074 = vmatpush1.bf16.msra.mxu1 (!%p8453_p12), %v8470_v50  ;;  %v8534_v50 = vcombine.low (!%p8453_p12), %v1571_v36, %v1575_v37 }
 0x17d   : > { %3075 = vmatprep.subr.bf16.mxu1 (!%p8453_p12), %v8479_v52  ;;  %v1541_v52 = vld [vmem:[#allocation7 + $0x190] sm:$0xff] (!%p8453_p12) }
 0x180   : > { %3076 = vmatpush1.bf16.msra.mxu1 (!%p8453_p12), %v8478_v57  ;;  %v1591_v57 = vld [vmem:[#allocation7 + $0x320] sm:$0xff] (!%p8453_p12) }
 0x181   : > { %3077 = vmatprep.subr.bf16.mxu1 (!%p8453_p12), %v8487_v59  ;;  %v8507_v59 = vcombine.high (!%p8453_p12), %v1541_v52, %v1545_v53 }
 0x184   : > { %3078 = vmatpush1.bf16.msra.mxu1 (!%p8453_p12), %v8486_v63 }
 0x185   : > { %3079 = vmatprep.subr.bf16.mxu1 (!%p8453_p12), %v8495_v1  ;;  %v1599_v1 = vld [vmem:[#allocation7 + $0x360] sm:$0xff] (!%p8453_p12) }
 0x188   : > { %3080 = vmatpush1.bf16.msra.mxu1 (!%p8453_p12), %v8494_v5 }
 0x189   : > { %3081 = vmatprep.subr.bf16.mxu1 (!%p8453_p12), %v8503_v6 }
 0x205   : > { %v1311_v9 = vpop.f32.mrb[0].mxu0 }
 0x206   : > { %v1352_v11 = vpop.f32.mrb[0].mxu1  ;;  %v1313_v13 = vpop.f32.mrb[1].mxu0 }
 0x207   : > { %v1353_v12 = vadd.f32 %v1352_v11, %v1311_v9  ;;  %v1354_v15 = vpop.f32.mrb[1].mxu1  ;;  %v1315_v17 = vpop.f32.mrb[2].mxu0  ;;  %v1547_v9 = vld [vmem:[#allocation7 + $0x1c0] sm:$0xff] (!%p8453_p12)  ;;  %v1493_v11 = vld [vmem:[#allocation7 + $0x10] sm:$0xff] (!%p8453_p12) }
 0x208   : > { %v1355_v16 = vadd.f32 %v1354_v15, %v1313_v13  ;;  %v1356_v18 = vpop.f32.mrb[2].mxu1  ;;  %v1316_v20 = vpop.f32.mrb[3].mxu0  ;;  %v8502_v15 = vcombine.low (!%p8453_p12), %v1539_v2, %v1543_v3  ;;  %v1505_v17 = vld [vmem:[#allocation7 + $0x70] sm:$0xff] (!%p8453_p12)  ;;  %v8506_v2 = vcombine.low (!%p8453_p12), %v1541_v52, %v1545_v53  ;;  %v10765_v3 = vsub.s32 (!%p8453_p12), 0, %v10751_v46 }
 0x209   : > { %v1441_v19 = vadd.f32 %v1353_v12, %v489_v10  ;;  %v1357_v21 = vpop.f32.mrb[3].mxu1  ;;  %v1551_v10 = vld [vmem:[#allocation7 + $0x1e0] sm:$0xff] (!%p8453_p12)  ;;  %v1497_v12 = vld [vmem:[#allocation7 + $0x30] sm:$0xff] (!%p8453_p12) }
 0x20a   : > { %v1442_v22 = vadd.f32 %v1355_v16, %v490_v14  ;;  %v8459_v13 = vcombine.high (!%p8453_p12), %v1493_v11, %v1497_v12  ;;  %v8458_v14 = vcombine.low (!%p8453_p12), %v1493_v11, %v1497_v12  ;;  %v1501_v16 = vld [vmem:[#allocation7 + $0x50] sm:$0xff] (!%p8453_p12)  ;;  %v8511_v18 = vcombine.high (!%p8453_p12), %v1547_v9, %v1551_v10  ;;  %v1555_v21 = vld [vmem:[#allocation7 + $0x200] sm:$0xff] (!%p8453_p12)  ;;  %3082 = vmatpush1.bf16.msra.mxu1 (!%p8453_p12), %v8502_v15 }
 0x20b   : > { %1445 = vst [vmem:[#allocation2] sm:$0xff] %v1441_v19  ;;  %v8467_v19 = vcombine.high (!%p8453_p12), %v1501_v16, %v1505_v17  ;;  %v1509_v20 = vld [vmem:[#allocation7 + $0x90] sm:$0xff] (!%p8453_p12) }
 0x20c   : > { %1446 = vst [vmem:[#allocation2 + $0x8] sm:$0xff] %v1442_v22  ;;  %3233 = vmatprep.subr.bf16.mxu0 (!%p8453_p12), %v8459_v13  ;;  %v1559_v22 = vld [vmem:[#allocation7 + $0x220] sm:$0xff] (!%p8453_p12)  ;;  %3083 = vmatprep.subr.bf16.mxu1 (!%p8453_p12), %v8511_v18  ;;  %v1557_v11 = vld [vmem:[#allocation7 + $0x210] sm:$0xff] (!%p8453_p12) }
 0x20d   : > { %3234 = vmatpush1.bf16.msra.mxu0 (!%p8453_p12), %v8458_v14  ;;  %v1561_v12 = vld [vmem:[#allocation7 + $0x230] sm:$0xff] (!%p8453_p12)  ;;  %v1607_v14 = vld [vmem:[#allocation7 + $0x3a0] sm:$0xff] (!%p8453_p12) }
 0x20e   : > { %3235 = vmatprep.subr.bf16.mxu0 (!%p8453_p12), %v8467_v19  ;;  %v8523_v19 = vcombine.high (!%p8453_p12), %v1557_v11, %v1561_v12  ;;  %v1589_v53 = vld [vmem:[#allocation7 + $0x310] sm:$0xff] (!%p8453_p12) }
 0x212   : > { %v1453_v15 = vld [vmem:[#allocation2] sm:$0xff] (!%p8453_p12) }
 0x213   : > { %v1454_v55 = vld [vmem:[#allocation2 + $0x8] sm:$0xff] (!%p8453_p12) }
 0x214   : > { %v1480_v62 = vadd.f32 (!%p8453_p12), %v1466_v58, %v1454_v55  ;;  %v1587_v55 = vld [vmem:[#allocation7 + $0x300] sm:$0xff] (!%p8453_p12)  ;;  %v8498_v58 = vcombine.low (!%p8453_p12), %v1533_v42, %v1537_v43  ;;  %v1585_v42 = vld [vmem:[#allocation7 + $0x2f0] sm:$0xff] (!%p8453_p12) }
 0x215   : > { %v8551_v63 = vcombine.high (!%p8453_p12), %v1587_v55, %v1591_v57  ;;  %v8550_v6 = vcombine.low (!%p8453_p12), %v1587_v55, %v1591_v57  ;;  %v1635_v57 = vld [vmem:[#allocation7 + $0x480] sm:$0xff] (!%p8453_p12) }
 0x216   : > { %v1484_v0 = vmax.f32 (!%p8453_p12), %v1480_v62, 0.0  ;;  %v1553_v62 = vld [vmem:[#allocation7 + $0x1f0] sm:$0xff] (!%p8453_p12) }
 0x217   : > { %v8515_v5 = vcombine.high (!%p8453_p12), %v1549_v61, %v1553_v62 }
 0x218   : > { %v10760_v4 = vpack.c.bf16 (!%p8453_p12), %v1484_v0, %v1484_v0  ;;  %v1595_v0 = vld [vmem:[#allocation7 + $0x340] sm:$0xff] (!%p8453_p12) }
 0x219   : > { %v8559_v13 = vcombine.high (!%p8453_p12), %v1595_v0, %v1599_v1 }
 0x21a   : > { %3101 = vmatprep.mubr.bf16.mxu1 (!%p8453_p12), %v10760_v4  ;;  %3265 = vmatprep.mubr.bf16.mxu0 (!%p8453_p12), %v10760_v4 }
 0x245   : > { %v1393_v23 = vpop.f32.mrb[4].mxu0 }
 0x246   : > { %v1434_v24 = vpop.f32.mrb[4].mxu1  ;;  %v1395_v25 = vpop.f32.mrb[5].mxu0  ;;  %1452 = sbr.rel (%p8453_p12) target bundleno = 2236 (0x8bc), region = 96 }
 0x247   : > { %v1435_v8 = vadd.f32 %v1434_v24, %v1393_v23  ;;  %v1436_v27 = vpop.f32.mrb[5].mxu1  ;;  %v1397_v29 = vpop.f32.mrb[6].mxu0  ;;  %v8466_v23 = vcombine.low (!%p8453_p12), %v1501_v16, %v1505_v17  ;;  %v8514_v16 = vcombine.low (!%p8453_p12), %v1549_v61, %v1553_v62  ;;  %v1462_v17 = vrot.slane (!%p8453_p12), %v10756_v56, %v10765_v3  ;;  %v1597_v62 = vld [vmem:[#allocation7 + $0x350] sm:$0xff] (!%p8453_p12) }
 0x248   : > { %v1437_v28 = vadd.f32 %v1436_v27, %v1395_v25  ;;  %v1438_v30 = vpop.f32.mrb[6].mxu1  ;;  %v1398_v32 = vpop.f32.mrb[7].mxu0  ;;  %v1517_v25 = vld [vmem:[#allocation7 + $0xd0] sm:$0xff] (!%p8453_p12)  ;;  %v8519_v27 = vcombine.high (!%p8453_p12), %v1555_v21, %v1559_v22  ;;  %v1567_v29 = vld [vmem:[#allocation7 + $0x260] sm:$0xff] (!%p8453_p12) }
 0x249   : > { %v1443_v31 = vadd.f32 %v1435_v8, %v491_v7  ;;  %v1439_v33 = vpop.f32.mrb[7].mxu1  ;;  %v1513_v7 = vld [vmem:[#allocation7 + $0xb0] sm:$0xff] (!%p8453_p12)  ;;  %v8510_v8 = vcombine.low (!%p8453_p12), %v1547_v9, %v1551_v10  ;;  %3236 = vmatpush1.bf16.msra.mxu0 (!%p8453_p12), %v8466_v23  ;;  %v8518_v32 = vcombine.low (!%p8453_p12), %v1555_v21, %v1559_v22  ;;  %v1603_v9 = vld [vmem:[#allocation7 + $0x380] sm:$0xff] (!%p8453_p12)  ;;  %v10768_v10 = vsub.s32 (!%p8453_p12), 3, %v10751_v46 }
 0x24a   : > { %v1444_v34 = vadd.f32 %v1437_v28, %v492_v26  ;;  %v8475_v24 = vcombine.high (!%p8453_p12), %v1509_v20, %v1513_v7  ;;  %v1521_v26 = vld [vmem:[#allocation7 + $0xf0] sm:$0xff] (!%p8453_p12)  ;;  %v1563_v28 = vld [vmem:[#allocation7 + $0x240] sm:$0xff] (!%p8453_p12)  ;;  %v8474_v30 = vcombine.low (!%p8453_p12), %v1509_v20, %v1513_v7  ;;  %v8558_v20 = vcombine.low (!%p8453_p12), %v1595_v0, %v1599_v1 }
 0x24b   : > { %1447 = vst [vmem:[#allocation2 + $0x10] sm:$0xff] %v1443_v31  ;;  %v8483_v31 = vcombine.high (!%p8453_p12), %v1517_v25, %v1521_v26  ;;  %3084 = vmatpush1.bf16.msra.mxu1 (!%p8453_p12), %v8510_v8  ;;  %v1525_v33 = vld [vmem:[#allocation7 + $0x110] sm:$0xff] (!%p8453_p12)  ;;  %v8527_v35 = vcombine.high (!%p8453_p12), %v1563_v28, %v1567_v29  ;;  %v8482_v39 = vcombine.low (!%p8453_p12), %v1517_v25, %v1521_v26  ;;  %v1615_v8 = vld [vmem:[#allocation7 + $0x3e0] sm:$0xff] (!%p8453_p12) }
 0x24c   : > { %1448 = vst [vmem:[#allocation2 + $0x18] sm:$0xff] %v1444_v34  ;;  %3237 = vmatprep.subr.bf16.mxu0 (!%p8453_p12), %v8475_v24  ;;  %v1529_v34 = vld [vmem:[#allocation7 + $0x130] sm:$0xff] (!%p8453_p12)  ;;  %3085 = vmatprep.subr.bf16.mxu1 (!%p8453_p12), %v8519_v27  ;;  %v8526_v41 = vcombine.low (!%p8453_p12), %v1563_v28, %v1567_v29  ;;  %v1474_v21 = vrot.slane (!%p8453_p12), %v10756_v56, %v10768_v10  ;;  %v1611_v24 = vld [vmem:[#allocation7 + $0x3c0] sm:$0xff] (!%p8453_p12) }
 0x24d   : > { %3238 = vmatpush1.bf16.msra.mxu0 %v8474_v30  ;;  %v8491_v40 = vcombine.high %v1525_v33, %v1529_v34  ;;  %v8490_v48 = vcombine.low %v1525_v33, %v1529_v34  ;;  %v1565_v22 = vld [vmem:[#allocation7 + $0x250] sm:$0xff]  ;;  %v8567_v7 = vcombine.high %v1603_v9, %v1607_v14  ;;  %v8522_v25 = vcombine.low %v1557_v11, %v1561_v12  ;;  %v1619_v33 = vld [vmem:[#allocation7 + $0x400] sm:$0xff] }
 0x24e   : > { %3239 = vmatprep.subr.bf16.mxu0 %v8483_v31  ;;  %v1569_v23 = vld [vmem:[#allocation7 + $0x270] sm:$0xff]  ;;  %v1479_v26 = vadd.f32 %v1462_v17, %v1453_v15  ;;  %v8566_v28 = vcombine.low %v1603_v9, %v1607_v14  ;;  %v1623_v34 = vld [vmem:[#allocation7 + $0x420] sm:$0xff] }
 0x24f   : > { %3086 = vmatpush1.bf16.msra.mxu1 %v8518_v32  ;;  %v8531_v27 = vcombine.high %v1565_v22, %v1569_v23  ;;  %v1573_v30 = vld [vmem:[#allocation7 + $0x290] sm:$0xff]  ;;  %v8575_v32 = vcombine.high %v1611_v24, %v1615_v8  ;;  %v8583_v43 = vcombine.high %v1619_v33, %v1623_v34  ;;  %v1643_v1 = vld [vmem:[#allocation7 + $0x4c0] sm:$0xff] }
 0x250   : > { %3087 = vmatprep.subr.bf16.mxu1 %v8527_v35  ;;  %v1577_v31 = vld [vmem:[#allocation7 + $0x2b0] sm:$0xff]  ;;  %v8530_v35 = vcombine.low %v1565_v22, %v1569_v23  ;;  %v1483_v36 = vmax.f32 %v1479_v26, 0.0  ;;  %v1651_v14 = vld [vmem:[#allocation7 + $0x500] sm:$0xff] }
 0x251   : > { %3240 = vmatpush1.bf16.msra.mxu0 %v8482_v39  ;;  %v8539_v37 = vcombine.high %v1573_v30, %v1577_v31  ;;  %v8574_v39 = vcombine.low %v1611_v24, %v1615_v8  ;;  %v8538_v47 = vcombine.low %v1573_v30, %v1577_v31  ;;  %v1605_v11 = vld [vmem:[#allocation7 + $0x390] sm:$0xff]  ;;  %v1655_v15 = vld [vmem:[#allocation7 + $0x520] sm:$0xff] }
 0x252   : > { %3241 = vmatprep.subr.bf16.mxu0 %v8491_v40  ;;  %v1609_v12 = vld [vmem:[#allocation7 + $0x3b0] sm:$0xff]  ;;  %v1659_v22 = vld [vmem:[#allocation7 + $0x540] sm:$0xff]  ;;  %v8614_v8 = vcombine.low %v1651_v14, %v1655_v15 }
 0x253   : > { %3088 = vmatpush1.bf16.msra.mxu1 %v8526_v41  ;;  %v1456_v18 = vld [vmem:[#allocation2 + $0x18] sm:$0xff]  ;;  %v8571_v17 = vcombine.high %v1605_v11, %v1609_v12  ;;  %v1663_v23 = vld [vmem:[#allocation7 + $0x560] sm:$0xff] }
 0x254   : > { %3089 = vmatprep.subr.bf16.mxu1 %v8535_v44  ;;  %v1482_v29 = vadd.f32 %v1474_v21, %v1456_v18  ;;  %v1581_v41 = vld [vmem:[#allocation7 + $0x2d0] sm:$0xff]  ;;  %v1627_v44 = vld [vmem:[#allocation7 + $0x440] sm:$0xff]  ;;  %v8615_v21 = vcombine.high %v1651_v14, %v1655_v15 }
 0x255   : > { %3242 = vmatpush1.bf16.msra.mxu0 %v8490_v48  ;;  %v10774_v48 = vpack.c.bf16 %v1483_v36, %v1483_v36  ;;  %v8591_v55 = vcombine.high %v1627_v44, %v1631_v45  ;;  %v8590_v61 = vcombine.low %v1627_v44, %v1631_v45  ;;  %v1625_v26 = vld [vmem:[#allocation7 + $0x430] sm:$0xff]  ;;  %v1675_v36 = vld [vmem:[#allocation7 + $0x5c0] sm:$0xff] }
 0x256   : > { %3243 = vmatprep.subr.bf16.mxu0 %v8499_v49  ;;  %v1486_v40 = vmax.f32 %v1482_v29, 0.0  ;;  %v8547_v49 = vcombine.high %v1581_v41, %v1585_v42  ;;  %v1671_v29 = vld [vmem:[#allocation7 + $0x5a0] sm:$0xff] }
 0x257   : > { %3090 = vmatpush1.bf16.msra.mxu1 %v8534_v50  ;;  %v8582_v50 = vcombine.low %v1619_v33, %v1623_v34  ;;  %v1629_v33 = vld [vmem:[#allocation7 + $0x450] sm:$0xff]  ;;  %v1683_v45 = vld [vmem:[#allocation7 + $0x600] sm:$0xff] }
 0x258   : > { %3091 = vmatprep.subr.bf16.mxu1 %v8543_v54  ;;  %v10776_v52 = vpack.c.bf16 %v1486_v40, %v1486_v40  ;;  %v1593_v54 = vld [vmem:[#allocation7 + $0x330] sm:$0xff]  ;;  %v1707_v15 = vld [vmem:[#allocation7 + $0x6c0] sm:$0xff] }
 0x259   : > { %3244 = vmatpush1.bf16.msra.mxu0 %v8498_v58  ;;  %v1639_v58 = vld [vmem:[#allocation7 + $0x4a0] sm:$0xff]  ;;  %v1633_v34 = vld [vmem:[#allocation7 + $0x470] sm:$0xff] }
 0x25a   : > { %3245 = vmatprep.subr.bf16.mxu0 %v8507_v59  ;;  %v8546_v59 = vcombine.low %v1581_v41, %v1585_v42  ;;  %v8599_v0 = vcombine.high %v1635_v57, %v1639_v58  ;;  %v8598_v9 = vcombine.low %v1635_v57, %v1639_v58  ;;  %v8595_v40 = vcombine.high %v1629_v33, %v1633_v34  ;;  %v1637_v42 = vld [vmem:[#allocation7 + $0x490] sm:$0xff]  ;;  %v1691_v58 = vld [vmem:[#allocation7 + $0x640] sm:$0xff] }
 0x25b   : > { %3092 = vmatpush1.bf16.msra.mxu1 %v8542_v60  ;;  %v8555_v60 = vcombine.high %v1589_v53, %v1593_v54 }
 0x25c   : > { %3093 = vmatprep.subr.bf16.mxu1 %v8551_v63  ;;  %v1601_v63 = vld [vmem:[#allocation7 + $0x370] sm:$0xff] }
 0x25d   : > { %3246 = vmatpush1.bf16.msra.mxu0 %v8506_v2  ;;  %v1647_v2 = vld [vmem:[#allocation7 + $0x4e0] sm:$0xff] }
 0x25e   : > { %3247 = vmatprep.subr.bf16.mxu0 %v8515_v5  ;;  %v8554_v5 = vcombine.low %v1589_v53, %v1593_v54  ;;  %v8606_v18 = vcombine.low %v1643_v1, %v1647_v2  ;;  %v1645_v54 = vld [vmem:[#allocation7 + $0x4d0] sm:$0xff] }
 0x25f   : > { %3094 = vmatpush1.bf16.msra.mxu1 %v8550_v6  ;;  %v8563_v6 = vcombine.high %v1597_v62, %v1601_v63 }
 0x260   : > { %3095 = vmatprep.subr.bf16.mxu1 %v8559_v13  ;;  %v8607_v13 = vcombine.high %v1643_v1, %v1647_v2  ;;  %v1699_v2 = vld [vmem:[#allocation7 + $0x680] sm:$0xff] }
 0x261   : > { %3248 = vmatpush1.bf16.msra.mxu0 %v8514_v16  ;;  %v8562_v16 = vcombine.low %v1597_v62, %v1601_v63  ;;  %v1653_v63 = vld [vmem:[#allocation7 + $0x510] sm:$0xff] }
 0x262   : > { %3249 = vmatprep.subr.bf16.mxu0 %v8523_v19  ;;  %v1613_v19 = vld [vmem:[#allocation7 + $0x3d0] sm:$0xff] }
 0x263   : > { %3096 = vmatpush1.bf16.msra.mxu1 %v8558_v20  ;;  %v1617_v20 = vld [vmem:[#allocation7 + $0x3f0] sm:$0xff] }
 0x264   : > { %3097 = vmatprep.subr.bf16.mxu1 %v8567_v7  ;;  %v8570_v7 = vcombine.low %v1605_v11, %v1609_v12  ;;  %v8579_v24 = vcombine.high %v1613_v19, %v1617_v20  ;;  %v8578_v30 = vcombine.low %v1613_v19, %v1617_v20  ;;  %v1661_v12 = vld [vmem:[#allocation7 + $0x550] sm:$0xff] }
 0x265   : > { %3250 = vmatpush1.bf16.msra.mxu0 %v8522_v25  ;;  %v1621_v25 = vld [vmem:[#allocation7 + $0x410] sm:$0xff] }
 0x266   : > { %3251 = vmatprep.subr.bf16.mxu0 %v8531_v27  ;;  %v8623_v27 = vcombine.high %v1659_v22, %v1663_v23  ;;  %v8587_v31 = vcombine.high %v1621_v25, %v1625_v26  ;;  %v1669_v20 = vld [vmem:[#allocation7 + $0x590] sm:$0xff] }
 0x267   : > { %3098 = vmatpush1.bf16.msra.mxu1 %v8566_v28  ;;  %v1667_v28 = vld [vmem:[#allocation7 + $0x580] sm:$0xff] }
 0x268   : > { %3099 = vmatprep.subr.bf16.mxu1 %v8575_v32  ;;  %v8622_v32 = vcombine.low %v1659_v22, %v1663_v23  ;;  %v8630_v41 = vcombine.low %v1667_v28, %v1671_v29  ;;  %v1715_v23 = vld [vmem:[#allocation7 + $0x700] sm:$0xff] }
 0x269   : > { %3252 = vmatpush1.bf16.msra.mxu0 %v8530_v35  ;;  %v8631_v35 = vcombine.high %v1667_v28, %v1671_v29  ;;  %v1723_v29 = vld [vmem:[#allocation7 + $0x740] sm:$0xff] }
 0x26a   : > { %3253 = vmatprep.subr.bf16.mxu0 %v8539_v37  ;;  %v1679_v37 = vld [vmem:[#allocation7 + $0x5e0] sm:$0xff] }
 0x26b   : > { %3100 = vmatpush1.bf16.msra.mxu1 %v8574_v39  ;;  %v8586_v39 = vcombine.low %v1621_v25, %v1625_v26  ;;  %v8639_v44 = vcombine.high %v1675_v36, %v1679_v37  ;;  %v8638_v53 = vcombine.low %v1675_v36, %v1679_v37  ;;  %v1677_v26 = vld [vmem:[#allocation7 + $0x5d0] sm:$0xff] }
 0x26c   : > { %3110 = vmatprep.subr.bf16.mxu1 %v8583_v43  ;;  %v1641_v43 = vld [vmem:[#allocation7 + $0x4b0] sm:$0xff] }
 0x26d   : > { %3254 = vmatpush1.bf16.msra.mxu0 %v8538_v47  ;;  %v1687_v47 = vld [vmem:[#allocation7 + $0x620] sm:$0xff]  ;;  %v1689_v36 = vld [vmem:[#allocation7 + $0x630] sm:$0xff] }
 0x26e   : > { %3102 = vmatmul.mubr.bf16.vlgmr.msra.gmra.mrb[0].mxu1 %v10774_v48  ;;  %3255 = vmatprep.subr.bf16.mxu0 %v8547_v49  ;;  %v8594_v49 = vcombine.low %v1629_v33, %v1633_v34  ;;  %v8647_v57 = vcombine.high %v1683_v45, %v1687_v47  ;;  %v8646_v62 = vcombine.low %v1683_v45, %v1687_v47  ;;  %v1455_v45 = vld [vmem:[#allocation2 + $0x10] sm:$0xff] }
 0x26f   : > { %3111 = vmatpush1.bf16.msra.mxu1 %v8582_v50  ;;  %3142 = vmatprep.mubr.bf16.mxu1 %v10776_v52  ;;  %v8603_v50 = vcombine.high %v1637_v42, %v1641_v43  ;;  %v1693_v47 = vld [vmem:[#allocation7 + $0x650] sm:$0xff] }
 0x270   : > { %3112 = vmatprep.subr.bf16.mxu1 %v8591_v55  ;;  %v1649_v55 = vld [vmem:[#allocation7 + $0x4f0] sm:$0xff] }
 0x271   : > { %3256 = vmatpush1.bf16.msra.mxu0 %v8546_v59  ;;  %v1695_v59 = vld [vmem:[#allocation7 + $0x660] sm:$0xff] }
 0x272   : > { %3257 = vmatprep.subr.bf16.mxu0 %v8555_v60  ;;  %v8602_v60 = vcombine.low %v1637_v42, %v1641_v43  ;;  %v8655_v1 = vcombine.high %v1691_v58, %v1695_v59  ;;  %v8654_v11 = vcombine.low %v1691_v58, %v1695_v59 }
 0x273   : > { %3113 = vmatpush1.bf16.msra.mxu1 %v8590_v61  ;;  %v8611_v61 = vcombine.high %v1645_v54, %v1649_v55 }
 0x274   : > { %3114 = vmatprep.subr.bf16.mxu1 %v8599_v0  ;;  %v1657_v0 = vld [vmem:[#allocation7 + $0x530] sm:$0xff] }
 0x275   : > { %3258 = vmatpush1.bf16.msra.mxu0 %v8554_v5  ;;  %v1703_v5 = vld [vmem:[#allocation7 + $0x6a0] sm:$0xff] }
 0x276   : > { %3259 = vmatprep.subr.bf16.mxu0 %v8563_v6  ;;  %v8610_v6 = vcombine.low %v1645_v54, %v1649_v55  ;;  %v8663_v14 = vcombine.high %v1699_v2, %v1703_v5  ;;  %v8662_v19 = vcombine.low %v1699_v2, %v1703_v5  ;;  %v1743_v54 = vld [vmem:[#allocation7 + $0x7e0] sm:$0xff] }
 0x277   : > { %3115 = vmatpush1.bf16.msra.mxu1 %v8598_v9  ;;  %v8619_v9 = vcombine.high %v1653_v63, %v1657_v0 }
 0x278   : > { %3116 = vmatprep.subr.bf16.mxu1 %v8607_v13  ;;  %v1665_v13 = vld [vmem:[#allocation7 + $0x570] sm:$0xff] }
 0x279   : > { %3260 = vmatpush1.bf16.msra.mxu0 %v8562_v16  ;;  %v1711_v16 = vld [vmem:[#allocation7 + $0x6e0] sm:$0xff] }
 0x27a   : > { %3261 = vmatprep.subr.bf16.mxu0 %v8571_v17  ;;  %v8618_v17 = vcombine.low %v1653_v63, %v1657_v0  ;;  %v8671_v22 = vcombine.high %v1707_v15, %v1711_v16  ;;  %v8670_v25 = vcombine.low %v1707_v15, %v1711_v16  ;;  %v1496_v63 = vld [vmem:[#allocation7 + $0x28] sm:$0xff] }
 0x27b   : > { %3117 = vmatpush1.bf16.msra.mxu1 %v8606_v18  ;;  %v8627_v18 = vcombine.high %v1661_v12, %v1665_v13 }
 0x27c   : > { %3118 = vmatprep.subr.bf16.mxu1 %v8615_v21  ;;  %v1673_v21 = vld [vmem:[#allocation7 + $0x5b0] sm:$0xff] }
 0x27d   : > { %3262 = vmatpush1.bf16.msra.mxu0 %v8570_v7  ;;  %v1719_v7 = vld [vmem:[#allocation7 + $0x720] sm:$0xff] }
 0x27e   : > { %3263 = vmatprep.subr.bf16.mxu0 %v8579_v24  ;;  %v8626_v24 = vcombine.low %v1661_v12, %v1665_v13  ;;  %v8679_v28 = vcombine.high %v1715_v23, %v1719_v7  ;;  %v8678_v34 = vcombine.low %v1715_v23, %v1719_v7  ;;  %v1500_v12 = vld [vmem:[#allocation7 + $0x48] sm:$0xff] }
 0x27f   : > { %3119 = vmatpush1.bf16.msra.mxu1 %v8614_v8  ;;  %v8635_v8 = vcombine.high %v1669_v20, %v1673_v21  ;;  %v1504_v13 = vld [vmem:[#allocation7 + $0x68] sm:$0xff] }
 0x280   : > { %3120 = vmatprep.subr.bf16.mxu1 %v8623_v27  ;;  %v1681_v27 = vld [vmem:[#allocation7 + $0x5f0] sm:$0xff] }
 0x281   : > { %3264 = vmatpush1.bf16.msra.mxu0 %v8578_v30  ;;  %v1727_v30 = vld [vmem:[#allocation7 + $0x760] sm:$0xff]  ;;  %v8643_v33 = vcombine.high %v1677_v26, %v1681_v27 }
 0x282   : > { %3274 = vmatprep.subr.bf16.mxu0 %v8587_v31  ;;  %v8634_v31 = vcombine.low %v1669_v20, %v1673_v21  ;;  %v8687_v37 = vcombine.high %v1723_v29, %v1727_v30  ;;  %v8465_v20 = vcombine.high %v1500_v12, %v1504_v13  ;;  %v1508_v21 = vld [vmem:[#allocation7 + $0x88] sm:$0xff] }
 0x283   : > { %3121 = vmatpush1.bf16.msra.mxu1 %v8622_v32  ;;  %v10783_v32 = vsub.s32 2, %v10751_v46 }
 0x284   : > { %3122 = vmatprep.subr.bf16.mxu1 %v8631_v35  ;;  %3266 = vmatmul.mubr.bf16.vlgmr.msra.gmra.mrb[0].mxu0 %v10774_v48  ;;  %v1685_v35 = vld [vmem:[#allocation7 + $0x610] sm:$0xff] }
 0x285   : > { %3275 = vmatpush1.bf16.msra.mxu0 %v8586_v39  ;;  %3306 = vmatprep.mubr.bf16.mxu0 %v10776_v52  ;;  %v1731_v39 = vld [vmem:[#allocation7 + $0x780] sm:$0xff]  ;;  %v1470_v42 = vrot.slane %v10756_v56, %v10783_v32  ;;  %v8651_v43 = vcombine.high %v1685_v35, %v1689_v36  ;;  %v8650_v55 = vcombine.low %v1685_v35, %v1689_v36  ;;  %v1705_v56 = vld [vmem:[#allocation7 + $0x6b0] sm:$0xff]  ;;  %v1524_v36 = vld [vmem:[#allocation7 + $0x108] sm:$0xff] }
 0x286   : > { %3276 = vmatprep.subr.bf16.mxu0 %v8595_v40  ;;  %v1735_v40 = vld [vmem:[#allocation7 + $0x7a0] sm:$0xff] }
 0x287   : > { %3123 = vmatpush1.bf16.msra.mxu1 %v8630_v41  ;;  %v8642_v41 = vcombine.low %v1677_v26, %v1681_v27  ;;  %v8694_v59 = vcombine.low %v1731_v39, %v1735_v40  ;;  %v1516_v27 = vld [vmem:[#allocation7 + $0xc8] sm:$0xff] }
 0x288   : > { %3124 = vmatprep.subr.bf16.mxu1 %v8639_v44  ;;  %v8686_v44 = vcombine.low %v1723_v29, %v1727_v30 }
 0x289   : > { %3277 = vmatpush1.bf16.msra.mxu0 %v8594_v49  ;;  %v1697_v49 = vld [vmem:[#allocation7 + $0x670] sm:$0xff] }
 0x28a   : > { %3278 = vmatprep.subr.bf16.mxu0 %v8603_v50  ;;  %v8695_v50 = vcombine.high %v1731_v39, %v1735_v40  ;;  %v8659_v58 = vcombine.high %v1693_v47, %v1697_v49  ;;  %v8658_v0 = vcombine.low %v1693_v47, %v1697_v49  ;;  %v1536_v47 = vld [vmem:[#allocation7 + $0x168] sm:$0xff] }
 0x28b   : > { %3125 = vmatpush1.bf16.msra.mxu1 %v8638_v53  ;;  %v1739_v53 = vld [vmem:[#allocation7 + $0x7c0] sm:$0xff] }
 0x28c   : > { %3126 = vmatprep.subr.bf16.mxu1 %v8647_v57  ;;  %v1481_v57 = vadd.f32 %v1470_v42, %v1455_v45  ;;  %v8702_v5 = vcombine.low %v1739_v53, %v1743_v54  ;;  %v1741_v42 = vld [vmem:[#allocation7 + $0x7d0] sm:$0xff]  ;;  %v1532_v45 = vld [vmem:[#allocation7 + $0x148] sm:$0xff] }
 0x28d   : > { %3279 = vmatpush1.bf16.msra.mxu0 %v8602_v60  ;;  %v1701_v60 = vld [vmem:[#allocation7 + $0x690] sm:$0xff] }
 0x28e   : > { %3280 = vmatprep.subr.bf16.mxu0 %v8611_v61  ;;  %v8703_v61 = vcombine.high %v1739_v53, %v1743_v54  ;;  %v8667_v2 = vcombine.high %v1701_v60, %v1705_v56  ;;  %v8497_v54 = vcombine.high %v1532_v45, %v1536_v47 }
 0x28f   : > { %3127 = vmatpush1.bf16.msra.mxu1 %v8646_v62  ;;  %v1492_v62 = vld [vmem:[#allocation7 + $0x8] sm:$0xff] }
 0x290   : > { %3128 = vmatprep.subr.bf16.mxu1 %v8655_v1  ;;  %v1485_v1 = vmax.f32 %v1481_v57, 0.0  ;;  %v1544_v57 = vld [vmem:[#allocation7 + $0x1a8] sm:$0xff] }
 0x291   : > { %3281 = vmatpush1.bf16.msra.mxu0 %v8610_v6  ;;  %v1709_v6 = vld [vmem:[#allocation7 + $0x6d0] sm:$0xff] }
 0x292   : > { %3282 = vmatprep.subr.bf16.mxu0 %v8619_v9  ;;  %v1713_v9 = vld [vmem:[#allocation7 + $0x6f0] sm:$0xff]  ;;  %v10787_v15 = vpack.c.bf16 %v1485_v1, %v1485_v1  ;;  %v1560_v1 = vld [vmem:[#allocation7 + $0x228] sm:$0xff] }
 0x293   : > { %3129 = vmatpush1.bf16.msra.mxu1 %v8654_v11  ;;  %v8457_v11 = vcombine.high %v1492_v62, %v1496_v63  ;;  %v8675_v16 = vcombine.high %v1709_v6, %v1713_v9  ;;  %v8674_v23 = vcombine.low %v1709_v6, %v1713_v9  ;;  %v3417_v9 = vld [vmem:[#allocation10 + $0x20] sm:$0xff] }
 0x294   : > { %3130 = vmatprep.subr.bf16.mxu1 %v8663_v14  ;;  %v8666_v14 = vcombine.low %v1701_v60, %v1705_v56  ;;  %v1548_v56 = vld [vmem:[#allocation7 + $0x1c8] sm:$0xff] }
 0x295   : > { %3283 = vmatpush1.bf16.msra.mxu0 %v8618_v17  ;;  %v8456_v17 = vcombine.low %v1492_v62, %v1496_v63 }
 0x296   : > { %3284 = vmatprep.subr.bf16.mxu0 %v8627_v18  ;;  %v1717_v18 = vld [vmem:[#allocation7 + $0x710] sm:$0xff] }
 0x297   : > { %3131 = vmatpush1.bf16.msra.mxu1 %v8662_v19  ;;  %v1721_v19 = vld [vmem:[#allocation7 + $0x730] sm:$0xff] }
 0x298   : > { %3132 = vmatprep.subr.bf16.mxu1 %v8671_v22  ;;  %v1512_v22 = vld [vmem:[#allocation7 + $0xa8] sm:$0xff]  ;;  %v8683_v7 = vcombine.high %v1717_v18, %v1721_v19  ;;  %v8682_v29 = vcombine.low %v1717_v18, %v1721_v19 }
 0x299   : > { %3285 = vmatpush1.bf16.msra.mxu0 %v8626_v24  ;;  %v8464_v24 = vcombine.low %v1500_v12, %v1504_v13  ;;  %v8473_v26 = vcombine.high %v1508_v21, %v1512_v22  ;;  %v1568_v12 = vld [vmem:[#allocation7 + $0x268] sm:$0xff] }
 0x29a   : > { %3286 = vmatprep.subr.bf16.mxu0 %v8635_v8  ;;  %v1725_v8 = vld [vmem:[#allocation7 + $0x750] sm:$0xff]  ;;  %v3425_v19 = vld [vmem:[#allocation10 + $0x60] sm:$0xff] }
 0x29b   : > { %3133 = vmatpush1.bf16.msra.mxu1 %v8670_v25  ;;  %v1729_v25 = vld [vmem:[#allocation7 + $0x770] sm:$0xff] }
 0x29c   : > { %3134 = vmatprep.subr.bf16.mxu1 %v8679_v28  ;;  %v1520_v28 = vld [vmem:[#allocation7 + $0xe8] sm:$0xff]  ;;  %v8691_v30 = vcombine.high %v1725_v8, %v1729_v25  ;;  %v8690_v39 = vcombine.low %v1725_v8, %v1729_v25 }
 0x29d   : > { %3287 = vmatpush1.bf16.msra.mxu0 %v8634_v31  ;;  %v8472_v31 = vcombine.low %v1508_v21, %v1512_v22  ;;  %v8481_v35 = vcombine.high %v1516_v27, %v1520_v28  ;;  %v1576_v21 = vld [vmem:[#allocation7 + $0x2a8] sm:$0xff] }
 0x29e   : > { %3288 = vmatprep.subr.bf16.mxu0 %v8643_v33  ;;  %v1733_v33 = vld [vmem:[#allocation7 + $0x790] sm:$0xff]  ;;  %v3433_v25 = vld [vmem:[#allocation10 + $0xa0] sm:$0xff] }
 0x29f   : > { %3135 = vmatpush1.bf16.msra.mxu1 %v8678_v34  ;;  %v1737_v34 = vld [vmem:[#allocation7 + $0x7b0] sm:$0xff] }
 0x2a0   : > { %3136 = vmatprep.subr.bf16.mxu1 %v8687_v37  ;;  %v1528_v37 = vld [vmem:[#allocation7 + $0x128] sm:$0xff]  ;;  %v8699_v40 = vcombine.high %v1733_v33, %v1737_v34  ;;  %v8698_v49 = vcombine.low %v1733_v33, %v1737_v34 }
 0x2a1   : > { %3289 = vmatpush1.bf16.msra.mxu0 %v8642_v41  ;;  %v8480_v41 = vcombine.low %v1516_v27, %v1520_v28  ;;  %v8488_v53 = vcombine.low %v1524_v36, %v1528_v37  ;;  %v1584_v27 = vld [vmem:[#allocation7 + $0x2e8] sm:$0xff] }
 0x2a2   : > { %3290 = vmatprep.subr.bf16.mxu0 %v8651_v43  ;;  %v1745_v43 = vld [vmem:[#allocation7 + $0x7f0] sm:$0xff]  ;;  %v3441_v34 = vld [vmem:[#allocation10 + $0xe0] sm:$0xff] }
 0x2a3   : > { %3137 = vmatpush1.bf16.msra.mxu1 %v8686_v44  ;;  %v8489_v44 = vcombine.high %v1524_v36, %v1528_v37  ;;  %v1592_v36 = vld [vmem:[#allocation7 + $0x328] sm:$0xff] }
 0x2a4   : > { %3138 = vmatprep.subr.bf16.mxu1 %v8695_v50  ;;  %v8707_v50 = vcombine.high %v1741_v42, %v1745_v43 }
 0x2a5   : > { %3291 = vmatpush1.bf16.msra.mxu0 %v8650_v55  ;;  %v1540_v55 = vld [vmem:[#allocation7 + $0x188] sm:$0xff] }
 0x2a6   : > { %3292 = vmatprep.subr.bf16.mxu0 %v8659_v58  ;;  %v8706_v58 = vcombine.low %v1741_v42, %v1745_v43  ;;  %v8505_v60 = vcombine.high %v1540_v55, %v1544_v57  ;;  %v8504_v62 = vcombine.low %v1540_v55, %v1544_v57  ;;  %v3449_v43 = vld [vmem:[#allocation10 + $0x120] sm:$0xff] }
 0x2a7   : > { %3139 = vmatpush1.bf16.msra.mxu1 %v8694_v59  ;;  %v8496_v59 = vcombine.low %v1532_v45, %v1536_v47  ;;  %v1600_v45 = vld [vmem:[#allocation7 + $0x368] sm:$0xff] }
 0x2a8   : > { %3140 = vmatprep.subr.bf16.mxu1 %v8703_v61  ;;  %v1552_v61 = vld [vmem:[#allocation7 + $0x1e8] sm:$0xff] }
 0x2a9   : > { %3293 = vmatpush1.bf16.msra.mxu0 %v8658_v0  ;;  %v8513_v63 = vcombine.high %v1548_v56, %v1552_v61  ;;  %v1556_v0 = vld [vmem:[#allocation7 + $0x208] sm:$0xff] }
 0x2aa   : > { %3294 = vmatprep.subr.bf16.mxu0 %v8667_v2  ;;  %v8512_v2 = vcombine.low %v1548_v56, %v1552_v61  ;;  %v8521_v6 = vcombine.high %v1556_v0, %v1560_v1  ;;  %v3457_v55 = vld [vmem:[#allocation10 + $0x160] sm:$0xff] }
 0x2ab   : > { %3141 = vmatpush1.bf16.msra.mxu1 %v8702_v5  ;;  %v3413_v5 = vld [vmem:[#allocation10] sm:$0xff] }
 0x2ac   : > { %3151 = vmatprep.subr.bf16.mxu1 %v8457_v11  ;;  %v1564_v11 = vld [vmem:[#allocation7 + $0x248] sm:$0xff]  ;;  %v8710_v13 = vcombine.low %v3413_v5, %v3417_v9 }
 0x2ad   : > { %3295 = vmatpush1.bf16.msra.mxu0 %v8666_v14  ;;  %v8711_v14 = vcombine.high %v3413_v5, %v3417_v9  ;;  %v8529_v18 = vcombine.high %v1564_v11, %v1568_v12  ;;  %v1604_v57 = vld [vmem:[#allocation7 + $0x388] sm:$0xff] }
 0x2ae   : > { %3143 = vmatmul.mubr.bf16.vlgmr.msra.gmra.mrb[0].mxu1 %v10787_v15  ;;  %3296 = vmatprep.subr.bf16.mxu0 %v8675_v16  ;;  %v8520_v16 = vcombine.low %v1556_v0, %v1560_v1  ;;  %v3461_v61 = vld [vmem:[#allocation10 + $0x180] sm:$0xff] }
 0x2af   : > { %3152 = vmatpush1.bf16.msra.mxu1 %v8456_v17  ;;  %3183 = vmatprep.mubr.bf16.mxu1 %v10760_v4  ;;  %v3421_v17 = vld [vmem:[#allocation10 + $0x40] sm:$0xff] }
 0x2b0   : > { %3153 = vmatprep.subr.bf16.mxu1 %v8465_v20  ;;  %v1572_v20 = vld [vmem:[#allocation7 + $0x288] sm:$0xff]  ;;  %v8718_v22 = vcombine.low %v3421_v17, %v3425_v19 }
 0x2b1   : > { %3297 = vmatpush1.bf16.msra.mxu0 %v8674_v23  ;;  %v8719_v23 = vcombine.high %v3421_v17, %v3425_v19  ;;  %v8537_v8 = vcombine.high %v1572_v20, %v1576_v21  ;;  %v1612_v0 = vld [vmem:[#allocation7 + $0x3c8] sm:$0xff] }
 0x2b2   : > { %3298 = vmatprep.subr.bf16.mxu0 %v8683_v7  ;;  %v8528_v7 = vcombine.low %v1564_v11, %v1568_v12  ;;  %v1616_v1 = vld [vmem:[#allocation7 + $0x3e8] sm:$0xff] }
 0x2b3   : > { %3154 = vmatpush1.bf16.msra.mxu1 %v8464_v24  ;;  %v3429_v24 = vld [vmem:[#allocation10 + $0x80] sm:$0xff]  ;;  %v8577_v11 = vcombine.high %v1612_v0, %v1616_v1 }
 0x2b4   : > { %3155 = vmatprep.subr.bf16.mxu1 %v8473_v26  ;;  %v1580_v26 = vld [vmem:[#allocation7 + $0x2c8] sm:$0xff]  ;;  %v8726_v28 = vcombine.low %v3429_v24, %v3433_v25 }
 0x2b5   : > { %3299 = vmatpush1.bf16.msra.mxu0 %v8682_v29  ;;  %v8727_v29 = vcombine.high %v3429_v24, %v3433_v25  ;;  %v8545_v33 = vcombine.high %v1580_v26, %v1584_v27  ;;  %v3469_v9 = vld [vmem:[#allocation10 + $0x1c0] sm:$0xff] }
 0x2b6   : > { %3300 = vmatprep.subr.bf16.mxu0 %v8691_v30  ;;  %v8536_v30 = vcombine.low %v1572_v20, %v1576_v21  ;;  %v3473_v12 = vld [vmem:[#allocation10 + $0x1e0] sm:$0xff] }
 0x2b7   : > { %3156 = vmatpush1.bf16.msra.mxu1 %v8472_v31  ;;  %v3437_v31 = vld [vmem:[#allocation10 + $0xc0] sm:$0xff]  ;;  %v8767_v17 = vcombine.high %v3469_v9, %v3473_v12 }
 0x2b8   : > { %3157 = vmatprep.subr.bf16.mxu1 %v8481_v35  ;;  %v1588_v35 = vld [vmem:[#allocation7 + $0x308] sm:$0xff]  ;;  %v8734_v37 = vcombine.low %v3437_v31, %v3441_v34 }
 0x2b9   : > { %3301 = vmatpush1.bf16.msra.mxu0 %v8690_v39  ;;  %v8735_v39 = vcombine.high %v3437_v31, %v3441_v34  ;;  %v8553_v42 = vcombine.high %v1588_v35, %v1592_v36  ;;  %v3477_v19 = vld [vmem:[#allocation10 + $0x200] sm:$0xff] }
 0x2ba   : > { %3302 = vmatprep.subr.bf16.mxu0 %v8699_v40  ;;  %v8544_v40 = vcombine.low %v1580_v26, %v1584_v27  ;;  %v3481_v21 = vld [vmem:[#allocation10 + $0x220] sm:$0xff] }
 0x2bb   : > { %3158 = vmatpush1.bf16.msra.mxu1 %v8480_v41  ;;  %v3445_v41 = vld [vmem:[#allocation10 + $0x100] sm:$0xff]  ;;  %v8775_v24 = vcombine.high %v3477_v19, %v3481_v21 }
 0x2bc   : > { %3159 = vmatprep.subr.bf16.mxu1 %v8489_v44  ;;  %v1596_v44 = vld [vmem:[#allocation7 + $0x348] sm:$0xff]  ;;  %v8742_v47 = vcombine.low %v3445_v41, %v3449_v43 }
 0x2bd   : > { %3303 = vmatpush1.bf16.msra.mxu0 %v8698_v49  ;;  %v8743_v49 = vcombine.high %v3445_v41, %v3449_v43  ;;  %v8560_v56 = vcombine.low %v1596_v44, %v1600_v45  ;;  %v3485_v25 = vld [vmem:[#allocation10 + $0x240] sm:$0xff] }
 0x2be   : > { %3304 = vmatprep.subr.bf16.mxu0 %v8707_v50  ;;  %v8552_v50 = vcombine.low %v1588_v35, %v1592_v36  ;;  %v3489_v27 = vld [vmem:[#allocation10 + $0x260] sm:$0xff] }
 0x2bf   : > { %3160 = vmatpush1.bf16.msra.mxu1 %v8488_v53  ;;  %v3453_v53 = vld [vmem:[#allocation10 + $0x140] sm:$0xff]  ;;  %v8783_v31 = vcombine.high %v3485_v25, %v3489_v27 }
 0x2c0   : > { %3161 = vmatprep.subr.bf16.mxu1 %v8497_v54  ;;  %v8561_v54 = vcombine.high %v1596_v44, %v1600_v45  ;;  %v3493_v34 = vld [vmem:[#allocation10 + $0x280] sm:$0xff] }
 0x2c1   : > { %3305 = vmatpush1.bf16.msra.mxu0 %v8706_v58  ;;  %v1608_v58 = vld [vmem:[#allocation7 + $0x3a8] sm:$0xff] }
 0x2c2   : > { %6527 = vmatprep.subr.bf16.mxu0 %v8711_v14  ;;  %v1624_v14 = vld [vmem:[#allocation7 + $0x428] sm:$0xff] }
 0x2c3   : > { %3162 = vmatpush1.bf16.msra.mxu1 %v8496_v59  ;;  %v8750_v59 = vcombine.low %v3453_v53, %v3457_v55  ;;  %v3497_v36 = vld [vmem:[#allocation10 + $0x2a0] sm:$0xff] }
 0x2c4   : > { %3163 = vmatprep.subr.bf16.mxu1 %v8505_v60  ;;  %3307 = vmatmul.mubr.bf16.vlgmr.msra.gmra.mrb[0].mxu0 %v10787_v15  ;;  %v8751_v60 = vcombine.high %v3453_v53, %v3457_v55  ;;  %v8791_v41 = vcombine.high %v3493_v34, %v3497_v36  ;;  %v3501_v43 = vld [vmem:[#allocation10 + $0x2c0] sm:$0xff] }
 0x2c5   : > { %6528 = vmatpush1.bf16.msra.mxu0 %v8710_v13  ;;  %v1620_v13 = vld [vmem:[#allocation7 + $0x408] sm:$0xff] }
 0x2c6   : > { %6529 = vmatprep.subr.bf16.mxu0 %v8719_v23  ;;  %v8585_v20 = vcombine.high %v1620_v13, %v1624_v14  ;;  %v1632_v23 = vld [vmem:[#allocation7 + $0x468] sm:$0xff] }
 0x2c7   : > { %3164 = vmatpush1.bf16.msra.mxu1 %v8504_v62  ;;  %v8569_v62 = vcombine.high %v1604_v57, %v1608_v58  ;;  %v3505_v45 = vld [vmem:[#allocation10 + $0x2e0] sm:$0xff] }
 0x2c8   : > { %3165 = vmatprep.subr.bf16.mxu1 %v8513_v63  ;;  %v3465_v63 = vld [vmem:[#allocation10 + $0x1a0] sm:$0xff]  ;;  %v8799_v53 = vcombine.high %v3501_v43, %v3505_v45 }
 0x2c9   : > { %6530 = vmatpush1.bf16.msra.mxu0 %v8718_v22  ;;  %v8759_v5 = vcombine.high %v3461_v61, %v3465_v63  ;;  %v1628_v22 = vld [vmem:[#allocation7 + $0x448] sm:$0xff] }
 0x2ca   : > { %6531 = vmatprep.subr.bf16.mxu0 %v8727_v29  ;;  %v8593_v26 = vcombine.high %v1628_v22, %v1632_v23  ;;  %v1640_v29 = vld [vmem:[#allocation7 + $0x4a8] sm:$0xff] }
 0x2cb   : > { %3166 = vmatpush1.bf16.msra.mxu1 %v8512_v2  ;;  %v8758_v2 = vcombine.low %v3461_v61, %v3465_v63  ;;  %v3509_v55 = vld [vmem:[#allocation10 + $0x300] sm:$0xff] }
 0x2cc   : > { %3167 = vmatprep.subr.bf16.mxu1 %v8521_v6  ;;  %v8568_v6 = vcombine.low %v1604_v57, %v1608_v58  ;;  %v3513_v58 = vld [vmem:[#allocation10 + $0x320] sm:$0xff] }
 0x2cd   : > { %6532 = vmatpush1.bf16.msra.mxu0 %v8726_v28  ;;  %v1636_v28 = vld [vmem:[#allocation7 + $0x488] sm:$0xff]  ;;  %v8807_v61 = vcombine.high %v3509_v55, %v3513_v58 }
 0x2ce   : > { %6533 = vmatprep.subr.bf16.mxu0 %v8735_v39  ;;  %v8601_v35 = vcombine.high %v1636_v28, %v1640_v29  ;;  %v1648_v39 = vld [vmem:[#allocation7 + $0x4e8] sm:$0xff] }
 0x2cf   : > { %3168 = vmatpush1.bf16.msra.mxu1 %v8520_v16  ;;  %v8766_v16 = vcombine.low %v3469_v9, %v3473_v12  ;;  %v3517_v63 = vld [vmem:[#allocation10 + $0x340] sm:$0xff] }
 0x2d0   : > { %3169 = vmatprep.subr.bf16.mxu1 %v8529_v18  ;;  %v8576_v18 = vcombine.low %v1612_v0, %v1616_v1  ;;  %v3521_v1 = vld [vmem:[#allocation10 + $0x360] sm:$0xff] }
 0x2d1   : > { %6534 = vmatpush1.bf16.msra.mxu0 %v8734_v37  ;;  %v1644_v37 = vld [vmem:[#allocation7 + $0x4c8] sm:$0xff]  ;;  %v8815_v9 = vcombine.high %v3517_v63, %v3521_v1 }
 0x2d2   : > { %6535 = vmatprep.subr.bf16.mxu0 %v8743_v49  ;;  %v8609_v44 = vcombine.high %v1644_v37, %v1648_v39  ;;  %v1656_v49 = vld [vmem:[#allocation7 + $0x528] sm:$0xff] }
 0x2d3   : > { %3170 = vmatpush1.bf16.msra.mxu1 %v8528_v7  ;;  %v8774_v7 = vcombine.low %v3477_v19, %v3481_v21  ;;  %v3533_v21 = vld [vmem:[#allocation10 + $0x3c0] sm:$0xff] }
 0x2d4   : > { %3171 = vmatprep.subr.bf16.mxu1 %v8537_v8  ;;  %v8584_v8 = vcombine.low %v1620_v13, %v1624_v14  ;;  %v3525_v13 = vld [vmem:[#allocation10 + $0x380] sm:$0xff] }
 0x2d5   : > { %6536 = vmatpush1.bf16.msra.mxu0 %v8742_v47  ;;  %v1652_v47 = vld [vmem:[#allocation7 + $0x508] sm:$0xff] }
 0x2d6   : > { %6537 = vmatprep.subr.bf16.mxu0 %v8751_v60  ;;  %v8617_v57 = vcombine.high %v1652_v47, %v1656_v49  ;;  %v1664_v60 = vld [vmem:[#allocation7 + $0x568] sm:$0xff] }
 0x2d7   : > { %3172 = vmatpush1.bf16.msra.mxu1 %v8536_v30  ;;  %v8782_v30 = vcombine.low %v3485_v25, %v3489_v27  ;;  %v3529_v14 = vld [vmem:[#allocation10 + $0x3a0] sm:$0xff] }
 0x2d8   : > { %3173 = vmatprep.subr.bf16.mxu1 %v8545_v33  ;;  %v8592_v33 = vcombine.low %v1628_v22, %v1632_v23  ;;  %v8823_v19 = vcombine.high %v3525_v13, %v3529_v14  ;;  %v3537_v23 = vld [vmem:[#allocation10 + $0x3e0] sm:$0xff] }
 0x2d9   : > { %6538 = vmatpush1.bf16.msra.mxu0 %v8750_v59  ;;  %v1660_v59 = vld [vmem:[#allocation7 + $0x548] sm:$0xff]  ;;  %v8831_v25 = vcombine.high %v3533_v21, %v3537_v23 }
 0x2da   : > { %6539 = vmatprep.subr.bf16.mxu0 %v8759_v5  ;;  %v8625_v0 = vcombine.high %v1660_v59, %v1664_v60  ;;  %v1672_v5 = vld [vmem:[#allocation7 + $0x5a8] sm:$0xff] }
 0x2db   : > { %3174 = vmatpush1.bf16.msra.mxu1 %v8544_v40  ;;  %v8790_v40 = vcombine.low %v3493_v34, %v3497_v36  ;;  %v1704_v34 = vld [vmem:[#allocation7 + $0x6a8] sm:$0xff] }
 0x2dc   : > { %3175 = vmatprep.subr.bf16.mxu1 %v8553_v42  ;;  %v8600_v42 = vcombine.low %v1636_v28, %v1640_v29  ;;  %v1692_v28 = vld [vmem:[#allocation7 + $0x648] sm:$0xff] }
 0x2dd   : > { %6540 = vmatpush1.bf16.msra.mxu0 %v8758_v2  ;;  %v1668_v2 = vld [vmem:[#allocation7 + $0x588] sm:$0xff] }
 0x2de   : > { %6541 = vmatprep.subr.bf16.mxu0 %v8767_v17  ;;  %v8633_v12 = vcombine.high %v1668_v2, %v1672_v5  ;;  %v1680_v17 = vld [vmem:[#allocation7 + $0x5e8] sm:$0xff] }
 0x2df   : > { %3176 = vmatpush1.bf16.msra.mxu1 %v8552_v50  ;;  %v8798_v50 = vcombine.low %v3501_v43, %v3505_v45  ;;  %v1696_v29 = vld [vmem:[#allocation7 + $0x668] sm:$0xff] }
 0x2e0   : > { %3177 = vmatprep.subr.bf16.mxu1 %v8561_v54  ;;  %v8608_v54 = vcombine.low %v1644_v37, %v1648_v39  ;;  %v1708_v37 = vld [vmem:[#allocation7 + $0x6c8] sm:$0xff] }
 0x2e1   : > { %6542 = vmatpush1.bf16.msra.mxu0 %v8766_v16  ;;  %v1676_v16 = vld [vmem:[#allocation7 + $0x5c8] sm:$0xff] }
 0x2e2   : > { %6543 = vmatprep.subr.bf16.mxu0 %v8775_v24  ;;  %v8641_v22 = vcombine.high %v1676_v16, %v1680_v17  ;;  %v1688_v24 = vld [vmem:[#allocation7 + $0x628] sm:$0xff] }
 0x2e3   : > { %3178 = vmatpush1.bf16.msra.mxu1 %v8560_v56  ;;  %v8806_v56 = vcombine.low %v3509_v55, %v3513_v58  ;;  %v1712_v39 = vld [vmem:[#allocation7 + $0x6e8] sm:$0xff] }
 0x2e4   : > { %3179 = vmatprep.subr.bf16.mxu1 %v8569_v62  ;;  %v8616_v62 = vcombine.low %v1652_v47, %v1656_v49  ;;  %v1720_v43 = vld [vmem:[#allocation7 + $0x728] sm:$0xff] }
 0x2e5   : > { %6544 = vmatpush1.bf16.msra.mxu0 %v8774_v7  ;;  %v1684_v7 = vld [vmem:[#allocation7 + $0x608] sm:$0xff] }
 0x2e6   : > { %6545 = vmatprep.subr.bf16.mxu0 %v8783_v31  ;;  %v8649_v27 = vcombine.high %v1684_v7, %v1688_v24  ;;  %v8657_v31 = vcombine.high %v1692_v28, %v1696_v29  ;;  %v1724_v47 = vld [vmem:[#allocation7 + $0x748] sm:$0xff] }
 0x2e7   : > { %3180 = vmatpush1.bf16.msra.mxu1 %v8568_v6  ;;  %v8814_v6 = vcombine.low %v3517_v63, %v3521_v1  ;;  %v1728_v49 = vld [vmem:[#allocation7 + $0x768] sm:$0xff]  ;;  %v1498_v63 = vld [vmem:[#allocation7 + $0x38] sm:$0xff] }
 0x2e8   : > { %3181 = vmatprep.subr.bf16.mxu1 %v8577_v11  ;;  %v8624_v11 = vcombine.low %v1660_v59, %v1664_v60  ;;  %v1736_v55 = vld [vmem:[#allocation7 + $0x7a8] sm:$0xff] }
 0x2e9   : > { %6546 = vmatpush1.bf16.msra.mxu0 %v8782_v30  ;;  %v8648_v30 = vcombine.low %v1684_v7, %v1688_v24  ;;  %v1740_v59 = vld [vmem:[#allocation7 + $0x7c8] sm:$0xff]  ;;  %v1534_v7 = vld [vmem:[#allocation7 + $0x158] sm:$0xff] }
 0x2ea   : > { %6547 = vmatprep.subr.bf16.mxu0 %v8791_v41  ;;  %v8673_v41 = vcombine.high %v1708_v37, %v1712_v39  ;;  %v1744_v60 = vld [vmem:[#allocation7 + $0x7e8] sm:$0xff]  ;;  %v1538_v24 = vld [vmem:[#allocation7 + $0x178] sm:$0xff] }
 0x2eb   : > { %3182 = vmatpush1.bf16.msra.mxu1 %v8576_v18  ;;  %v8822_v18 = vcombine.low %v3525_v13, %v3529_v14 }
 0x2ec   : > { %3192 = vmatprep.subr.bf16.mxu1 %v8585_v20  ;;  %v8632_v20 = vcombine.low %v1668_v2, %v1672_v5  ;;  %v1502_v2 = vld [vmem:[#allocation7 + $0x58] sm:$0xff] }
 0x2ed   : > { %6548 = vmatpush1.bf16.msra.mxu0 %v8790_v40  ;;  %v1506_v5 = vld [vmem:[#allocation7 + $0x78] sm:$0xff] }
 0x2ee   : > { %3184 = vmatmul.mubr.bf16.vlgmr.msra.gmra.mrb[4].mxu1 %v10774_v48  ;;  %6549 = vmatprep.subr.bf16.mxu0 %v8799_v53  ;;  %v8689_v53 = vcombine.high %v1724_v47, %v1728_v49  ;;  %v8468_v13 = vcombine.low %v1502_v2, %v1506_v5 }
 0x2ef   : > { %3193 = vmatpush1.bf16.msra.mxu1 %v8584_v8  ;;  %3224 = vmatprep.mubr.bf16.mxu1 %v10776_v52  ;;  %v8830_v8 = vcombine.low %v3533_v21, %v3537_v23  ;;  %v1530_v21 = vld [vmem:[#allocation7 + $0x138] sm:$0xff] }
 0x2f0   : > { %3194 = vmatprep.subr.bf16.mxu1 %v8593_v26  ;;  %v8640_v26 = vcombine.low %v1676_v16, %v1680_v17  ;;  %v1518_v16 = vld [vmem:[#allocation7 + $0xd8] sm:$0xff] }
 0x2f1   : > { %6550 = vmatpush1.bf16.msra.mxu0 %v8798_v50  ;;  %v1522_v17 = vld [vmem:[#allocation7 + $0xf8] sm:$0xff] }
 0x2f2   : > { %6551 = vmatprep.subr.bf16.mxu0 %v8807_v61  ;;  %v8705_v61 = vcombine.high %v1740_v59, %v1744_v60 }
 0x2f3   : > { %3195 = vmatpush1.bf16.msra.mxu1 %v8592_v33  ;;  %v1700_v33 = vld [vmem:[#allocation7 + $0x688] sm:$0xff] }
 0x2f4   : > { %3196 = vmatprep.subr.bf16.mxu1 %v8601_v35  ;;  %v8656_v35 = vcombine.low %v1692_v28, %v1696_v29  ;;  %v8665_v36 = vcombine.high %v1700_v33, %v1704_v34  ;;  %v8664_v40 = vcombine.low %v1700_v33, %v1704_v34  ;;  %v1550_v29 = vld [vmem:[#allocation7 + $0x1d8] sm:$0xff] }
 0x2f5   : > { %6552 = vmatpush1.bf16.msra.mxu0 %v8806_v56  ;;  %v1558_v34 = vld [vmem:[#allocation7 + $0x218] sm:$0xff] }
 0x2f6   : > { %6553 = vmatprep.subr.bf16.mxu0 %v8815_v9  ;;  %v8469_v9 = vcombine.high %v1502_v2, %v1506_v5  ;;  %v1606_v5 = vld [vmem:[#allocation7 + $0x398] sm:$0xff] }
 0x2f7   : > { %3197 = vmatpush1.bf16.msra.mxu1 %v8600_v42  ;;  %v1716_v42 = vld [vmem:[#allocation7 + $0x708] sm:$0xff] }
 0x2f8   : > { %3198 = vmatprep.subr.bf16.mxu1 %v8609_v44  ;;  %v8672_v44 = vcombine.low %v1708_v37, %v1712_v39  ;;  %v8681_v45 = vcombine.high %v1716_v42, %v1720_v43  ;;  %v8680_v50 = vcombine.low %v1716_v42, %v1720_v43  ;;  %v10798_v37 = vld [vmem:[#allocation10 + $0x420] sm:$0xff]  ;;  %v1566_v43 = vld [vmem:[#allocation7 + $0x258] sm:$0xff] }
 0x2f9   : > { %6554 = vmatpush1.bf16.msra.mxu0 %v8814_v6 }
 0x2fa   : > { %6555 = vmatprep.subr.bf16.mxu0 %v8823_v19  ;;  %v8485_v19 = vcombine.high %v1518_v16, %v1522_v17 }
 0x2fb   : > { %3199 = vmatpush1.bf16.msra.mxu1 %v8608_v54  ;;  %v1732_v54 = vld [vmem:[#allocation7 + $0x788] sm:$0xff] }
 0x2fc   : > { %3200 = vmatprep.subr.bf16.mxu1 %v8617_v57  ;;  %v8688_v57 = vcombine.low %v1724_v47, %v1728_v49  ;;  %v8697_v58 = vcombine.high %v1732_v54, %v1736_v55  ;;  %v8696_v56 = vcombine.low %v1732_v54, %v1736_v55  ;;  %v1574_v49 = vld [vmem:[#allocation7 + $0x298] sm:$0xff] }
 0x2fd   : > { %6556 = vmatpush1.bf16.msra.mxu0 %v8822_v18  ;;  %v1582_v55 = vld [vmem:[#allocation7 + $0x2d8] sm:$0xff] }
 0x2fe   : > { %6557 = vmatprep.subr.bf16.mxu0 %v8831_v25  ;;  %v1542_v25 = vld [vmem:[#allocation7 + $0x198] sm:$0xff] }
 0x2ff   : > { %3201 = vmatpush1.bf16.msra.mxu1 %v8616_v62  ;;  %v1494_v62 = vld [vmem:[#allocation7 + $0x18] sm:$0xff] }
 0x300   : > { %3202 = vmatprep.subr.bf16.mxu1 %v8625_v0  ;;  %v8704_v0 = vcombine.low %v1740_v59, %v1744_v60  ;;  %v8461_v1 = vcombine.high %v1494_v62, %v1498_v63  ;;  %v8460_v6 = vcombine.low %v1494_v62, %v1498_v63  ;;  %v1590_v60 = vld [vmem:[#allocation7 + $0x318] sm:$0xff] }
 0x301   : > { %6558 = vmatpush1.bf16.msra.mxu0 %v8830_v8  ;;  %v1598_v63 = vld [vmem:[#allocation7 + $0x358] sm:$0xff] }
 0x303   : > { %3203 = vmatpush1.bf16.msra.mxu1 %v8624_v11  ;;  %v1510_v11 = vld [vmem:[#allocation7 + $0x98] sm:$0xff] }
 0x304   : > { %3204 = vmatprep.subr.bf16.mxu1 %v8633_v12  ;;  %v1514_v12 = vld [vmem:[#allocation7 + $0xb8] sm:$0xff] }
 0x305   : > { %v8477_v14 = vcombine.high %v1510_v11, %v1514_v12  ;;  %v8476_v18 = vcombine.low %v1510_v11, %v1514_v12  ;;  %v1614_v12 = vld [vmem:[#allocation7 + $0x3d8] sm:$0xff] }
 0x307   : > { %3205 = vmatpush1.bf16.msra.mxu1 %v8632_v20  ;;  %v1526_v20 = vld [vmem:[#allocation7 + $0x118] sm:$0xff] }
 0x308   : > { %3206 = vmatprep.subr.bf16.mxu1 %v8641_v22  ;;  %v8484_v22 = vcombine.low %v1518_v16, %v1522_v17  ;;  %v8493_v23 = vcombine.high %v1526_v20, %v1530_v21  ;;  %v8492_v8 = vcombine.low %v1526_v20, %v1530_v21  ;;  %v1622_v17 = vld [vmem:[#allocation7 + $0x418] sm:$0xff] }
 0x309   : > { %v1630_v21 = vld [vmem:[#allocation7 + $0x458] sm:$0xff] }
 0x30b   : > { %3207 = vmatpush1.bf16.msra.mxu1 %v8640_v26  ;;  %v1546_v26 = vld [vmem:[#allocation7 + $0x1b8] sm:$0xff] }
 0x30c   : > { %3208 = vmatprep.subr.bf16.mxu1 %v8649_v27  ;;  %v8500_v27 = vcombine.low %v1534_v7, %v1538_v24  ;;  %v8509_v28 = vcombine.high %v1542_v25, %v1546_v26 }
 0x30f   : > { %3209 = vmatpush1.bf16.msra.mxu1 %v8648_v30  ;;  %v1554_v30 = vld [vmem:[#allocation7 + $0x1f8] sm:$0xff] }
 0x310   : > { %3210 = vmatprep.subr.bf16.mxu1 %v8657_v31  ;;  %v8508_v31 = vcombine.low %v1542_v25, %v1546_v26  ;;  %v8517_v33 = vcombine.high %v1550_v29, %v1554_v30  ;;  %v8516_v39 = vcombine.low %v1550_v29, %v1554_v30  ;;  %v1646_v26 = vld [vmem:[#allocation7 + $0x4d8] sm:$0xff] }
 0x311   : > { %v1654_v30 = vld [vmem:[#allocation7 + $0x518] sm:$0xff] }
 0x313   : > { %3211 = vmatpush1.bf16.msra.mxu1 %v8656_v35  ;;  %v1562_v35 = vld [vmem:[#allocation7 + $0x238] sm:$0xff] }
 0x314   : > { %3212 = vmatprep.subr.bf16.mxu1 %v8665_v36  ;;  %v10796_v36 = vld [vmem:[#allocation10 + $0x400] sm:$0xff]  ;;  %v8525_v42 = vcombine.high %v1558_v34, %v1562_v35 }
 0x317   : > { %3213 = vmatpush1.bf16.msra.mxu1 %v8664_v40  ;;  %v8838_v40 = vcombine.low %v10796_v36, %v10798_v37 }
 0x318   : > { %3214 = vmatprep.subr.bf16.mxu1 %v8673_v41  ;;  %v8839_v41 = vcombine.high %v10796_v36, %v10798_v37  ;;  %v1714_v36 = vld [vmem:[#allocation7 + $0x6f8] sm:$0xff]  ;;  %v3573_v37 = vld [vmem:[#allocation10 + $0x500] sm:$0xff] }
 0x31a   : > { %6568 = vmatprep.subr.bf16.mxu0 %v8839_v41  ;;  %v10806_v41 = vld [vmem:[#allocation8] sm:$0xff] }
 0x31b   : > { %3215 = vmatpush1.bf16.msra.mxu1 %v8672_v44  ;;  %v1570_v44 = vld [vmem:[#allocation7 + $0x278] sm:$0xff] }
 0x31c   : > { %3216 = vmatprep.subr.bf16.mxu1 %v8681_v45  ;;  %v8524_v45 = vcombine.low %v1558_v34, %v1562_v35  ;;  %v8533_v47 = vcombine.high %v1566_v43, %v1570_v44  ;;  %v1662_v35 = vld [vmem:[#allocation7 + $0x558] sm:$0xff] }
 0x31f   : > { %3217 = vmatpush1.bf16.msra.mxu1 %v8680_v50  ;;  %v1578_v50 = vld [vmem:[#allocation7 + $0x2b8] sm:$0xff] }
 0x320   : > { %3218 = vmatprep.subr.bf16.mxu1 %v8689_v53  ;;  %v8532_v53 = vcombine.low %v1566_v43, %v1570_v44  ;;  %v8541_v54 = vcombine.high %v1574_v49, %v1578_v50  ;;  %v1674_v43 = vld [vmem:[#allocation7 + $0x5b8] sm:$0xff]  ;;  %v1752_v44 = vrot.slane %v10806_v41, %v10765_v3 }
 0x323   : > { %3219 = vmatpush1.bf16.msra.mxu1 %v8688_v57  ;;  %v1586_v57 = vld [vmem:[#allocation7 + $0x2f8] sm:$0xff] }
 0x324   : > { %3220 = vmatprep.subr.bf16.mxu1 %v8697_v58  ;;  %v8540_v58 = vcombine.low %v1574_v49, %v1578_v50  ;;  %v8549_v59 = vcombine.high %v1582_v55, %v1586_v57 }
 0x327   : > { %3221 = vmatpush1.bf16.msra.mxu1 %v8696_v56  ;;  %v1594_v56 = vld [vmem:[#allocation7 + $0x338] sm:$0xff] }
 0x328   : > { %3222 = vmatprep.subr.bf16.mxu1 %v8705_v61  ;;  %v8548_v61 = vcombine.low %v1582_v55, %v1586_v57  ;;  %v8557_v62 = vcombine.high %v1590_v60, %v1594_v56 }
 0x32b   : > { %3223 = vmatpush1.bf16.msra.mxu1 %v8704_v0  ;;  %v1602_v0 = vld [vmem:[#allocation7 + $0x378] sm:$0xff] }
 0x32c   : > { %3315 = vmatprep.subr.bf16.mxu1 %v8461_v1  ;;  %v8556_v1 = vcombine.low %v1590_v60, %v1594_v56  ;;  %v8565_v2 = vcombine.high %v1598_v63, %v1602_v0 }
 0x32e   : > { %3225 = vmatmul.mubr.bf16.vlgmr.msra.gmra.mrb[4].mxu1 %v10787_v15 }
 0x32f   : > { %3316 = vmatpush1.bf16.msra.mxu1 %v8460_v6  ;;  %3347 = vmatprep.mubr.bf16.mxu1 %v10760_v4  ;;  %v8501_v4 = vcombine.high %v1534_v7, %v1538_v24  ;;  %v1610_v6 = vld [vmem:[#allocation7 + $0x3b8] sm:$0xff] }
 0x330   : > { %3317 = vmatprep.subr.bf16.mxu1 %v8469_v9  ;;  %v8564_v9 = vcombine.low %v1598_v63, %v1602_v0  ;;  %v8573_v11 = vcombine.high %v1606_v5, %v1610_v6  ;;  %v1638_v24 = vld [vmem:[#allocation7 + $0x498] sm:$0xff] }
 0x331   : > { %v1686_v63 = vld [vmem:[#allocation7 + $0x618] sm:$0xff] }
 0x333   : > { %3318 = vmatpush1.bf16.msra.mxu1 %v8468_v13  ;;  %v1618_v13 = vld [vmem:[#allocation7 + $0x3f8] sm:$0xff] }
 0x334   : > { %3319 = vmatprep.subr.bf16.mxu1 %v8477_v14  ;;  %v8572_v14 = vcombine.low %v1606_v5, %v1610_v6  ;;  %v8581_v16 = vcombine.high %v1614_v12, %v1618_v13  ;;  %v3553_v5 = vld [vmem:[#allocation10 + $0x460] sm:$0xff] }
 0x335   : > { %v10812_v6 = vld [vmem:[#allocation10 + $0x800] sm:$0xff] }
 0x337   : > { %3320 = vmatpush1.bf16.msra.mxu1 %v8476_v18  ;;  %v1626_v18 = vld [vmem:[#allocation7 + $0x438] sm:$0xff] }
 0x338   : > { %3321 = vmatprep.subr.bf16.mxu1 %v8485_v19  ;;  %v8580_v19 = vcombine.low %v1614_v12, %v1618_v13  ;;  %v8589_v20 = vcombine.high %v1622_v17, %v1626_v18 }
 0x33b   : > { %3322 = vmatpush1.bf16.msra.mxu1 %v8484_v22  ;;  %v1634_v22 = vld [vmem:[#allocation7 + $0x478] sm:$0xff] }
 0x33c   : > { %3323 = vmatprep.subr.bf16.mxu1 %v8493_v23  ;;  %v8588_v23 = vcombine.low %v1622_v17, %v1626_v18  ;;  %v8597_v7 = vcombine.high %v1630_v21, %v1634_v22 }
 0x33f   : > { %3324 = vmatpush1.bf16.msra.mxu1 %v8492_v8  ;;  %v1642_v8 = vld [vmem:[#allocation7 + $0x4b8] sm:$0xff] }
 0x340   : > { %3325 = vmatprep.subr.bf16.mxu1 %v8501_v4  ;;  %v8596_v4 = vcombine.low %v1630_v21, %v1634_v22  ;;  %v8605_v25 = vcombine.high %v1638_v24, %v1642_v8  ;;  %v3561_v21 = vld [vmem:[#allocation10 + $0x4a0] sm:$0xff] }
 0x343   : > { %3326 = vmatpush1.bf16.msra.mxu1 %v8500_v27  ;;  %v1650_v27 = vld [vmem:[#allocation7 + $0x4f8] sm:$0xff] }
 0x344   : > { %3327 = vmatprep.subr.bf16.mxu1 %v8509_v28  ;;  %v8604_v28 = vcombine.low %v1638_v24, %v1642_v8  ;;  %v8613_v29 = vcombine.high %v1646_v26, %v1650_v27  ;;  %v1702_v24 = vld [vmem:[#allocation7 + $0x698] sm:$0xff] }
 0x347   : > { %3328 = vmatpush1.bf16.msra.mxu1 %v8508_v31  ;;  %v1658_v31 = vld [vmem:[#allocation7 + $0x538] sm:$0xff] }
 0x348   : > { %3329 = vmatprep.subr.bf16.mxu1 %v8517_v33  ;;  %v8612_v33 = vcombine.low %v1646_v26, %v1650_v27  ;;  %v8621_v34 = vcombine.high %v1654_v30, %v1658_v31  ;;  %v3569_v26 = vld [vmem:[#allocation10 + $0x4e0] sm:$0xff] }
 0x34b   : > { %3330 = vmatpush1.bf16.msra.mxu1 %v8516_v39  ;;  %v8620_v39 = vcombine.low %v1654_v30, %v1658_v31  ;;  %v1710_v30 = vld [vmem:[#allocation7 + $0x6d8] sm:$0xff] }
 0x34c   : > { %3331 = vmatprep.subr.bf16.mxu1 %v8525_v42  ;;  %v1670_v42 = vld [vmem:[#allocation7 + $0x598] sm:$0xff] }
 0x34d   : > { %v8637_v49 = vcombine.high %v1670_v42, %v1674_v43  ;;  %v8636_v60 = vcombine.low %v1670_v42, %v1674_v43  ;;  %v3581_v42 = vld [vmem:[#allocation10 + $0x540] sm:$0xff] }
 0x34e   : > { %v3585_v43 = vld [vmem:[#allocation10 + $0x560] sm:$0xff] }
 0x34f   : > { %3332 = vmatpush1.bf16.msra.mxu1 %v8524_v45  ;;  %v1756_v45 = vrot.slane %v10806_v41, %v10754_v51 }
 0x350   : > { %3333 = vmatprep.subr.bf16.mxu1 %v8533_v47 }
 0x353   : > { %3334 = vmatpush1.bf16.msra.mxu1 %v8532_v53  ;;  %v1678_v53 = vld [vmem:[#allocation7 + $0x5d8] sm:$0xff] }
 0x354   : > { %3335 = vmatprep.subr.bf16.mxu1 %v8541_v54  ;;  %v1682_v54 = vld [vmem:[#allocation7 + $0x5f8] sm:$0xff] }
 0x355   : > { %v8644_v12 = vcombine.low %v1678_v53, %v1682_v54 }
 0x357   : > { %3336 = vmatpush1.bf16.msra.mxu1 %v8540_v58 }
 0x358   : > { %3337 = vmatprep.subr.bf16.mxu1 %v8549_v59 }
 0x35b   : > { %3338 = vmatpush1.bf16.msra.mxu1 %v8548_v61 }
 0x35c   : > { %3339 = vmatprep.subr.bf16.mxu1 %v8557_v62  ;;  %v8645_v62 = vcombine.high %v1678_v53, %v1682_v54  ;;  %v8879_v53 = vcombine.high %v3581_v42, %v3585_v43 }
 0x35f   : > { %3340 = vmatpush1.bf16.msra.mxu1 %v8556_v1  ;;  %v1690_v1 = vld [vmem:[#allocation7 + $0x638] sm:$0xff] }
 0x360   : > { %3341 = vmatprep.subr.bf16.mxu1 %v8565_v2  ;;  %v3549_v2 = vld [vmem:[#allocation10 + $0x440] sm:$0xff]  ;;  %v8652_v22 = vcombine.low %v1686_v63, %v1690_v1 }
 0x361   : > { %v8847_v17 = vcombine.high %v3549_v2, %v3553_v5 }
 0x363   : > { %3342 = vmatpush1.bf16.msra.mxu1 %v8564_v9  ;;  %v10814_v9 = vld [vmem:[#allocation10 + $0x820] sm:$0xff] }
 0x364   : > { %3343 = vmatprep.subr.bf16.mxu1 %v8573_v11  ;;  %v8966_v18 = vcombine.low %v10812_v6, %v10814_v9 }
 0x367   : > { %3344 = vmatpush1.bf16.msra.mxu1 %v8572_v14  ;;  %v8653_v14 = vcombine.high %v1686_v63, %v1690_v1  ;;  %v1734_v63 = vld [vmem:[#allocation7 + $0x798] sm:$0xff] }
 0x368   : > { %3345 = vmatprep.subr.bf16.mxu1 %v8581_v16  ;;  %v1694_v16 = vld [vmem:[#allocation7 + $0x658] sm:$0xff] }
 0x369   : > { %v1738_v1 = vld [vmem:[#allocation7 + $0x7b8] sm:$0xff] }
 0x36b   : > { %3346 = vmatpush1.bf16.msra.mxu1 %v8580_v19  ;;  %v1698_v19 = vld [vmem:[#allocation7 + $0x678] sm:$0xff] }
 0x36c   : > { %3356 = vmatprep.subr.bf16.mxu1 %v8589_v20  ;;  %v3557_v20 = vld [vmem:[#allocation10 + $0x480] sm:$0xff]  ;;  %v8660_v27 = vcombine.low %v1694_v16, %v1698_v19 }
 0x36d   : > { %v8855_v8 = vcombine.high %v3557_v20, %v3561_v21 }
 0x36e   : > { %3348 = vmatmul.mubr.bf16.vlgmr.msra.gmra.mrb[8].mxu1 %v10774_v48  ;;  %v1666_v48 = vld [vmem:[#allocation7 + $0x578] sm:$0xff] }
 0x36f   : > { %3357 = vmatpush1.bf16.msra.mxu1 %v8588_v23  ;;  %3388 = vmatprep.mubr.bf16.mxu1 %v10776_v52  ;;  %v8629_v52 = vcombine.high %v1662_v35, %v1666_v48  ;;  %v8628_v47 = vcombine.low %v1662_v35, %v1666_v48  ;;  %v8846_v23 = vcombine.low %v3549_v2, %v3553_v5  ;;  %v1718_v48 = vld [vmem:[#allocation7 + $0x718] sm:$0xff]  ;;  %v3597_v2 = vld [vmem:[#allocation10 + $0x5c0] sm:$0xff] }
 0x370   : > { %3358 = vmatprep.subr.bf16.mxu1 %v8597_v7  ;;  %v8661_v7 = vcombine.high %v1694_v16, %v1698_v19  ;;  %v8677_v35 = vcombine.high %v1710_v30, %v1714_v36  ;;  %v3601_v5 = vld [vmem:[#allocation10 + $0x5e0] sm:$0xff]  ;;  %v8701_v16 = vcombine.high %v1734_v63, %v1738_v1 }
 0x371   : > { %v8895_v19 = vcombine.high %v3597_v2, %v3601_v5 }
 0x373   : > { %3359 = vmatpush1.bf16.msra.mxu1 %v8596_v4  ;;  %v1706_v4 = vld [vmem:[#allocation7 + $0x6b8] sm:$0xff] }
 0x374   : > { %3360 = vmatprep.subr.bf16.mxu1 %v8605_v25  ;;  %v3565_v25 = vld [vmem:[#allocation10 + $0x4c0] sm:$0xff] }
 0x375   : > { %v8863_v31 = vcombine.high %v3565_v25, %v3569_v26 }
 0x377   : > { %3361 = vmatpush1.bf16.msra.mxu1 %v8604_v28  ;;  %v8854_v28 = vcombine.low %v3557_v20, %v3561_v21  ;;  %v1746_v20 = vld [vmem:[#allocation7 + $0x7f8] sm:$0xff]  ;;  %v3605_v21 = vld [vmem:[#allocation10 + $0x600] sm:$0xff] }
 0x378   : > { %3362 = vmatprep.subr.bf16.mxu1 %v8613_v29  ;;  %v8669_v29 = vcombine.high %v1702_v24, %v1706_v4 }
 0x37b   : > { %3363 = vmatpush1.bf16.msra.mxu1 %v8612_v33  ;;  %v8668_v33 = vcombine.low %v1702_v24, %v1706_v4 }
 0x37c   : > { %3364 = vmatprep.subr.bf16.mxu1 %v8621_v34  ;;  %v8862_v34 = vcombine.low %v3565_v25, %v3569_v26  ;;  %v3418_v25 = vld [vmem:[#allocation10 + $0x28] sm:$0xff]  ;;  %v3613_v26 = vld [vmem:[#allocation10 + $0x640] sm:$0xff] }
 0x37f   : > { %3365 = vmatpush1.bf16.msra.mxu1 %v8620_v39 }
 0x380   : > { %3366 = vmatprep.subr.bf16.mxu1 %v8629_v52  ;;  %v1722_v52 = vld [vmem:[#allocation7 + $0x738] sm:$0xff] }
 0x381   : > { %v3144_v50 = vpop.f32.mrb[0].mxu1 }
 0x382   : > { %v9354_v55 = vadd.f32 %v3144_v50, %v1752_v44  ;;  %v3146_v57 = vpop.f32.mrb[1].mxu1  ;;  %v8676_v44 = vcombine.low %v1710_v30, %v1714_v36  ;;  %v1726_v50 = vld [vmem:[#allocation7 + $0x758] sm:$0xff]  ;;  %v3422_v36 = vld [vmem:[#allocation10 + $0x48] sm:$0xff] }
 0x383   : > { %v9355_v58 = vadd.f32 %v3146_v57, %v1756_v45  ;;  %v3148_v59 = vpop.f32.mrb[2].mxu1  ;;  %3367 = vmatpush1.bf16.msra.mxu1 %v8628_v47  ;;  %v3589_v57 = vld [vmem:[#allocation10 + $0x580] sm:$0xff] }
 0x384   : > { %v3397_v56 = vmax.f32 %v9354_v55, 0.0  ;;  %v3149_v61 = vpop.f32.mrb[3].mxu1  ;;  %3368 = vmatprep.subr.bf16.mxu1 %v8637_v49  ;;  %v8685_v49 = vcombine.high %v1718_v48, %v1722_v52  ;;  %v1730_v55 = vld [vmem:[#allocation7 + $0x778] sm:$0xff] }
 0x385   : > { %v3398_v0 = vmax.f32 %v9355_v58, 0.0  ;;  %v3593_v58 = vld [vmem:[#allocation10 + $0x5a0] sm:$0xff]  ;;  %v8878_v61 = vcombine.low %v3581_v42, %v3585_v43 }
 0x386   : > { %v10818_v13 = vpack.c.bf16 %v3397_v56, %v3397_v56  ;;  %v8684_v56 = vcombine.low %v1718_v48, %v1722_v52  ;;  %v3434_v52 = vld [vmem:[#allocation10 + $0xa8] sm:$0xff]  ;;  %v3629_v43 = vld [vmem:[#allocation10 + $0x6c0] sm:$0xff] }
 0x387   : > { %v10816_v11 = vpack.c.bf16 %v3398_v0, %v3398_v0  ;;  %3369 = vmatpush1.bf16.msra.mxu1 %v8636_v60  ;;  %v8887_v0 = vcombine.high %v3589_v57, %v3593_v58 }
 0x388   : > { %3370 = vmatprep.subr.bf16.mxu1 %v8645_v62  ;;  %v8693_v62 = vcombine.high %v1726_v50, %v1730_v55 }
 0x389   : > { %6559 = vmatprep.mubr.bf16.mxu0 %v10816_v11 }
 0x38a   : > { %6560 = vmatmul.mubr.bf16.vlgmr.msra.gmra.mrb[4].mxu0 %v10818_v13 }
 0x38b   : > { %3371 = vmatpush1.bf16.msra.mxu1 %v8644_v12  ;;  %6569 = vmatpush1.bf16.msra.mxu0 %v8838_v40  ;;  %v3577_v40 = vld [vmem:[#allocation10 + $0x520] sm:$0xff]  ;;  %v8692_v12 = vcombine.low %v1726_v50, %v1730_v55  ;;  %v3442_v55 = vld [vmem:[#allocation10 + $0xe8] sm:$0xff] }
 0x38c   : > { %3372 = vmatprep.subr.bf16.mxu1 %v8653_v14  ;;  %6570 = vmatprep.subr.bf16.mxu0 %v8847_v17  ;;  %v8871_v39 = vcombine.high %v3573_v37, %v3577_v40  ;;  %v8870_v45 = vcombine.low %v3573_v37, %v3577_v40  ;;  %v8886_v14 = vcombine.low %v3589_v57, %v3593_v58  ;;  %v1742_v17 = vld [vmem:[#allocation7 + $0x7d8] sm:$0xff]  ;;  %v3426_v37 = vld [vmem:[#allocation10 + $0x68] sm:$0xff]  ;;  %v3621_v40 = vld [vmem:[#allocation10 + $0x680] sm:$0xff] }
 0x38d   : > { %v8709_v24 = vcombine.high %v1742_v17, %v1746_v20  ;;  %v3637_v58 = vld [vmem:[#allocation10 + $0x700] sm:$0xff] }
 0x38f   : > { %3373 = vmatpush1.bf16.msra.mxu1 %v8652_v22  ;;  %6571 = vmatpush1.bf16.msra.mxu0 %v8846_v23  ;;  %v3609_v22 = vld [vmem:[#allocation10 + $0x620] sm:$0xff]  ;;  %v8700_v23 = vcombine.low %v1734_v63, %v1738_v1 }
 0x390   : > { %3374 = vmatprep.subr.bf16.mxu1 %v8661_v7  ;;  %6572 = vmatprep.subr.bf16.mxu0 %v8855_v8  ;;  %v8894_v7 = vcombine.low %v3597_v2, %v3601_v5  ;;  %v3414_v8 = vld [vmem:[#allocation10 + $0x8] sm:$0xff]  ;;  %v8903_v4 = vcombine.high %v3605_v21, %v3609_v22  ;;  %v3649_v1 = vld [vmem:[#allocation10 + $0x760] sm:$0xff] }
 0x391   : > { %v8713_v30 = vcombine.high %v3414_v8, %v3418_v25 }
 0x393   : > { %3375 = vmatpush1.bf16.msra.mxu1 %v8660_v27  ;;  %6573 = vmatpush1.bf16.msra.mxu0 %v8854_v28  ;;  %v3617_v27 = vld [vmem:[#allocation10 + $0x660] sm:$0xff]  ;;  %v8708_v28 = vcombine.low %v1742_v17, %v1746_v20 }
 0x394   : > { %3376 = vmatprep.subr.bf16.mxu1 %v8669_v29  ;;  %6574 = vmatprep.subr.bf16.mxu0 %v8863_v31  ;;  %v8902_v29 = vcombine.low %v3605_v21, %v3609_v22  ;;  %v8911_v31 = vcombine.high %v3613_v26, %v3617_v27  ;;  %v8910_v48 = vcombine.low %v3613_v26, %v3617_v27  ;;  %v3657_v20 = vld [vmem:[#allocation10 + $0x7a0] sm:$0xff] }
 0x397   : > { %3377 = vmatpush1.bf16.msra.mxu1 %v8668_v33  ;;  %6575 = vmatpush1.bf16.msra.mxu0 %v8862_v34  ;;  %v10827_v47 = vpop.f32.mrb[0].mxu0  ;;  %v3625_v33 = vld [vmem:[#allocation10 + $0x6a0] sm:$0xff]  ;;  %v8712_v34 = vcombine.low %v3414_v8, %v3418_v25 }
 0x398   : > { %3378 = vmatprep.subr.bf16.mxu1 %v8677_v35  ;;  %6576 = vmatprep.subr.bf16.mxu0 %v8871_v39  ;;  %v10829_v54 = vpop.f32.mrb[1].mxu0  ;;  %v8721_v35 = vcombine.high %v3422_v36, %v3426_v37  ;;  %v3430_v39 = vld [vmem:[#allocation10 + $0x88] sm:$0xff]  ;;  %v8919_v42 = vcombine.high %v3621_v40, %v3625_v33  ;;  %v8918_v50 = vcombine.low %v3621_v40, %v3625_v33  ;;  %v3665_v25 = vld [vmem:[#allocation10 + $0x7e0] sm:$0xff] }
 0x399   : > { %v3312_v59 = vpop.f32.mrb[2].mxu0  ;;  %v3478_v33 = vld [vmem:[#allocation10 + $0x208] sm:$0xff] }
 0x39a   : > { %v3313_v60 = vpop.f32.mrb[3].mxu0  ;;  %v3641_v59 = vld [vmem:[#allocation10 + $0x720] sm:$0xff] }
 0x39b   : > { %3379 = vmatpush1.bf16.msra.mxu1 %v8676_v44  ;;  %6577 = vmatpush1.bf16.msra.mxu0 %v8870_v45  ;;  %v3633_v44 = vld [vmem:[#allocation10 + $0x6e0] sm:$0xff]  ;;  %v8720_v45 = vcombine.low %v3422_v36, %v3426_v37  ;;  %v8728_v60 = vcombine.low %v3430_v39, %v3434_v52  ;;  %v8935_v63 = vcombine.high %v3637_v58, %v3641_v59 }
 0x39c   : > { %3380 = vmatprep.subr.bf16.mxu1 %v8685_v49  ;;  %6578 = vmatprep.subr.bf16.mxu0 %v8879_v53  ;;  %v8729_v49 = vcombine.high %v3430_v39, %v3434_v52  ;;  %v3438_v53 = vld [vmem:[#allocation10 + $0xc8] sm:$0xff]  ;;  %v8927_v57 = vcombine.high %v3629_v43, %v3633_v44 }
 0x39d   : > { %v8736_v2 = vcombine.low %v3438_v53, %v3442_v55  ;;  %v3486_v52 = vld [vmem:[#allocation10 + $0x248] sm:$0xff] }
 0x39f   : > { %3381 = vmatpush1.bf16.msra.mxu1 %v8684_v56  ;;  %6579 = vmatpush1.bf16.msra.mxu0 %v8878_v61  ;;  %v8926_v56 = vcombine.low %v3629_v43, %v3633_v44  ;;  %v3446_v61 = vld [vmem:[#allocation10 + $0x108] sm:$0xff] }
 0x3a0   : > { %3382 = vmatprep.subr.bf16.mxu1 %v8693_v62  ;;  %6580 = vmatprep.subr.bf16.mxu0 %v8887_v0  ;;  %v3450_v62 = vld [vmem:[#allocation10 + $0x128] sm:$0xff]  ;;  %v3645_v0 = vld [vmem:[#allocation10 + $0x740] sm:$0xff] }
 0x3a1   : > { %v8745_v5 = vcombine.high %v3446_v61, %v3450_v62  ;;  %v8943_v17 = vcombine.high %v3645_v0, %v3649_v1  ;;  %v8744_v21 = vcombine.low %v3446_v61, %v3450_v62  ;;  %v3518_v62 = vld [vmem:[#allocation10 + $0x348] sm:$0xff] }
 0x3a3   : > { %3383 = vmatpush1.bf16.msra.mxu1 %v8692_v12  ;;  %6581 = vmatpush1.bf16.msra.mxu0 %v8886_v14  ;;  %v8934_v12 = vcombine.low %v3637_v58, %v3641_v59  ;;  %v3454_v14 = vld [vmem:[#allocation10 + $0x148] sm:$0xff] }
 0x3a4   : > { %3384 = vmatprep.subr.bf16.mxu1 %v8701_v16  ;;  %6582 = vmatprep.subr.bf16.mxu0 %v8895_v19  ;;  %v3458_v16 = vld [vmem:[#allocation10 + $0x168] sm:$0xff]  ;;  %v3653_v19 = vld [vmem:[#allocation10 + $0x780] sm:$0xff] }
 0x3a5   : > { %v8753_v22 = vcombine.high %v3454_v14, %v3458_v16  ;;  %v8951_v8 = vcombine.high %v3653_v19, %v3657_v20  ;;  %v8752_v26 = vcombine.low %v3454_v14, %v3458_v16  ;;  %v3534_v16 = vld [vmem:[#allocation10 + $0x3c8] sm:$0xff] }
 0x3a7   : > { %3385 = vmatpush1.bf16.msra.mxu1 %v8700_v23  ;;  %6583 = vmatpush1.bf16.msra.mxu0 %v8894_v7  ;;  %v8942_v23 = vcombine.low %v3645_v0, %v3649_v1  ;;  %v3462_v7 = vld [vmem:[#allocation10 + $0x188] sm:$0xff] }
 0x3a8   : > { %3386 = vmatprep.subr.bf16.mxu1 %v8709_v24  ;;  %6584 = vmatprep.subr.bf16.mxu0 %v8903_v4  ;;  %v3466_v24 = vld [vmem:[#allocation10 + $0x1a8] sm:$0xff]  ;;  %v3661_v4 = vld [vmem:[#allocation10 + $0x7c0] sm:$0xff] }
 0x3a9   : > { %v8761_v27 = vcombine.high %v3462_v7, %v3466_v24  ;;  %v8760_v36 = vcombine.low %v3462_v7, %v3466_v24  ;;  %v8958_v40 = vcombine.low %v3661_v4, %v3665_v25  ;;  %v3550_v24 = vld [vmem:[#allocation10 + $0x448] sm:$0xff] }
 0x3ab   : > { %3387 = vmatpush1.bf16.msra.mxu1 %v8708_v28  ;;  %6585 = vmatpush1.bf16.msra.mxu0 %v8902_v29  ;;  %v8950_v28 = vcombine.low %v3653_v19, %v3657_v20  ;;  %v3470_v29 = vld [vmem:[#allocation10 + $0x1c8] sm:$0xff] }
 0x3ac   : > { %6691 = vmatprep.subr.bf16.mxu1 %v8713_v30  ;;  %6586 = vmatprep.subr.bf16.mxu0 %v8911_v31  ;;  %v3474_v30 = vld [vmem:[#allocation10 + $0x1e8] sm:$0xff]  ;;  %v8959_v31 = vcombine.high %v3661_v4, %v3665_v25 }
 0x3ad   : > { %v8769_v37 = vcombine.high %v3470_v29, %v3474_v30 }
 0x3ae   : > { %3389 = vmatmul.mubr.bf16.vlgmr.msra.gmra.mrb[8].mxu1 %v10787_v15  ;;  %v8737_v15 = vcombine.high %v3438_v53, %v3442_v55  ;;  %v3502_v55 = vld [vmem:[#allocation10 + $0x2c8] sm:$0xff] }
 0x3af   : > { %6692 = vmatpush1.bf16.msra.mxu1 %v8712_v34  ;;  %6723 = vmatprep.mubr.bf16.mxu1 %v10816_v11  ;;  %v3482_v34 = vld [vmem:[#allocation10 + $0x228] sm:$0xff] }
 0x3b0   : > { %6693 = vmatprep.subr.bf16.mxu1 %v8721_v35  ;;  %6587 = vmatpush1.bf16.msra.mxu0 %v8910_v48  ;;  %v8967_v35 = vcombine.high %v10812_v6, %v10814_v9  ;;  %v8768_v48 = vcombine.low %v3470_v29, %v3474_v30  ;;  %v8777_v39 = vcombine.high %v3478_v33, %v3482_v34  ;;  %v3566_v30 = vld [vmem:[#allocation10 + $0x4c8] sm:$0xff] }
 0x3b1   : > { %6588 = vmatprep.subr.bf16.mxu0 %v8919_v42  ;;  %v3490_v42 = vld [vmem:[#allocation10 + $0x268] sm:$0xff]  ;;  %v8776_v43 = vcombine.low %v3478_v33, %v3482_v34 }
 0x3b2   : > { %v8785_v44 = vcombine.high %v3486_v52, %v3490_v42  ;;  %v3578_v33 = vld [vmem:[#allocation10 + $0x528] sm:$0xff] }
 0x3b3   : > { %6694 = vmatpush1.bf16.msra.mxu1 %v8720_v45  ;;  %v3494_v45 = vld [vmem:[#allocation10 + $0x288] sm:$0xff] }
 0x3b4   : > { %6695 = vmatprep.subr.bf16.mxu1 %v8729_v49  ;;  %6589 = vmatpush1.bf16.msra.mxu0 %v8918_v50  ;;  %v3498_v49 = vld [vmem:[#allocation10 + $0x2a8] sm:$0xff]  ;;  %v8784_v50 = vcombine.low %v3486_v52, %v3490_v42 }
 0x3b5   : > { %6590 = vmatprep.subr.bf16.mxu0 %v8927_v57  ;;  %v8793_v53 = vcombine.high %v3494_v45, %v3498_v49  ;;  %v3506_v57 = vld [vmem:[#allocation10 + $0x2e8] sm:$0xff]  ;;  %v8792_v58 = vcombine.low %v3494_v45, %v3498_v49 }
 0x3b6   : > { %v8801_v59 = vcombine.high %v3502_v55, %v3506_v57  ;;  %v3586_v52 = vld [vmem:[#allocation10 + $0x568] sm:$0xff] }
 0x3b7   : > { %6696 = vmatpush1.bf16.msra.mxu1 %v8728_v60  ;;  %v3510_v60 = vld [vmem:[#allocation10 + $0x308] sm:$0xff] }
 0x3b8   : > { %6697 = vmatprep.subr.bf16.mxu1 %v8737_v15  ;;  %6591 = vmatpush1.bf16.msra.mxu0 %v8926_v56  ;;  %v3514_v15 = vld [vmem:[#allocation10 + $0x328] sm:$0xff]  ;;  %v8800_v56 = vcombine.low %v3502_v55, %v3506_v57 }
 0x3b9   : > { %6592 = vmatprep.subr.bf16.mxu0 %v8935_v63  ;;  %v8809_v61 = vcombine.high %v3510_v60, %v3514_v15  ;;  %v3522_v63 = vld [vmem:[#allocation10 + $0x368] sm:$0xff]  ;;  %v8808_v0 = vcombine.low %v3510_v60, %v3514_v15 }
 0x3ba   : > { %v8817_v1 = vcombine.high %v3518_v62, %v3522_v63  ;;  %v3590_v45 = vld [vmem:[#allocation10 + $0x588] sm:$0xff] }
 0x3bb   : > { %6698 = vmatpush1.bf16.msra.mxu1 %v8736_v2  ;;  %v3526_v2 = vld [vmem:[#allocation10 + $0x388] sm:$0xff] }
 0x3bc   : > { %6699 = vmatprep.subr.bf16.mxu1 %v8745_v5  ;;  %6593 = vmatpush1.bf16.msra.mxu0 %v8934_v12  ;;  %v3530_v5 = vld [vmem:[#allocation10 + $0x3a8] sm:$0xff]  ;;  %v8816_v12 = vcombine.low %v3518_v62, %v3522_v63 }
 0x3bd   : > { %6594 = vmatprep.subr.bf16.mxu0 %v8943_v17  ;;  %v8825_v14 = vcombine.high %v3526_v2, %v3530_v5  ;;  %v3538_v17 = vld [vmem:[#allocation10 + $0x3e8] sm:$0xff]  ;;  %v8824_v19 = vcombine.low %v3526_v2, %v3530_v5 }
 0x3be   : > { %v8833_v20 = vcombine.high %v3534_v16, %v3538_v17  ;;  %v3594_v49 = vld [vmem:[#allocation10 + $0x5a8] sm:$0xff] }
 0x3bf   : > { %6700 = vmatpush1.bf16.msra.mxu1 %v8744_v21  ;;  %v3542_v21 = vld [vmem:[#allocation10 + $0x408] sm:$0xff]  ;;  %v8889_v57 = vcombine.high %v3590_v45, %v3594_v49 }
 0x3c0   : > { %6701 = vmatprep.subr.bf16.mxu1 %v8753_v22  ;;  %6595 = vmatpush1.bf16.msra.mxu0 %v8942_v23  ;;  %v3546_v22 = vld [vmem:[#allocation10 + $0x428] sm:$0xff]  ;;  %v8832_v23 = vcombine.low %v3534_v16, %v3538_v17  ;;  %v3677_v16 = vld [vmem:[#allocation10 + $0x840] sm:$0xff] }
 0x3c1   : > { %6596 = vmatprep.subr.bf16.mxu0 %v8951_v8  ;;  %v8841_v7 = vcombine.high %v3542_v21, %v3546_v22  ;;  %v3554_v8 = vld [vmem:[#allocation10 + $0x468] sm:$0xff]  ;;  %v8840_v4 = vcombine.low %v3542_v21, %v3546_v22  ;;  %v3681_v17 = vld [vmem:[#allocation10 + $0x860] sm:$0xff] }
 0x3c2   : > { %v8849_v25 = vcombine.high %v3550_v24, %v3554_v8  ;;  %v3598_v60 = vld [vmem:[#allocation10 + $0x5c8] sm:$0xff] }
 0x3c3   : > { %6702 = vmatpush1.bf16.msra.mxu1 %v8752_v26  ;;  %v3558_v26 = vld [vmem:[#allocation10 + $0x488] sm:$0xff] }
 0x3c4   : > { %6703 = vmatprep.subr.bf16.mxu1 %v8761_v27  ;;  %6597 = vmatpush1.bf16.msra.mxu0 %v8950_v28  ;;  %v3562_v27 = vld [vmem:[#allocation10 + $0x4a8] sm:$0xff]  ;;  %v8848_v28 = vcombine.low %v3550_v24, %v3554_v8  ;;  %v3685_v8 = vld [vmem:[#allocation10 + $0x880] sm:$0xff] }
 0x3c5   : > { %6598 = vmatprep.subr.bf16.mxu0 %v8959_v31  ;;  %v8857_v29 = vcombine.high %v3558_v26, %v3562_v27  ;;  %v3570_v31 = vld [vmem:[#allocation10 + $0x4e8] sm:$0xff] }
 0x3c6   : > { %v8864_v34 = vcombine.low %v3566_v30, %v3570_v31  ;;  %v3602_v15 = vld [vmem:[#allocation10 + $0x5e8] sm:$0xff] }
 0x3c7   : > { %6704 = vmatpush1.bf16.msra.mxu1 %v8760_v36  ;;  %v8856_v36 = vcombine.low %v3558_v26, %v3562_v27  ;;  %v8897_v5 = vcombine.high %v3598_v60, %v3602_v15  ;;  %v8896_v22 = vcombine.low %v3598_v60, %v3602_v15  ;;  %v3618_v26 = vld [vmem:[#allocation10 + $0x668] sm:$0xff]  ;;  %v8974_v27 = vcombine.low %v3677_v16, %v3681_v17  ;;  %v3717_v15 = vld [vmem:[#allocation10 + $0x980] sm:$0xff] }
 0x3c8   : > { %6705 = vmatprep.subr.bf16.mxu1 %v8769_v37  ;;  %6599 = vmatpush1.bf16.msra.mxu0 %v8958_v40  ;;  %v8865_v37 = vcombine.high %v3566_v30, %v3570_v31  ;;  %v3574_v40 = vld [vmem:[#allocation10 + $0x508] sm:$0xff]  ;;  %v3693_v31 = vld [vmem:[#allocation10 + $0x8c0] sm:$0xff] }
 0x3c9   : > { %6609 = vmatprep.subr.bf16.mxu0 %v8967_v35  ;;  %v8873_v35 = vcombine.high %v3574_v40, %v3578_v33  ;;  %v8872_v42 = vcombine.low %v3574_v40, %v3578_v33  ;;  %v3626_v40 = vld [vmem:[#allocation10 + $0x6a8] sm:$0xff] }
 0x3cb   : > { %6706 = vmatpush1.bf16.msra.mxu1 %v8768_v48  ;;  %v1771_v48 = vsub.s32 5, %v10751_v46 }
 0x3cc   : > { %6707 = vmatprep.subr.bf16.mxu1 %v8777_v39  ;;  %v3582_v39 = vld [vmem:[#allocation10 + $0x548] sm:$0xff] }
 0x3cd   : > { %v8880_v55 = vcombine.low %v3582_v39, %v3586_v52 }
 0x3cf   : > { %6708 = vmatpush1.bf16.msra.mxu1 %v8776_v43  ;;  %v8881_v43 = vcombine.high %v3582_v39, %v3586_v52  ;;  %v3630_v39 = vld [vmem:[#allocation10 + $0x6c8] sm:$0xff] }
 0x3d0   : > { %6709 = vmatprep.subr.bf16.mxu1 %v8785_v44  ;;  %v1772_v44 = vrot.slane %v10806_v41, %v1771_v48  ;;  %v3634_v52 = vld [vmem:[#allocation10 + $0x6e8] sm:$0xff] }
 0x3d3   : > { %6710 = vmatpush1.bf16.msra.mxu1 %v8784_v50  ;;  %v1760_v50 = vrot.slane %v10806_v41, %v10783_v32 }
 0x3d4   : > { %6711 = vmatprep.subr.bf16.mxu1 %v8793_v53  ;;  %v1764_v53 = vrot.slane %v10806_v41, %v10768_v10 }
 0x3d7   : > { %6712 = vmatpush1.bf16.msra.mxu1 %v8792_v58  ;;  %v9359_v58 = vadd.f32 %v10829_v54, %v1772_v44 }
 0x3d8   : > { %6713 = vmatprep.subr.bf16.mxu1 %v8801_v59 }
 0x3db   : > { %6714 = vmatpush1.bf16.msra.mxu1 %v8800_v56 }
 0x3dc   : > { %6715 = vmatprep.subr.bf16.mxu1 %v8809_v61 }
 0x3df   : > { %6716 = vmatpush1.bf16.msra.mxu1 %v8808_v0  ;;  %v8888_v0 = vcombine.low %v3590_v45, %v3594_v49  ;;  %v8929_v45 = vcombine.high %v3630_v39, %v3634_v52  ;;  %v3709_v49 = vld [vmem:[#allocation10 + $0x940] sm:$0xff] }
 0x3e0   : > { %6717 = vmatprep.subr.bf16.mxu1 %v8817_v1 }
 0x3e3   : > { %6718 = vmatpush1.bf16.msra.mxu1 %v8816_v12  ;;  %v3402_v12 = vmax.f32 %v9359_v58, 0.0  ;;  %v8928_v58 = vcombine.low %v3630_v39, %v3634_v52 }
 0x3e4   : > { %6719 = vmatprep.subr.bf16.mxu1 %v8825_v14 }
 0x3e7   : > { %6720 = vmatpush1.bf16.msra.mxu1 %v8824_v19  ;;  %v3606_v19 = vld [vmem:[#allocation10 + $0x608] sm:$0xff] }
 0x3e8   : > { %6721 = vmatprep.subr.bf16.mxu1 %v8833_v20  ;;  %v3610_v20 = vld [vmem:[#allocation10 + $0x628] sm:$0xff] }
 0x3e9   : > { %v8905_v24 = vcombine.high %v3606_v19, %v3610_v20 }
 0x3eb   : > { %6722 = vmatpush1.bf16.msra.mxu1 %v8832_v23  ;;  %v8975_v23 = vcombine.high %v3677_v16, %v3681_v17  ;;  %v3658_v16 = vld [vmem:[#allocation10 + $0x7a8] sm:$0xff] }
 0x3ec   : > { %6732 = vmatprep.subr.bf16.mxu1 %v8841_v7  ;;  %v10849_v7 = vpack.c.bf16 %v3402_v12, %v3402_v12  ;;  %v3729_v12 = vld [vmem:[#allocation10 + $0x9e0] sm:$0xff] }
 0x3ee   : > { %6724 = vmatmul.mubr.bf16.vlgmr.msra.gmra.mrb[12].mxu1 %v10818_v13 }
 0x3ef   : > { %6733 = vmatpush1.bf16.msra.mxu1 %v8840_v4  ;;  %v3689_v4 = vld [vmem:[#allocation10 + $0x8a0] sm:$0xff] }
 0x3f0   : > { %6734 = vmatprep.subr.bf16.mxu1 %v8849_v25  ;;  %v3614_v25 = vld [vmem:[#allocation10 + $0x648] sm:$0xff]  ;;  %v8982_v33 = vcombine.low %v3685_v8, %v3689_v4 }
 0x3f1   : > { %v8913_v30 = vcombine.high %v3614_v25, %v3618_v26 }
 0x3f3   : > { %6735 = vmatpush1.bf16.msra.mxu1 %v8848_v28  ;;  %v8904_v28 = vcombine.low %v3606_v19, %v3610_v20 }
 0x3f4   : > { %6736 = vmatprep.subr.bf16.mxu1 %v8857_v29  ;;  %v8983_v29 = vcombine.high %v3685_v8, %v3689_v4  ;;  %v3662_v8 = vld [vmem:[#allocation10 + $0x7c8] sm:$0xff] }
 0x3f5   : > { %v3666_v4 = vld [vmem:[#allocation10 + $0x7e8] sm:$0xff] }
 0x3f7   : > { %6737 = vmatpush1.bf16.msra.mxu1 %v8856_v36  ;;  %v3697_v36 = vld [vmem:[#allocation10 + $0x8e0] sm:$0xff] }
 0x3f8   : > { %6738 = vmatprep.subr.bf16.mxu1 %v8865_v37  ;;  %v3622_v37 = vld [vmem:[#allocation10 + $0x688] sm:$0xff]  ;;  %v8991_v6 = vcombine.high %v3693_v31, %v3697_v36 }
 0x3f9   : > { %v8921_v9 = vcombine.high %v3622_v37, %v3626_v40 }
 0x3fb   : > { %6739 = vmatpush1.bf16.msra.mxu1 %v8864_v34  ;;  %v8912_v34 = vcombine.low %v3614_v25, %v3618_v26 }
 0x3fc   : > { %6740 = vmatprep.subr.bf16.mxu1 %v8873_v35  ;;  %v3705_v35 = vld [vmem:[#allocation10 + $0x920] sm:$0xff] }
 0x3ff   : > { %6741 = vmatpush1.bf16.msra.mxu1 %v8872_v42  ;;  %v8990_v42 = vcombine.low %v3693_v31, %v3697_v36  ;;  %v3670_v31 = vld [vmem:[#allocation10 + $0x808] sm:$0xff] }
 0x400   : > { %6742 = vmatprep.subr.bf16.mxu1 %v8881_v43  ;;  %v8920_v43 = vcombine.low %v3622_v37, %v3626_v40  ;;  %v3674_v36 = vld [vmem:[#allocation10 + $0x828] sm:$0xff]  ;;  %v8960_v40 = vcombine.low %v3662_v8, %v3666_v4 }
 0x401   : > { %v3226_v59 = vpop.f32.mrb[4].mxu1  ;;  %v8968_v52 = vcombine.low %v3670_v31, %v3674_v36 }
 0x402   : > { %v9356_v56 = vadd.f32 %v3226_v59, %v1760_v50  ;;  %v3228_v61 = vpop.f32.mrb[5].mxu1  ;;  %v3713_v50 = vld [vmem:[#allocation10 + $0x960] sm:$0xff] }
 0x403   : > { %v9357_v62 = vadd.f32 %v3228_v61, %v1764_v53  ;;  %v3230_v63 = vpop.f32.mrb[6].mxu1  ;;  %6743 = vmatpush1.bf16.msra.mxu1 %v8880_v55  ;;  %v3638_v53 = vld [vmem:[#allocation10 + $0x708] sm:$0xff]  ;;  %v9007_v59 = vcombine.high %v3709_v49, %v3713_v50 }
 0x404   : > { %v3399_v1 = vmax.f32 %v9356_v56, 0.0  ;;  %v3231_v2 = vpop.f32.mrb[7].mxu1  ;;  %6744 = vmatprep.subr.bf16.mxu1 %v8889_v57  ;;  %v3642_v55 = vld [vmem:[#allocation10 + $0x728] sm:$0xff]  ;;  %v3721_v56 = vld [vmem:[#allocation10 + $0x9a0] sm:$0xff]  ;;  %v9006_v63 = vcombine.low %v3709_v49, %v3713_v50 }
 0x405   : > { %v3400_v14 = vmax.f32 %v9357_v62, 0.0  ;;  %v8937_v60 = vcombine.high %v3638_v53, %v3642_v55  ;;  %v3646_v61 = vld [vmem:[#allocation10 + $0x748] sm:$0xff]  ;;  %v9014_v17 = vcombine.low %v3717_v15, %v3721_v56 }
 0x406   : > { %v10847_v21 = vpack.c.bf16 %v3399_v1, %v3399_v1  ;;  %v3650_v62 = vld [vmem:[#allocation10 + $0x768] sm:$0xff]  ;;  %v9015_v1 = vcombine.high %v3717_v15, %v3721_v56 }
 0x407   : > { %v10845_v54 = vpack.c.bf16 %v3400_v14, %v3400_v14  ;;  %6745 = vmatpush1.bf16.msra.mxu1 %v8888_v0  ;;  %v8936_v0 = vcombine.low %v3638_v53, %v3642_v55  ;;  %v8945_v2 = vcombine.high %v3646_v61, %v3650_v62  ;;  %v3654_v14 = vld [vmem:[#allocation10 + $0x788] sm:$0xff]  ;;  %v8944_v19 = vcombine.low %v3646_v61, %v3650_v62 }
 0x408   : > { %6746 = vmatprep.subr.bf16.mxu1 %v8897_v5  ;;  %v3725_v5 = vld [vmem:[#allocation10 + $0x9c0] sm:$0xff]  ;;  %v8952_v26 = vcombine.low %v3654_v14, %v3658_v16  ;;  %v3686_v49 = vld [vmem:[#allocation10 + $0x888] sm:$0xff] }
 0x409   : > { %6600 = vmatprep.mubr.bf16.mxu0 %v10845_v54  ;;  %6764 = vmatprep.mubr.bf16.mxu1 %v10845_v54  ;;  %v9023_v20 = vcombine.high %v3725_v5, %v3729_v12  ;;  %v9022_v25 = vcombine.low %v3725_v5, %v3729_v12  ;;  %v3690_v50 = vld [vmem:[#allocation10 + $0x8a8] sm:$0xff] }
 0x40a   : > { %6601 = vmatmul.mubr.bf16.vlgmr.msra.gmra.mrb[4].mxu0 %v10847_v21  ;;  %v3694_v15 = vld [vmem:[#allocation10 + $0x8c8] sm:$0xff]  ;;  %v8984_v62 = vcombine.low %v3686_v49, %v3690_v50 }
 0x40b   : > { %6610 = vmatpush1.bf16.msra.mxu0 %v8966_v18  ;;  %6641 = vmatprep.mubr.bf16.mxu0 %v10849_v7  ;;  %v3701_v18 = vld [vmem:[#allocation10 + $0x900] sm:$0xff]  ;;  %v3698_v56 = vld [vmem:[#allocation10 + $0x8e8] sm:$0xff] }
 0x40c   : > { %6747 = vmatpush1.bf16.msra.mxu1 %v8896_v22  ;;  %6611 = vmatprep.subr.bf16.mxu0 %v8975_v23  ;;  %v8999_v44 = vcombine.high %v3701_v18, %v3705_v35  ;;  %v8998_v57 = vcombine.low %v3701_v18, %v3705_v35  ;;  %v8953_v22 = vcombine.high %v3654_v14, %v3658_v16  ;;  %v3733_v23 = vld [vmem:[#allocation10 + $0xa00] sm:$0xff]  ;;  %v3678_v18 = vld [vmem:[#allocation10 + $0x848] sm:$0xff]  ;;  %v1767_v16 = vsub.s32 4, %v10751_v46 }
 0x40d   : > { %6748 = vmatprep.subr.bf16.mxu1 %v8905_v24  ;;  %v3737_v24 = vld [vmem:[#allocation10 + $0xa20] sm:$0xff]  ;;  %v3682_v35 = vld [vmem:[#allocation10 + $0x868] sm:$0xff] }
 0x40e   : > { %v9030_v37 = vcombine.low %v3733_v23, %v3737_v24  ;;  %v8976_v55 = vcombine.low %v3678_v18, %v3682_v35  ;;  %v3702_v5 = vld [vmem:[#allocation10 + $0x908] sm:$0xff] }
 0x40f   : > { %6612 = vmatpush1.bf16.msra.mxu0 %v8974_v27  ;;  %v9031_v27 = vcombine.high %v3733_v23, %v3737_v24  ;;  %v3706_v12 = vld [vmem:[#allocation10 + $0x928] sm:$0xff]  ;;  %v3785_v23 = vld [vmem:[#allocation10 + $0xba0] sm:$0xff] }
 0x410   : > { %6749 = vmatpush1.bf16.msra.mxu1 %v8904_v28  ;;  %6613 = vmatprep.subr.bf16.mxu0 %v8983_v29  ;;  %v8961_v28 = vcombine.high %v3662_v8, %v3666_v4  ;;  %v3741_v29 = vld [vmem:[#allocation10 + $0xa40] sm:$0xff]  ;;  %v3710_v24 = vld [vmem:[#allocation10 + $0x948] sm:$0xff] }
 0x411   : > { %6750 = vmatprep.subr.bf16.mxu1 %v8913_v30  ;;  %v3745_v30 = vld [vmem:[#allocation10 + $0xa60] sm:$0xff]  ;;  %v3714_v8 = vld [vmem:[#allocation10 + $0x968] sm:$0xff] }
 0x412   : > { %v9038_v39 = vcombine.low %v3741_v29, %v3745_v30 }
 0x413   : > { %6614 = vmatpush1.bf16.msra.mxu0 %v8982_v33  ;;  %v9039_v33 = vcombine.high %v3741_v29, %v3745_v30  ;;  %v3789_v29 = vld [vmem:[#allocation10 + $0xbc0] sm:$0xff] }
 0x414   : > { %6751 = vmatpush1.bf16.msra.mxu1 %v8912_v34  ;;  %6615 = vmatprep.subr.bf16.mxu0 %v8991_v6  ;;  %v8969_v34 = vcombine.high %v3670_v31, %v3674_v36  ;;  %v3749_v6 = vld [vmem:[#allocation10 + $0xa80] sm:$0xff]  ;;  %v3718_v31 = vld [vmem:[#allocation10 + $0x988] sm:$0xff] }
 0x415   : > { %6752 = vmatprep.subr.bf16.mxu1 %v8921_v9  ;;  %v3753_v9 = vld [vmem:[#allocation10 + $0xaa0] sm:$0xff]  ;;  %v3722_v36 = vld [vmem:[#allocation10 + $0x9a8] sm:$0xff] }
 0x416   : > { %v9046_v53 = vcombine.low %v3749_v6, %v3753_v9  ;;  %v3793_v30 = vld [vmem:[#allocation10 + $0xbe0] sm:$0xff] }
 0x417   : > { %6616 = vmatpush1.bf16.msra.mxu0 %v8990_v42  ;;  %v9047_v42 = vcombine.high %v3749_v6, %v3753_v9  ;;  %v3797_v6 = vld [vmem:[#allocation10 + $0xc00] sm:$0xff] }
 0x418   : > { %6753 = vmatpush1.bf16.msra.mxu1 %v8920_v43  ;;  %6617 = vmatprep.subr.bf16.mxu0 %v8999_v44  ;;  %v8977_v43 = vcombine.high %v3678_v18, %v3682_v35  ;;  %v3757_v44 = vld [vmem:[#allocation10 + $0xac0] sm:$0xff]  ;;  %v3726_v18 = vld [vmem:[#allocation10 + $0x9c8] sm:$0xff] }
 0x419   : > { %6754 = vmatprep.subr.bf16.mxu1 %v8929_v45  ;;  %v3761_v45 = vld [vmem:[#allocation10 + $0xae0] sm:$0xff]  ;;  %v3730_v35 = vld [vmem:[#allocation10 + $0x9e8] sm:$0xff] }
 0x41a   : > { %v9054_v61 = vcombine.low %v3757_v44, %v3761_v45  ;;  %v3801_v9 = vld [vmem:[#allocation10 + $0xc20] sm:$0xff] }
 0x41b   : > { %6618 = vmatpush1.bf16.msra.mxu0 %v8998_v57  ;;  %v9055_v57 = vcombine.high %v3757_v44, %v3761_v45  ;;  %v9025_v44 = vcombine.high %v3726_v18, %v3730_v35  ;;  %v3809_v45 = vld [vmem:[#allocation10 + $0xc60] sm:$0xff] }
 0x41c   : > { %6755 = vmatpush1.bf16.msra.mxu1 %v8928_v58  ;;  %6619 = vmatprep.subr.bf16.mxu0 %v9007_v59  ;;  %v8985_v58 = vcombine.high %v3686_v49, %v3690_v50  ;;  %v3765_v59 = vld [vmem:[#allocation10 + $0xb00] sm:$0xff]  ;;  %v3734_v49 = vld [vmem:[#allocation10 + $0xa08] sm:$0xff] }
 0x41d   : > { %6756 = vmatprep.subr.bf16.mxu1 %v8937_v60  ;;  %v3769_v60 = vld [vmem:[#allocation10 + $0xb20] sm:$0xff]  ;;  %v3738_v50 = vld [vmem:[#allocation10 + $0xa28] sm:$0xff] }
 0x41e   : > { %v9062_v14 = vcombine.low %v3765_v59, %v3769_v60 }
 0x41f   : > { %6620 = vmatpush1.bf16.msra.mxu0 %v9006_v63  ;;  %v9063_v63 = vcombine.high %v3765_v59, %v3769_v60  ;;  %v9033_v59 = vcombine.high %v3734_v49, %v3738_v50  ;;  %v3813_v60 = vld [vmem:[#allocation10 + $0xc80] sm:$0xff] }
 0x420   : > { %6757 = vmatpush1.bf16.msra.mxu1 %v8936_v0  ;;  %6621 = vmatprep.subr.bf16.mxu0 %v9015_v1  ;;  %v8993_v0 = vcombine.high %v3694_v15, %v3698_v56  ;;  %v3773_v1 = vld [vmem:[#allocation10 + $0xb40] sm:$0xff] }
 0x421   : > { %6758 = vmatprep.subr.bf16.mxu1 %v8945_v2  ;;  %v3777_v2 = vld [vmem:[#allocation10 + $0xb60] sm:$0xff] }
 0x422   : > { %v9070_v4 = vcombine.low %v3773_v1, %v3777_v2 }
 0x423   : > { %6622 = vmatpush1.bf16.msra.mxu0 %v9014_v17  ;;  %v8992_v17 = vcombine.low %v3694_v15, %v3698_v56  ;;  %v3817_v15 = vld [vmem:[#allocation10 + $0xca0] sm:$0xff]  ;;  %v3742_v56 = vld [vmem:[#allocation10 + $0xa48] sm:$0xff] }
 0x424   : > { %6759 = vmatpush1.bf16.msra.mxu1 %v8944_v19  ;;  %6623 = vmatprep.subr.bf16.mxu0 %v9023_v20  ;;  %v9071_v19 = vcombine.high %v3773_v1, %v3777_v2  ;;  %v9001_v20 = vcombine.high %v3702_v5, %v3706_v12  ;;  %v3821_v2 = vld [vmem:[#allocation10 + $0xcc0] sm:$0xff] }
 0x425   : > { %6760 = vmatprep.subr.bf16.mxu1 %v8953_v22  ;;  %v3781_v22 = vld [vmem:[#allocation10 + $0xb80] sm:$0xff] }
 0x427   : > { %6624 = vmatpush1.bf16.msra.mxu0 %v9022_v25  ;;  %v1768_v25 = vrot.slane %v10806_v41, %v1767_v16  ;;  %v9017_v41 = vcombine.high %v3718_v31, %v3722_v36 }
 0x428   : > { %6761 = vmatpush1.bf16.msra.mxu1 %v8952_v26  ;;  %6625 = vmatprep.subr.bf16.mxu0 %v9031_v27  ;;  %v9000_v26 = vcombine.low %v3702_v5, %v3706_v12  ;;  %v9079_v27 = vcombine.high %v3781_v22, %v3785_v23  ;;  %v3825_v5 = vld [vmem:[#allocation10 + $0xce0] sm:$0xff]  ;;  %v3750_v12 = vld [vmem:[#allocation10 + $0xa88] sm:$0xff] }
 0x429   : > { %6762 = vmatprep.subr.bf16.mxu1 %v8961_v28  ;;  %v9009_v28 = vcombine.high %v3710_v24, %v3714_v8 }
 0x42b   : > { %6626 = vmatpush1.bf16.msra.mxu0 %v9030_v37  ;;  %v9078_v37 = vcombine.low %v3781_v22, %v3785_v23  ;;  %v3829_v23 = vld [vmem:[#allocation10 + $0xd00] sm:$0xff] }
 0x42c   : > { %6763 = vmatpush1.bf16.msra.mxu1 %v8960_v40  ;;  %6627 = vmatprep.subr.bf16.mxu0 %v9039_v33  ;;  %v9358_v40 = vadd.f32 %v10827_v47, %v1768_v25  ;;  %v9008_v33 = vcombine.low %v3710_v24, %v3714_v8  ;;  %v3805_v47 = vld [vmem:[#allocation10 + $0xc40] sm:$0xff]  ;;  %v3758_v8 = vld [vmem:[#allocation10 + $0xac8] sm:$0xff]  ;;  %v9118_v25 = vcombine.low %v3821_v2, %v3825_v5 }
 0x42d   : > { %6773 = vmatprep.subr.bf16.mxu1 %v8969_v34  ;;  %v9087_v34 = vcombine.high %v3789_v29, %v3793_v30  ;;  %v3833_v24 = vld [vmem:[#allocation10 + $0xd20] sm:$0xff] }
 0x42f   : > { %6628 = vmatpush1.bf16.msra.mxu0 %v9038_v39  ;;  %6765 = vmatmul.mubr.bf16.vlgmr.msra.gmra.mrb[12].mxu1 %v10847_v21  ;;  %v9086_v39 = vcombine.low %v3789_v29, %v3793_v30  ;;  %v3837_v29 = vld [vmem:[#allocation10 + $0xd40] sm:$0xff] }
 0x430   : > { %6774 = vmatpush1.bf16.msra.mxu1 %v8968_v52  ;;  %6805 = vmatprep.mubr.bf16.mxu1 %v10849_v7  ;;  %v3401_v52 = vmax.f32 %v9358_v40, 0.0  ;;  %v3841_v30 = vld [vmem:[#allocation10 + $0xd60] sm:$0xff] }
 0x431   : > { %6629 = vmatprep.subr.bf16.mxu0 %v9047_v42  ;;  %6775 = vmatprep.subr.bf16.mxu1 %v8977_v43  ;;  %v9016_v42 = vcombine.low %v3718_v31, %v3722_v36  ;;  %v9095_v43 = vcombine.high %v3797_v6, %v3801_v9  ;;  %v3766_v31 = vld [vmem:[#allocation10 + $0xb08] sm:$0xff] }
 0x432   : > { %v3770_v36 = vld [vmem:[#allocation10 + $0xb28] sm:$0xff] }
 0x433   : > { %6630 = vmatpush1.bf16.msra.mxu0 %v9046_v53  ;;  %v9094_v53 = vcombine.low %v3797_v6, %v3801_v9  ;;  %v3849_v6 = vld [vmem:[#allocation10 + $0xda0] sm:$0xff]  ;;  %v3774_v9 = vld [vmem:[#allocation10 + $0xb48] sm:$0xff] }
 0x434   : > { %6776 = vmatpush1.bf16.msra.mxu1 %v8976_v55  ;;  %6631 = vmatprep.subr.bf16.mxu0 %v9055_v57  ;;  %v10865_v55 = vpack.c.bf16 %v3401_v52, %v3401_v52  ;;  %v9024_v57 = vcombine.low %v3726_v18, %v3730_v35  ;;  %v3778_v18 = vld [vmem:[#allocation10 + $0xb68] sm:$0xff]  ;;  %v9134_v35 = vcombine.low %v3837_v29, %v3841_v30 }
 0x435   : > { %6777 = vmatprep.subr.bf16.mxu1 %v8985_v58  ;;  %v9103_v58 = vcombine.high %v3805_v47, %v3809_v45 }
 0x437   : > { %6632 = vmatpush1.bf16.msra.mxu0 %v9054_v61  ;;  %v3746_v61 = vld [vmem:[#allocation10 + $0xa68] sm:$0xff] }
 0x438   : > { %6778 = vmatpush1.bf16.msra.mxu1 %v8984_v62  ;;  %6633 = vmatprep.subr.bf16.mxu0 %v9063_v63  ;;  %v9102_v62 = vcombine.low %v3805_v47, %v3809_v45  ;;  %v9032_v63 = vcombine.low %v3734_v49, %v3738_v50  ;;  %v9041_v1 = vcombine.high %v3742_v56, %v3746_v61  ;;  %v3782_v47 = vld [vmem:[#allocation10 + $0xb88] sm:$0xff] }
 0x439   : > { %6779 = vmatprep.subr.bf16.mxu1 %v8993_v0  ;;  %v9111_v0 = vcombine.high %v3813_v60, %v3817_v15  ;;  %v3786_v45 = vld [vmem:[#allocation10 + $0xba8] sm:$0xff]  ;;  %v9072_v50 = vcombine.low %v3774_v9, %v3778_v18 }
 0x43b   : > { %6634 = vmatpush1.bf16.msra.mxu0 %v9062_v14  ;;  %v3754_v14 = vld [vmem:[#allocation10 + $0xaa8] sm:$0xff] }
 0x43c   : > { %6780 = vmatpush1.bf16.msra.mxu1 %v8992_v17  ;;  %6635 = vmatprep.subr.bf16.mxu0 %v9071_v19  ;;  %v9110_v17 = vcombine.low %v3813_v60, %v3817_v15  ;;  %v9040_v19 = vcombine.low %v3742_v56, %v3746_v61  ;;  %v9049_v22 = vcombine.high %v3750_v12, %v3754_v14  ;;  %v3790_v60 = vld [vmem:[#allocation10 + $0xbc8] sm:$0xff] }
 0x43d   : > { %6781 = vmatprep.subr.bf16.mxu1 %v9001_v20  ;;  %v9119_v20 = vcombine.high %v3821_v2, %v3825_v5  ;;  %v3794_v15 = vld [vmem:[#allocation10 + $0xbe8] sm:$0xff]  ;;  %v9080_v61 = vcombine.low %v3782_v47, %v3786_v45 }
 0x43e   : > { %v3798_v2 = vld [vmem:[#allocation10 + $0xc08] sm:$0xff] }
 0x43f   : > { %6636 = vmatpush1.bf16.msra.mxu0 %v9070_v4  ;;  %v3762_v4 = vld [vmem:[#allocation10 + $0xae8] sm:$0xff] }
 0x440   : > { %6782 = vmatpush1.bf16.msra.mxu1 %v9000_v26  ;;  %6637 = vmatprep.subr.bf16.mxu0 %v9079_v27  ;;  %v9048_v26 = vcombine.low %v3750_v12, %v3754_v14  ;;  %v9127_v27 = vcombine.high %v3829_v23, %v3833_v24  ;;  %v9056_v40 = vcombine.low %v3758_v8, %v3762_v4  ;;  %v3802_v5 = vld [vmem:[#allocation10 + $0xc28] sm:$0xff] }
 0x441   : > { %6783 = vmatprep.subr.bf16.mxu1 %v9009_v28  ;;  %v9057_v28 = vcombine.high %v3758_v8, %v3762_v4  ;;  %v9088_v14 = vcombine.low %v3790_v60, %v3794_v15  ;;  %v9096_v4 = vcombine.low %v3798_v2, %v3802_v5 }
 0x443   : > { %6638 = vmatpush1.bf16.msra.mxu0 %v9078_v37  ;;  %v9126_v37 = vcombine.low %v3829_v23, %v3833_v24  ;;  %v3806_v23 = vld [vmem:[#allocation10 + $0xc48] sm:$0xff] }
 0x444   : > { %6784 = vmatpush1.bf16.msra.mxu1 %v9008_v33  ;;  %6639 = vmatprep.subr.bf16.mxu0 %v9087_v34  ;;  %v9135_v33 = vcombine.high %v3837_v29, %v3841_v30  ;;  %v9065_v34 = vcombine.high %v3766_v31, %v3770_v36  ;;  %v3810_v24 = vld [vmem:[#allocation10 + $0xc68] sm:$0xff] }
 0x445   : > { %6785 = vmatprep.subr.bf16.mxu1 %v9017_v41  ;;  %v3845_v41 = vld [vmem:[#allocation10 + $0xd80] sm:$0xff]  ;;  %v3814_v29 = vld [vmem:[#allocation10 + $0xc88] sm:$0xff] }
 0x446   : > { %v9143_v52 = vcombine.high %v3845_v41, %v3849_v6  ;;  %v9142_v49 = vcombine.low %v3845_v41, %v3849_v6  ;;  %v3818_v30 = vld [vmem:[#allocation10 + $0xca8] sm:$0xff] }
 0x447   : > { %6640 = vmatpush1.bf16.msra.mxu0 %v9086_v39  ;;  %v9064_v39 = vcombine.low %v3766_v31, %v3770_v36  ;;  %v9104_v36 = vcombine.low %v3806_v23, %v3810_v24  ;;  %v3822_v41 = vld [vmem:[#allocation10 + $0xcc8] sm:$0xff] }
 0x448   : > { %6786 = vmatpush1.bf16.msra.mxu1 %v9016_v42  ;;  %6650 = vmatprep.subr.bf16.mxu0 %v9095_v43  ;;  %v9073_v42 = vcombine.high %v3774_v9, %v3778_v18  ;;  %v3853_v43 = vld [vmem:[#allocation10 + $0xdc0] sm:$0xff]  ;;  %v3826_v6 = vld [vmem:[#allocation10 + $0xce8] sm:$0xff]  ;;  %v9112_v18 = vcombine.low %v3814_v29, %v3818_v30 }
 0x449   : > { %6787 = vmatprep.subr.bf16.mxu1 %v9025_v44  ;;  %v3857_v44 = vld [vmem:[#allocation10 + $0xde0] sm:$0xff] }
 0x44a   : > { %6642 = vmatmul.mubr.bf16.vlgmr.msra.gmra.mrb[4].mxu0 %v10865_v55  ;;  %v9150_v56 = vcombine.low %v3853_v43, %v3857_v44 }
 0x44b   : > { %6651 = vmatpush1.bf16.msra.mxu0 %v9094_v53  ;;  %v9151_v53 = vcombine.high %v3853_v43, %v3857_v44  ;;  %v3830_v43 = vld [vmem:[#allocation10 + $0xd08] sm:$0xff] }
 0x44c   : > { %6788 = vmatpush1.bf16.msra.mxu1 %v9024_v57  ;;  %6652 = vmatprep.subr.bf16.mxu0 %v9103_v58  ;;  %v9081_v57 = vcombine.high %v3782_v47, %v3786_v45  ;;  %v3861_v58 = vld [vmem:[#allocation10 + $0xe00] sm:$0xff]  ;;  %v3834_v44 = vld [vmem:[#allocation10 + $0xd28] sm:$0xff]  ;;  %v9120_v45 = vcombine.low %v3822_v41, %v3826_v6 }
 0x44d   : > { %6789 = vmatprep.subr.bf16.mxu1 %v9033_v59  ;;  %v3865_v59 = vld [vmem:[#allocation10 + $0xe20] sm:$0xff] }
 0x44e   : > { %v9158_v12 = vcombine.low %v3861_v58, %v3865_v59 }
 0x44f   : > { %6653 = vmatpush1.bf16.msra.mxu0 %v9102_v62  ;;  %v9159_v62 = vcombine.high %v3861_v58, %v3865_v59  ;;  %v1775_v58 = vsub.s32 6, %v10751_v46  ;;  %v3838_v59 = vld [vmem:[#allocation10 + $0xd48] sm:$0xff] }
 0x450   : > { %6790 = vmatpush1.bf16.msra.mxu1 %v9032_v63  ;;  %6654 = vmatprep.subr.bf16.mxu0 %v9111_v0  ;;  %v9089_v63 = vcombine.high %v3790_v60, %v3794_v15  ;;  %v3869_v0 = vld [vmem:[#allocation10 + $0xe40] sm:$0xff]  ;;  %v3842_v60 = vld [vmem:[#allocation10 + $0xd68] sm:$0xff] }
 0x451   : > { %6791 = vmatprep.subr.bf16.mxu1 %v9041_v1  ;;  %v3873_v1 = vld [vmem:[#allocation10 + $0xe60] sm:$0xff] }
 0x452   : > { %v9166_v8 = vcombine.low %v3869_v0, %v3873_v1 }
 0x453   : > { %6655 = vmatpush1.bf16.msra.mxu0 %v9110_v17  ;;  %v9167_v17 = vcombine.high %v3869_v0, %v3873_v1  ;;  %v3917_v0 = vld [vmem:[#allocation10 + $0xfc0] sm:$0xff] }
 0x454   : > { %6792 = vmatpush1.bf16.msra.mxu1 %v9040_v19  ;;  %6656 = vmatprep.subr.bf16.mxu0 %v9119_v20  ;;  %v9097_v19 = vcombine.high %v3798_v2, %v3802_v5  ;;  %v3877_v20 = vld [vmem:[#allocation10 + $0xe80] sm:$0xff]  ;;  %v9961_v2 = vld [vmem:[#allocation8] sm:$0xff] }
 0x455   : > { %6793 = vmatprep.subr.bf16.mxu1 %v9049_v22  ;;  %v3881_v22 = vld [vmem:[#allocation10 + $0xea0] sm:$0xff]  ;;  %v1776_v5 = vrot.slane %v9961_v2, %v1775_v58 }
 0x456   : > { %v9174_v31 = vcombine.low %v3877_v20, %v3881_v22  ;;  %v3921_v1 = vld [vmem:[#allocation10 + $0xfe0] sm:$0xff] }
 0x457   : > { %6657 = vmatpush1.bf16.msra.mxu0 %v9118_v25  ;;  %v9175_v25 = vcombine.high %v3877_v20, %v3881_v22  ;;  %v9136_v20 = vcombine.low %v3838_v59, %v3842_v60  ;;  %v9215_v22 = vcombine.high %v3917_v0, %v3921_v1 }
 0x458   : > { %6794 = vmatpush1.bf16.msra.mxu1 %v9048_v26  ;;  %6658 = vmatprep.subr.bf16.mxu0 %v9127_v27  ;;  %v9105_v26 = vcombine.high %v3806_v23, %v3810_v24  ;;  %v3885_v27 = vld [vmem:[#allocation10 + $0xec0] sm:$0xff] }
 0x459   : > { %6795 = vmatprep.subr.bf16.mxu1 %v9057_v28  ;;  %v3889_v28 = vld [vmem:[#allocation10 + $0xee0] sm:$0xff] }
 0x45a   : > { %v9182_v9 = vcombine.low %v3885_v27, %v3889_v28 }
 0x45b   : > { %6659 = vmatpush1.bf16.msra.mxu0 %v9126_v37  ;;  %v9183_v37 = vcombine.high %v3885_v27, %v3889_v28 }
 0x45c   : > { %6796 = vmatpush1.bf16.msra.mxu1 %v9056_v40  ;;  %6660 = vmatprep.subr.bf16.mxu0 %v9135_v33  ;;  %v9113_v40 = vcombine.high %v3814_v29, %v3818_v30  ;;  %v3893_v33 = vld [vmem:[#allocation10 + $0xf00] sm:$0xff]  ;;  %v9214_v29 = vcombine.low %v3917_v0, %v3921_v1  ;;  %v3854_v30 = vld [vmem:[#allocation10 + $0xdc8] sm:$0xff] }
 0x45d   : > { %6797 = vmatprep.subr.bf16.mxu1 %v9065_v34  ;;  %v3897_v34 = vld [vmem:[#allocation10 + $0xf20] sm:$0xff]  ;;  %v3882_v0 = vld [vmem:[#allocation10 + $0xea8] sm:$0xff] }
 0x45e   : > { %v9190_v47 = vcombine.low %v3893_v33, %v3897_v34 }
 0x45f   : > { %6661 = vmatpush1.bf16.msra.mxu0 %v9134_v35  ;;  %v9191_v35 = vcombine.high %v3893_v33, %v3897_v34 }
 0x460   : > { %6798 = vmatpush1.bf16.msra.mxu1 %v9064_v39  ;;  %6662 = vmatprep.subr.bf16.mxu0 %v9143_v52  ;;  %v9121_v39 = vcombine.high %v3822_v41, %v3826_v6  ;;  %v3901_v52 = vld [vmem:[#allocation10 + $0xf40] sm:$0xff]  ;;  %v3423_v41 = vld [vmem:[#allocation10 + $0x50] sm:$0xff] }
 0x461   : > { %6799 = vmatprep.subr.bf16.mxu1 %v9073_v42  ;;  %v3905_v42 = vld [vmem:[#allocation10 + $0xf60] sm:$0xff]  ;;  %v3427_v6 = vld [vmem:[#allocation10 + $0x70] sm:$0xff] }
 0x462   : > { %v9198_v15 = vcombine.low %v3901_v52, %v3905_v42 }
 0x463   : > { %6663 = vmatpush1.bf16.msra.mxu0 %v9142_v49  ;;  %v9199_v49 = vcombine.high %v3901_v52, %v3905_v42 }
 0x464   : > { %6800 = vmatpush1.bf16.msra.mxu1 %v9072_v50  ;;  %6664 = vmatprep.subr.bf16.mxu0 %v9151_v53  ;;  %v9129_v50 = vcombine.high %v3830_v43, %v3834_v44  ;;  %v3909_v53 = vld [vmem:[#allocation10 + $0xf80] sm:$0xff] }
 0x465   : > { %6801 = vmatprep.subr.bf16.mxu1 %v9081_v57  ;;  %v3913_v57 = vld [vmem:[#allocation10 + $0xfa0] sm:$0xff] }
 0x467   : > { %6665 = vmatpush1.bf16.msra.mxu0 %v9150_v56  ;;  %v1779_v56 = vsub.s32 7, %v10751_v46 }
 0x468   : > { %6802 = vmatpush1.bf16.msra.mxu1 %v9080_v61  ;;  %6666 = vmatprep.subr.bf16.mxu0 %v9159_v62  ;;  %v9128_v61 = vcombine.low %v3830_v43, %v3834_v44  ;;  %v9207_v62 = vcombine.high %v3909_v53, %v3913_v57  ;;  %v8723_v44 = vcombine.high %v3423_v41, %v3427_v6 }
 0x469   : > { %6803 = vmatprep.subr.bf16.mxu1 %v9089_v63  ;;  %v9137_v63 = vcombine.high %v3838_v59, %v3842_v60 }
 0x46b   : > { %6667 = vmatpush1.bf16.msra.mxu0 %v9158_v12  ;;  %v3846_v12 = vld [vmem:[#allocation10 + $0xd88] sm:$0xff] }
 0x46c   : > { %6804 = vmatpush1.bf16.msra.mxu1 %v9088_v14  ;;  %6668 = vmatprep.subr.bf16.mxu0 %v9167_v17  ;;  %v3850_v14 = vld [vmem:[#allocation10 + $0xda8] sm:$0xff]  ;;  %v9206_v17 = vcombine.low %v3909_v53, %v3913_v57  ;;  %v8722_v57 = vcombine.low %v3423_v41, %v3427_v6 }
 0x46d   : > { %6814 = vmatprep.subr.bf16.mxu1 %v9097_v19  ;;  %v1780_v19 = vrot.slane %v9961_v2, %v1779_v56  ;;  %v9145_v24 = vcombine.high %v3846_v12, %v3850_v14  ;;  %v3874_v53 = vld [vmem:[#allocation10 + $0xe68] sm:$0xff] }
 0x46f   : > { %6669 = vmatpush1.bf16.msra.mxu0 %v9166_v8  ;;  %6806 = vmatmul.mubr.bf16.vlgmr.msra.gmra.mrb[12].mxu1 %v10865_v55  ;;  %v3415_v8 = vld [vmem:[#allocation10 + $0x10] sm:$0xff] }
 0x470   : > { %6815 = vmatpush1.bf16.msra.mxu1 %v9096_v4  ;;  %6670 = vmatprep.subr.bf16.mxu0 %v9175_v25  ;;  %v3419_v4 = vld [vmem:[#allocation10 + $0x30] sm:$0xff] }
 0x471   : > { %6816 = vmatprep.subr.bf16.mxu1 %v9105_v26  ;;  %v8715_v33 = vcombine.high %v3415_v8, %v3419_v4  ;;  %v8714_v52 = vcombine.low %v3415_v8, %v3419_v4  ;;  %v3455_v4 = vld [vmem:[#allocation10 + $0x150] sm:$0xff] }
 0x473   : > { %6671 = vmatpush1.bf16.msra.mxu0 %v9174_v31  ;;  %v3858_v31 = vld [vmem:[#allocation10 + $0xde8] sm:$0xff] }
 0x474   : > { %6817 = vmatpush1.bf16.msra.mxu1 %v9104_v36  ;;  %6672 = vmatprep.subr.bf16.mxu0 %v9183_v37  ;;  %v9152_v43 = vcombine.low %v3854_v30, %v3858_v31 }
 0x475   : > { %6818 = vmatprep.subr.bf16.mxu1 %v9113_v40  ;;  %v9144_v40 = vcombine.low %v3846_v12, %v3850_v14  ;;  %v3447_v14 = vld [vmem:[#allocation10 + $0x110] sm:$0xff] }
 0x477   : > { %6673 = vmatpush1.bf16.msra.mxu0 %v9182_v9  ;;  %v9153_v9 = vcombine.high %v3854_v30, %v3858_v31 }
 0x478   : > { %6819 = vmatpush1.bf16.msra.mxu1 %v9112_v18  ;;  %6674 = vmatprep.subr.bf16.mxu0 %v9191_v35  ;;  %v3862_v18 = vld [vmem:[#allocation10 + $0xe08] sm:$0xff] }
 0x479   : > { %6820 = vmatprep.subr.bf16.mxu1 %v9121_v39  ;;  %v3866_v35 = vld [vmem:[#allocation10 + $0xe28] sm:$0xff] }
 0x47a   : > { %v9160_v59 = vcombine.low %v3862_v18, %v3866_v35 }
 0x47b   : > { %6675 = vmatpush1.bf16.msra.mxu0 %v9190_v47  ;;  %v9161_v47 = vcombine.high %v3862_v18, %v3866_v35  ;;  %v3471_v18 = vld [vmem:[#allocation10 + $0x1d0] sm:$0xff] }
 0x47c   : > { %6821 = vmatpush1.bf16.msra.mxu1 %v9120_v45  ;;  %6676 = vmatprep.subr.bf16.mxu0 %v9199_v49  ;;  %v3431_v45 = vld [vmem:[#allocation10 + $0x90] sm:$0xff] }
 0x47d   : > { %6822 = vmatprep.subr.bf16.mxu1 %v9129_v50  ;;  %v3435_v49 = vld [vmem:[#allocation10 + $0xb0] sm:$0xff]  ;;  %v3870_v50 = vld [vmem:[#allocation10 + $0xe48] sm:$0xff] }
 0x47e   : > { %v8731_v60 = vcombine.high %v3431_v45, %v3435_v49  ;;  %v8730_v1 = vcombine.low %v3431_v45, %v3435_v49  ;;  %v9168_v2 = vcombine.low %v3870_v50, %v3874_v53  ;;  %v3475_v35 = vld [vmem:[#allocation10 + $0x1f0] sm:$0xff] }
 0x47f   : > { %6677 = vmatpush1.bf16.msra.mxu0 %v9198_v15  ;;  %v9169_v15 = vcombine.high %v3870_v50, %v3874_v53  ;;  %v8771_v45 = vcombine.high %v3471_v18, %v3475_v35  ;;  %v3479_v50 = vld [vmem:[#allocation10 + $0x210] sm:$0xff] }
 0x480   : > { %6823 = vmatpush1.bf16.msra.mxu1 %v9128_v61  ;;  %6678 = vmatprep.subr.bf16.mxu0 %v9207_v62  ;;  %v3439_v61 = vld [vmem:[#allocation10 + $0xd0] sm:$0xff] }
 0x481   : > { %v3390_v23 = vpop.f32.mrb[8].mxu1  ;;  %6824 = vmatprep.subr.bf16.mxu1 %v9137_v63  ;;  %v3443_v62 = vld [vmem:[#allocation10 + $0xf0] sm:$0xff]  ;;  %v3878_v63 = vld [vmem:[#allocation10 + $0xe88] sm:$0xff] }
 0x482   : > { %v9360_v25 = vadd.f32 %v3390_v23, %v1776_v5  ;;  %v3392_v26 = vpop.f32.mrb[9].mxu1  ;;  %v8739_v5 = vcombine.high %v3439_v61, %v3443_v62  ;;  %v9177_v12 = vcombine.high %v3878_v63, %v3882_v0  ;;  %v9176_v23 = vcombine.low %v3878_v63, %v3882_v0  ;;  %v3483_v53 = vld [vmem:[#allocation10 + $0x230] sm:$0xff] }
 0x483   : > { %v9361_v27 = vadd.f32 %v3392_v26, %v1780_v19  ;;  %6679 = vmatpush1.bf16.msra.mxu0 %v9206_v17  ;;  %v3394_v28 = vpop.f32.mrb[10].mxu1  ;;  %v3451_v17 = vld [vmem:[#allocation10 + $0x130] sm:$0xff]  ;;  %v3886_v19 = vld [vmem:[#allocation10 + $0xec8] sm:$0xff] }
 0x484   : > { %v3403_v36 = vmax.f32 %v9360_v25, 0.0  ;;  %6825 = vmatpush1.bf16.msra.mxu1 %v9136_v20  ;;  %v3395_v37 = vpop.f32.mrb[11].mxu1  ;;  %6680 = vmatprep.subr.bf16.mxu0 %v9215_v22  ;;  %v3890_v20 = vld [vmem:[#allocation10 + $0xee8] sm:$0xff]  ;;  %v8738_v22 = vcombine.low %v3439_v61, %v3443_v62  ;;  %v3459_v25 = vld [vmem:[#allocation10 + $0x170] sm:$0xff]  ;;  %v8746_v28 = vcombine.low %v3447_v14, %v3451_v17  ;;  %v8779_v61 = vcombine.high %v3479_v50, %v3483_v53 }
 0x485   : > { %v3404_v34 = vmax.f32 %v9361_v27, 0.0  ;;  %6826 = vmatprep.subr.bf16.mxu1 %v9145_v24  ;;  %v8747_v24 = vcombine.high %v3447_v14, %v3451_v17  ;;  %v9185_v8 = vcombine.high %v3886_v19, %v3890_v20  ;;  %v3894_v26 = vld [vmem:[#allocation10 + $0xf08] sm:$0xff]  ;;  %v8755_v30 = vcombine.high %v3455_v4, %v3459_v25  ;;  %v3467_v37 = vld [vmem:[#allocation10 + $0x1b0] sm:$0xff] }
 0x486   : > { %v10877_v42 = vpack.c.bf16 %v3403_v36, %v3403_v36  ;;  %v3898_v27 = vld [vmem:[#allocation10 + $0xf28] sm:$0xff]  ;;  %v3463_v36 = vld [vmem:[#allocation10 + $0x190] sm:$0xff] }
 0x487   : > { %v10875_v39 = vpack.c.bf16 %v3404_v34, %v3404_v34  ;;  %6681 = vmatpush1.bf16.msra.mxu0 %v9214_v29  ;;  %v9184_v29 = vcombine.low %v3886_v19, %v3890_v20  ;;  %v9193_v31 = vcombine.high %v3894_v26, %v3898_v27  ;;  %v8754_v34 = vcombine.low %v3455_v4, %v3459_v25  ;;  %v3487_v63 = vld [vmem:[#allocation10 + $0x250] sm:$0xff] }
 0x488   : > { %6827 = vmatpush1.bf16.msra.mxu1 %v9144_v40  ;;  %6855 = vmatprep.subr.bf16.mxu0 %v8715_v33  ;;  %v3902_v40 = vld [vmem:[#allocation10 + $0xf48] sm:$0xff]  ;;  %v9192_v41 = vcombine.low %v3894_v26, %v3898_v27  ;;  %v8763_v6 = vcombine.high %v3463_v36, %v3467_v37  ;;  %v3491_v0 = vld [vmem:[#allocation10 + $0x270] sm:$0xff] }
 0x489   : > { %6682 = vmatprep.mubr.bf16.mxu0 %v10875_v39  ;;  %6846 = vmatprep.mubr.bf16.mxu1 %v10875_v39  ;;  %v3906_v33 = vld [vmem:[#allocation10 + $0xf68] sm:$0xff]  ;;  %v8787_v14 = vcombine.high %v3487_v63, %v3491_v0  ;;  %v3495_v19 = vld [vmem:[#allocation10 + $0x290] sm:$0xff] }
 0x48a   : > { %6683 = vmatmul.mubr.bf16.vlgmr.msra.gmra.mrb[4].mxu0 %v10877_v42  ;;  %6828 = vmatprep.subr.bf16.mxu1 %v9153_v9  ;;  %v9201_v9 = vcombine.high %v3902_v40, %v3906_v33  ;;  %v3499_v20 = vld [vmem:[#allocation10 + $0x2b0] sm:$0xff] }
 0x48b   : > { %6856 = vmatpush1.bf16.msra.mxu0 %v8714_v52  ;;  %6887 = vmatprep.mubr.bf16.mxu0 %v10816_v11  ;;  %v3910_v52 = vld [vmem:[#allocation10 + $0xf88] sm:$0xff]  ;;  %v8795_v4 = vcombine.high %v3495_v19, %v3499_v20  ;;  %v3503_v26 = vld [vmem:[#allocation10 + $0x2d0] sm:$0xff] }
 0x48c   : > { %6829 = vmatpush1.bf16.msra.mxu1 %v9152_v43  ;;  %6857 = vmatprep.subr.bf16.mxu0 %v8723_v44  ;;  %v3914_v43 = vld [vmem:[#allocation10 + $0xfa8] sm:$0xff]  ;;  %v8762_v44 = vcombine.low %v3463_v36, %v3467_v37  ;;  %v3507_v27 = vld [vmem:[#allocation10 + $0x2f0] sm:$0xff] }
 0x48d   : > { %6830 = vmatprep.subr.bf16.mxu1 %v9161_v47  ;;  %v9200_v47 = vcombine.low %v3902_v40, %v3906_v33  ;;  %v9209_v49 = vcombine.high %v3910_v52, %v3914_v43  ;;  %v8803_v36 = vcombine.high %v3503_v26, %v3507_v27  ;;  %v3511_v40 = vld [vmem:[#allocation10 + $0x310] sm:$0xff] }
 0x48e   : > { %v3515_v33 = vld [vmem:[#allocation10 + $0x330] sm:$0xff] }
 0x48f   : > { %6858 = vmatpush1.bf16.msra.mxu0 %v8722_v57  ;;  %v3918_v57 = vld [vmem:[#allocation10 + $0xfc8] sm:$0xff] }
 0x490   : > { %6831 = vmatpush1.bf16.msra.mxu1 %v9160_v59  ;;  %6859 = vmatprep.subr.bf16.mxu0 %v8731_v60  ;;  %v3922_v59 = vld [vmem:[#allocation10 + $0xfe8] sm:$0xff]  ;;  %v8770_v60 = vcombine.low %v3471_v18, %v3475_v35  ;;  %v8811_v18 = vcombine.high %v3511_v40, %v3515_v33 }
 0x491   : > { %6832 = vmatprep.subr.bf16.mxu1 %v9169_v15  ;;  %v9208_v15 = vcombine.low %v3910_v52, %v3914_v43  ;;  %v9217_v62 = vcombine.high %v3918_v57, %v3922_v59  ;;  %v3519_v52 = vld [vmem:[#allocation10 + $0x350] sm:$0xff] }
 0x492   : > { %v3523_v43 = vld [vmem:[#allocation10 + $0x370] sm:$0xff] }
 0x493   : > { %6860 = vmatpush1.bf16.msra.mxu0 %v8730_v1  ;;  %v3416_v1 = vld [vmem:[#allocation10 + $0x18] sm:$0xff] }
 0x494   : > { %6833 = vmatpush1.bf16.msra.mxu1 %v9168_v2  ;;  %6861 = vmatprep.subr.bf16.mxu0 %v8739_v5  ;;  %v3420_v2 = vld [vmem:[#allocation10 + $0x38] sm:$0xff]  ;;  %v8778_v5 = vcombine.low %v3479_v50, %v3483_v53  ;;  %v3527_v53 = vld [vmem:[#allocation10 + $0x390] sm:$0xff] }
 0x495   : > { %6834 = vmatprep.subr.bf16.mxu1 %v9177_v12  ;;  %v9216_v12 = vcombine.low %v3918_v57, %v3922_v59  ;;  %v8717_v17 = vcombine.high %v3416_v1, %v3420_v2  ;;  %v3531_v57 = vld [vmem:[#allocation10 + $0x3b0] sm:$0xff]  ;;  %v3456_v59 = vld [vmem:[#allocation10 + $0x158] sm:$0xff] }
 0x497   : > { %6862 = vmatpush1.bf16.msra.mxu0 %v8738_v22  ;;  %v3424_v22 = vld [vmem:[#allocation10 + $0x58] sm:$0xff] }
 0x498   : > { %6835 = vmatpush1.bf16.msra.mxu1 %v9176_v23  ;;  %6863 = vmatprep.subr.bf16.mxu0 %v8747_v24  ;;  %v3428_v23 = vld [vmem:[#allocation10 + $0x78] sm:$0xff]  ;;  %v8786_v24 = vcombine.low %v3487_v63, %v3491_v0  ;;  %v3535_v0 = vld [vmem:[#allocation10 + $0x3d0] sm:$0xff] }
 0x499   : > { %6836 = vmatprep.subr.bf16.mxu1 %v9185_v8  ;;  %v8716_v8 = vcombine.low %v3416_v1, %v3420_v2  ;;  %v8725_v25 = vcombine.high %v3424_v22, %v3428_v23  ;;  %v3539_v1 = vld [vmem:[#allocation10 + $0x3f0] sm:$0xff]  ;;  %v3464_v2 = vld [vmem:[#allocation10 + $0x198] sm:$0xff] }
 0x49b   : > { %6864 = vmatpush1.bf16.msra.mxu0 %v8746_v28  ;;  %v3432_v28 = vld [vmem:[#allocation10 + $0x98] sm:$0xff] }
 0x49c   : > { %6837 = vmatpush1.bf16.msra.mxu1 %v9184_v29  ;;  %6865 = vmatprep.subr.bf16.mxu0 %v8755_v30  ;;  %v3436_v29 = vld [vmem:[#allocation10 + $0xb8] sm:$0xff]  ;;  %v8794_v30 = vcombine.low %v3495_v19, %v3499_v20  ;;  %v3543_v20 = vld [vmem:[#allocation10 + $0x410] sm:$0xff] }
 0x49d   : > { %6838 = vmatprep.subr.bf16.mxu1 %v9193_v31  ;;  %v8724_v31 = vcombine.low %v3424_v22, %v3428_v23  ;;  %v8733_v37 = vcombine.high %v3432_v28, %v3436_v29  ;;  %v3547_v22 = vld [vmem:[#allocation10 + $0x430] sm:$0xff]  ;;  %v3472_v23 = vld [vmem:[#allocation10 + $0x1d8] sm:$0xff] }
 0x49f   : > { %6866 = vmatpush1.bf16.msra.mxu0 %v8754_v34  ;;  %v3440_v34 = vld [vmem:[#allocation10 + $0xd8] sm:$0xff] }
 0x4a0   : > { %6839 = vmatpush1.bf16.msra.mxu1 %v9192_v41  ;;  %6867 = vmatprep.subr.bf16.mxu0 %v8763_v6  ;;  %v3444_v41 = vld [vmem:[#allocation10 + $0xf8] sm:$0xff]  ;;  %v8802_v6 = vcombine.low %v3503_v26, %v3507_v27  ;;  %v3551_v27 = vld [vmem:[#allocation10 + $0x450] sm:$0xff] }
 0x4a1   : > { %6840 = vmatprep.subr.bf16.mxu1 %v9201_v9  ;;  %v8732_v9 = vcombine.low %v3432_v28, %v3436_v29  ;;  %v8741_v35 = vcombine.high %v3440_v34, %v3444_v41  ;;  %v3555_v28 = vld [vmem:[#allocation10 + $0x470] sm:$0xff]  ;;  %v3480_v29 = vld [vmem:[#allocation10 + $0x218] sm:$0xff] }
 0x4a3   : > { %6868 = vmatpush1.bf16.msra.mxu0 %v8762_v44  ;;  %v3452_v44 = vld [vmem:[#allocation10 + $0x138] sm:$0xff] }
 0x4a4   : > { %6841 = vmatpush1.bf16.msra.mxu1 %v9200_v47  ;;  %6869 = vmatprep.subr.bf16.mxu0 %v8771_v45  ;;  %v8810_v47 = vcombine.low %v3511_v40, %v3515_v33  ;;  %v8740_v45 = vcombine.low %v3440_v34, %v3444_v41  ;;  %v3559_v33 = vld [vmem:[#allocation10 + $0x490] sm:$0xff]  ;;  %v3488_v41 = vld [vmem:[#allocation10 + $0x258] sm:$0xff] }
 0x4a5   : > { %6842 = vmatprep.subr.bf16.mxu1 %v9209_v49  ;;  %v8819_v49 = vcombine.high %v3519_v52, %v3523_v43  ;;  %v3563_v34 = vld [vmem:[#allocation10 + $0x4b0] sm:$0xff] }
 0x4a7   : > { %6870 = vmatpush1.bf16.msra.mxu0 %v8770_v60  ;;  %v3460_v60 = vld [vmem:[#allocation10 + $0x178] sm:$0xff] }
 0x4a8   : > { %6843 = vmatpush1.bf16.msra.mxu1 %v9208_v15  ;;  %6871 = vmatprep.subr.bf16.mxu0 %v8779_v61  ;;  %v8818_v15 = vcombine.low %v3519_v52, %v3523_v43  ;;  %v8757_v63 = vcombine.high %v3456_v59, %v3460_v60  ;;  %v3567_v43 = vld [vmem:[#allocation10 + $0x4d0] sm:$0xff] }
 0x4a9   : > { %6844 = vmatprep.subr.bf16.mxu1 %v9217_v62  ;;  %v8827_v62 = vcombine.high %v3527_v53, %v3531_v57 }
 0x4ab   : > { %6872 = vmatpush1.bf16.msra.mxu0 %v8778_v5  ;;  %v3468_v5 = vld [vmem:[#allocation10 + $0x1b8] sm:$0xff] }
 0x4ac   : > { %6845 = vmatpush1.bf16.msra.mxu1 %v9216_v12  ;;  %6873 = vmatprep.subr.bf16.mxu0 %v8787_v14  ;;  %v8826_v12 = vcombine.low %v3527_v53, %v3531_v57  ;;  %v8756_v14 = vcombine.low %v3456_v59, %v3460_v60  ;;  %v8765_v19 = vcombine.high %v3464_v2, %v3468_v5  ;;  %v3575_v57 = vld [vmem:[#allocation10 + $0x510] sm:$0xff]  ;;  %v3504_v60 = vld [vmem:[#allocation10 + $0x2d8] sm:$0xff] }
 0x4ad   : > { %7019 = vmatprep.subr.bf16.mxu1 %v8717_v17  ;;  %v8835_v17 = vcombine.high %v3535_v0, %v3539_v1  ;;  %v3579_v59 = vld [vmem:[#allocation10 + $0x530] sm:$0xff] }
 0x4af   : > { %6847 = vmatmul.mubr.bf16.vlgmr.msra.gmra.mrb[12].mxu1 %v10877_v42  ;;  %6874 = vmatpush1.bf16.msra.mxu0 %v8786_v24  ;;  %v3476_v24 = vld [vmem:[#allocation10 + $0x1f8] sm:$0xff] }
 0x4b0   : > { %7020 = vmatpush1.bf16.msra.mxu1 %v8716_v8  ;;  %7051 = vmatprep.mubr.bf16.mxu1 %v10816_v11  ;;  %v3448_v11 = vld [vmem:[#allocation10 + $0x118] sm:$0xff]  ;;  %v8834_v8 = vcombine.low %v3535_v0, %v3539_v1  ;;  %v8773_v26 = vcombine.high %v3472_v23, %v3476_v24  ;;  %v3583_v1 = vld [vmem:[#allocation10 + $0x550] sm:$0xff] }
 0x4b1   : > { %6875 = vmatprep.subr.bf16.mxu0 %v8795_v4  ;;  %7021 = vmatprep.subr.bf16.mxu1 %v8725_v25  ;;  %v8749_v50 = vcombine.high %v3448_v11, %v3452_v44  ;;  %v8748_v61 = vcombine.low %v3448_v11, %v3452_v44  ;;  %v8764_v4 = vcombine.low %v3464_v2, %v3468_v5  ;;  %v3571_v11 = vld [vmem:[#allocation10 + $0x4f0] sm:$0xff]  ;;  %v3496_v44 = vld [vmem:[#allocation10 + $0x298] sm:$0xff] }
 0x4b2   : > { %v8843_v25 = vcombine.high %v3543_v20, %v3547_v22  ;;  %v3587_v2 = vld [vmem:[#allocation10 + $0x570] sm:$0xff]  ;;  %v3512_v5 = vld [vmem:[#allocation10 + $0x318] sm:$0xff] }
 0x4b3   : > { %6876 = vmatpush1.bf16.msra.mxu0 %v8794_v30  ;;  %v3484_v30 = vld [vmem:[#allocation10 + $0x238] sm:$0xff] }
 0x4b4   : > { %7022 = vmatpush1.bf16.msra.mxu1 %v8724_v31  ;;  %6877 = vmatprep.subr.bf16.mxu0 %v8803_v36  ;;  %v8842_v31 = vcombine.low %v3543_v20, %v3547_v22  ;;  %v8772_v36 = vcombine.low %v3472_v23, %v3476_v24  ;;  %v8781_v40 = vcombine.high %v3480_v29, %v3484_v30  ;;  %v3591_v22 = vld [vmem:[#allocation10 + $0x590] sm:$0xff]  ;;  %v3520_v24 = vld [vmem:[#allocation10 + $0x358] sm:$0xff] }
 0x4b5   : > { %7023 = vmatprep.subr.bf16.mxu1 %v8733_v37  ;;  %v8851_v37 = vcombine.high %v3551_v27, %v3555_v28  ;;  %v3595_v23 = vld [vmem:[#allocation10 + $0x5b0] sm:$0xff] }
 0x4b7   : > { %6878 = vmatpush1.bf16.msra.mxu0 %v8802_v6  ;;  %v3492_v6 = vld [vmem:[#allocation10 + $0x278] sm:$0xff] }
 0x4b8   : > { %7024 = vmatpush1.bf16.msra.mxu1 %v8732_v9  ;;  %6879 = vmatprep.subr.bf16.mxu0 %v8811_v18  ;;  %v8850_v9 = vcombine.low %v3551_v27, %v3555_v28  ;;  %v8780_v18 = vcombine.low %v3480_v29, %v3484_v30  ;;  %v8789_v52 = vcombine.high %v3488_v41, %v3492_v6  ;;  %v3599_v28 = vld [vmem:[#allocation10 + $0x5d0] sm:$0xff]  ;;  %v3528_v30 = vld [vmem:[#allocation10 + $0x398] sm:$0xff] }
 0x4b9   : > { %7025 = vmatprep.subr.bf16.mxu1 %v8741_v35  ;;  %v8859_v35 = vcombine.high %v3559_v33, %v3563_v34  ;;  %v3603_v29 = vld [vmem:[#allocation10 + $0x5f0] sm:$0xff] }
 0x4bb   : > { %6880 = vmatpush1.bf16.msra.mxu0 %v8810_v47  ;;  %v3500_v47 = vld [vmem:[#allocation10 + $0x2b8] sm:$0xff] }
 0x4bc   : > { %7026 = vmatpush1.bf16.msra.mxu1 %v8740_v45  ;;  %6881 = vmatprep.subr.bf16.mxu0 %v8819_v49  ;;  %v8858_v45 = vcombine.low %v3559_v33, %v3563_v34  ;;  %v8788_v49 = vcombine.low %v3488_v41, %v3492_v6  ;;  %v8797_v53 = vcombine.high %v3496_v44, %v3500_v47  ;;  %v3607_v34 = vld [vmem:[#allocation10 + $0x610] sm:$0xff]  ;;  %v3536_v6 = vld [vmem:[#allocation10 + $0x3d8] sm:$0xff] }
 0x4bd   : > { %7027 = vmatprep.subr.bf16.mxu1 %v8749_v50  ;;  %v8867_v50 = vcombine.high %v3567_v43, %v3571_v11  ;;  %v3611_v41 = vld [vmem:[#allocation10 + $0x630] sm:$0xff] }
 0x4bf   : > { %6882 = vmatpush1.bf16.msra.mxu0 %v8818_v15  ;;  %v3508_v15 = vld [vmem:[#allocation10 + $0x2f8] sm:$0xff] }
 0x4c0   : > { %7028 = vmatpush1.bf16.msra.mxu1 %v8748_v61  ;;  %6883 = vmatprep.subr.bf16.mxu0 %v8827_v62  ;;  %v8866_v61 = vcombine.low %v3567_v43, %v3571_v11  ;;  %v8796_v62 = vcombine.low %v3496_v44, %v3500_v47  ;;  %v8805_v0 = vcombine.high %v3504_v60, %v3508_v15  ;;  %v3615_v11 = vld [vmem:[#allocation10 + $0x650] sm:$0xff]  ;;  %v3544_v47 = vld [vmem:[#allocation10 + $0x418] sm:$0xff] }
 0x4c1   : > { %7029 = vmatprep.subr.bf16.mxu1 %v8757_v63  ;;  %v8875_v63 = vcombine.high %v3575_v57, %v3579_v59  ;;  %v3619_v44 = vld [vmem:[#allocation10 + $0x670] sm:$0xff] }
 0x4c3   : > { %6884 = vmatpush1.bf16.msra.mxu0 %v8826_v12  ;;  %v3516_v12 = vld [vmem:[#allocation10 + $0x338] sm:$0xff] }
 0x4c4   : > { %7030 = vmatpush1.bf16.msra.mxu1 %v8756_v14  ;;  %6885 = vmatprep.subr.bf16.mxu0 %v8835_v17  ;;  %v8874_v14 = vcombine.low %v3575_v57, %v3579_v59  ;;  %v8804_v17 = vcombine.low %v3504_v60, %v3508_v15  ;;  %v8813_v20 = vcombine.high %v3512_v5, %v3516_v12  ;;  %v3623_v59 = vld [vmem:[#allocation10 + $0x690] sm:$0xff]  ;;  %v3552_v15 = vld [vmem:[#allocation10 + $0x458] sm:$0xff] }
 0x4c5   : > { %7031 = vmatprep.subr.bf16.mxu1 %v8765_v19  ;;  %v8883_v19 = vcombine.high %v3583_v1, %v3587_v2  ;;  %v3627_v60 = vld [vmem:[#allocation10 + $0x6b0] sm:$0xff] }
 0x4c7   : > { %6886 = vmatpush1.bf16.msra.mxu0 %v8834_v8  ;;  %v3524_v8 = vld [vmem:[#allocation10 + $0x378] sm:$0xff] }
 0x4c8   : > { %7032 = vmatpush1.bf16.msra.mxu1 %v8764_v4  ;;  %6896 = vmatprep.subr.bf16.mxu0 %v8843_v25  ;;  %v8882_v4 = vcombine.low %v3583_v1, %v3587_v2  ;;  %v8812_v25 = vcombine.low %v3512_v5, %v3516_v12  ;;  %v8821_v27 = vcombine.high %v3520_v24, %v3524_v8  ;;  %v3631_v2 = vld [vmem:[#allocation10 + $0x6d0] sm:$0xff]  ;;  %v3560_v12 = vld [vmem:[#allocation10 + $0x498] sm:$0xff] }
 0x4c9   : > { %7033 = vmatprep.subr.bf16.mxu1 %v8773_v26  ;;  %v8891_v26 = vcombine.high %v3591_v22, %v3595_v23  ;;  %v3635_v5 = vld [vmem:[#allocation10 + $0x6f0] sm:$0xff] }
 0x4ca   : > { %6888 = vmatmul.mubr.bf16.vlgmr.msra.gmra.mrb[8].mxu0 %v10818_v13 }
 0x4cb   : > { %6897 = vmatpush1.bf16.msra.mxu0 %v8842_v31  ;;  %6928 = vmatprep.mubr.bf16.mxu0 %v10845_v54  ;;  %v3532_v31 = vld [vmem:[#allocation10 + $0x3b8] sm:$0xff] }
 0x4cc   : > { %7034 = vmatpush1.bf16.msra.mxu1 %v8772_v36  ;;  %6898 = vmatprep.subr.bf16.mxu0 %v8851_v37  ;;  %v8890_v36 = vcombine.low %v3591_v22, %v3595_v23  ;;  %v8820_v37 = vcombine.low %v3520_v24, %v3524_v8  ;;  %v8829_v33 = vcombine.high %v3528_v30, %v3532_v31  ;;  %v3639_v23 = vld [vmem:[#allocation10 + $0x710] sm:$0xff]  ;;  %v3568_v8 = vld [vmem:[#allocation10 + $0x4d8] sm:$0xff] }
 0x4cd   : > { %7035 = vmatprep.subr.bf16.mxu1 %v8781_v40  ;;  %v8899_v40 = vcombine.high %v3599_v28, %v3603_v29  ;;  %v3643_v24 = vld [vmem:[#allocation10 + $0x730] sm:$0xff] }
 0x4cf   : > { %6899 = vmatpush1.bf16.msra.mxu0 %v8850_v9  ;;  %v3540_v9 = vld [vmem:[#allocation10 + $0x3f8] sm:$0xff] }
 0x4d0   : > { %7036 = vmatpush1.bf16.msra.mxu1 %v8780_v18  ;;  %6900 = vmatprep.subr.bf16.mxu0 %v8859_v35  ;;  %v8898_v18 = vcombine.low %v3599_v28, %v3603_v29  ;;  %v8828_v35 = vcombine.low %v3528_v30, %v3532_v31  ;;  %v8837_v43 = vcombine.high %v3536_v6, %v3540_v9  ;;  %v3647_v28 = vld [vmem:[#allocation10 + $0x750] sm:$0xff]  ;;  %v3580_v30 = vld [vmem:[#allocation10 + $0x538] sm:$0xff] }
 0x4d1   : > { %7037 = vmatprep.subr.bf16.mxu1 %v8789_v52  ;;  %v8907_v52 = vcombine.high %v3607_v34, %v3611_v41  ;;  %v3651_v29 = vld [vmem:[#allocation10 + $0x770] sm:$0xff]  ;;  %v8938_v31 = vcombine.low %v3639_v23, %v3643_v24 }
 0x4d3   : > { %6901 = vmatpush1.bf16.msra.mxu0 %v8858_v45  ;;  %v3548_v45 = vld [vmem:[#allocation10 + $0x438] sm:$0xff] }
 0x4d4   : > { %7038 = vmatpush1.bf16.msra.mxu1 %v8788_v49  ;;  %6902 = vmatprep.subr.bf16.mxu0 %v8867_v50  ;;  %v8906_v49 = vcombine.low %v3607_v34, %v3611_v41  ;;  %v8836_v50 = vcombine.low %v3536_v6, %v3540_v9  ;;  %v8845_v57 = vcombine.high %v3544_v47, %v3548_v45  ;;  %v3659_v34 = vld [vmem:[#allocation10 + $0x7b0] sm:$0xff]  ;;  %v3584_v41 = vld [vmem:[#allocation10 + $0x558] sm:$0xff] }
 0x4d5   : > { %7039 = vmatprep.subr.bf16.mxu1 %v8797_v53  ;;  %v8915_v53 = vcombine.high %v3615_v11, %v3619_v44  ;;  %v3588_v6 = vld [vmem:[#allocation10 + $0x578] sm:$0xff]  ;;  %v8946_v9 = vcombine.low %v3647_v28, %v3651_v29 }
 0x4d7   : > { %6903 = vmatpush1.bf16.msra.mxu0 %v8866_v61  ;;  %v3556_v61 = vld [vmem:[#allocation10 + $0x478] sm:$0xff] }
 0x4d8   : > { %7040 = vmatpush1.bf16.msra.mxu1 %v8796_v62  ;;  %6904 = vmatprep.subr.bf16.mxu0 %v8875_v63  ;;  %v8914_v62 = vcombine.low %v3615_v11, %v3619_v44  ;;  %v8844_v63 = vcombine.low %v3544_v47, %v3548_v45  ;;  %v8853_v1 = vcombine.high %v3552_v15, %v3556_v61  ;;  %v3667_v11 = vld [vmem:[#allocation10 + $0x7f0] sm:$0xff]  ;;  %v3592_v44 = vld [vmem:[#allocation10 + $0x598] sm:$0xff] }
 0x4d9   : > { %7041 = vmatprep.subr.bf16.mxu1 %v8805_v0  ;;  %v8923_v0 = vcombine.high %v3623_v59, %v3627_v60  ;;  %v3596_v47 = vld [vmem:[#allocation10 + $0x5b8] sm:$0xff] }
 0x4db   : > { %6905 = vmatpush1.bf16.msra.mxu0 %v8874_v14  ;;  %v3564_v14 = vld [vmem:[#allocation10 + $0x4b8] sm:$0xff] }
 0x4dc   : > { %7042 = vmatpush1.bf16.msra.mxu1 %v8804_v17  ;;  %6906 = vmatprep.subr.bf16.mxu0 %v8883_v19  ;;  %v8922_v17 = vcombine.low %v3623_v59, %v3627_v60  ;;  %v8852_v19 = vcombine.low %v3552_v15, %v3556_v61  ;;  %v8861_v22 = vcombine.high %v3560_v12, %v3564_v14  ;;  %v3675_v59 = vld [vmem:[#allocation10 + $0x830] sm:$0xff]  ;;  %v3600_v60 = vld [vmem:[#allocation10 + $0x5d8] sm:$0xff] }
 0x4dd   : > { %7043 = vmatprep.subr.bf16.mxu1 %v8813_v20  ;;  %v8931_v20 = vcombine.high %v3631_v2, %v3635_v5  ;;  %v3604_v15 = vld [vmem:[#allocation10 + $0x5f8] sm:$0xff] }
 0x4df   : > { %6907 = vmatpush1.bf16.msra.mxu0 %v8882_v4  ;;  %v3572_v4 = vld [vmem:[#allocation10 + $0x4f8] sm:$0xff] }
 0x4e0   : > { %7044 = vmatpush1.bf16.msra.mxu1 %v8812_v25  ;;  %6908 = vmatprep.subr.bf16.mxu0 %v8891_v26  ;;  %v8930_v25 = vcombine.low %v3631_v2, %v3635_v5  ;;  %v8860_v26 = vcombine.low %v3560_v12, %v3564_v14  ;;  %v3683_v2 = vld [vmem:[#allocation10 + $0x870] sm:$0xff]  ;;  %v3608_v5 = vld [vmem:[#allocation10 + $0x618] sm:$0xff] }
 0x4e1   : > { %7045 = vmatprep.subr.bf16.mxu1 %v8821_v27  ;;  %v8939_v27 = vcombine.high %v3639_v23, %v3643_v24  ;;  %v3612_v12 = vld [vmem:[#allocation10 + $0x638] sm:$0xff]  ;;  %v3691_v23 = vld [vmem:[#allocation10 + $0x8b0] sm:$0xff] }
 0x4e2   : > { %v3616_v24 = vld [vmem:[#allocation10 + $0x658] sm:$0xff] }
 0x4e3   : > { %6909 = vmatpush1.bf16.msra.mxu0 %v8890_v36  ;;  %v8868_v36 = vcombine.low %v3568_v8, %v3572_v4 }
 0x4e4   : > { %7046 = vmatpush1.bf16.msra.mxu1 %v8820_v37  ;;  %6910 = vmatprep.subr.bf16.mxu0 %v8899_v40  ;;  %v8947_v37 = vcombine.high %v3647_v28, %v3651_v29  ;;  %v3699_v28 = vld [vmem:[#allocation10 + $0x8f0] sm:$0xff]  ;;  %v3624_v29 = vld [vmem:[#allocation10 + $0x698] sm:$0xff] }
 0x4e5   : > { %7047 = vmatprep.subr.bf16.mxu1 %v8829_v33  ;;  %v3655_v33 = vld [vmem:[#allocation10 + $0x790] sm:$0xff] }
 0x4e6   : > { %v8954_v45 = vcombine.low %v3655_v33, %v3659_v34 }
 0x4e7   : > { %6911 = vmatpush1.bf16.msra.mxu0 %v8898_v18 }
 0x4e8   : > { %7048 = vmatpush1.bf16.msra.mxu1 %v8828_v35  ;;  %6912 = vmatprep.subr.bf16.mxu0 %v8907_v52  ;;  %v8955_v35 = vcombine.high %v3655_v33, %v3659_v34  ;;  %v8885_v52 = vcombine.high %v3584_v41, %v3588_v6  ;;  %v3707_v33 = vld [vmem:[#allocation10 + $0x930] sm:$0xff]  ;;  %v3632_v34 = vld [vmem:[#allocation10 + $0x6d8] sm:$0xff] }
 0x4e9   : > { %7049 = vmatprep.subr.bf16.mxu1 %v8837_v43  ;;  %v3663_v43 = vld [vmem:[#allocation10 + $0x7d0] sm:$0xff] }
 0x4ea   : > { %v8962_v61 = vcombine.low %v3663_v43, %v3667_v11 }
 0x4eb   : > { %6913 = vmatpush1.bf16.msra.mxu0 %v8906_v49  ;;  %v8884_v49 = vcombine.low %v3584_v41, %v3588_v6  ;;  %v3636_v41 = vld [vmem:[#allocation10 + $0x6f8] sm:$0xff] }
 0x4ec   : > { %7050 = vmatpush1.bf16.msra.mxu1 %v8836_v50  ;;  %6914 = vmatprep.subr.bf16.mxu0 %v8915_v53  ;;  %v8963_v50 = vcombine.high %v3663_v43, %v3667_v11  ;;  %v8893_v53 = vcombine.high %v3592_v44, %v3596_v47  ;;  %v3715_v43 = vld [vmem:[#allocation10 + $0x970] sm:$0xff]  ;;  %v3640_v11 = vld [vmem:[#allocation10 + $0x718] sm:$0xff] }
 0x4ed   : > { %7060 = vmatprep.subr.bf16.mxu1 %v8845_v57  ;;  %v3671_v57 = vld [vmem:[#allocation10 + $0x810] sm:$0xff] }
 0x4ee   : > { %v8970_v14 = vcombine.low %v3671_v57, %v3675_v59 }
 0x4ef   : > { %6915 = vmatpush1.bf16.msra.mxu0 %v8914_v62  ;;  %7052 = vmatmul.mubr.bf16.vlgmr.msra.gmra.mrb[16].mxu1 %v10818_v13  ;;  %v8869_v13 = vcombine.high %v3568_v8, %v3572_v4  ;;  %v8892_v62 = vcombine.low %v3592_v44, %v3596_v47  ;;  %v3620_v8 = vld [vmem:[#allocation10 + $0x678] sm:$0xff] }
 0x4f0   : > { %7061 = vmatpush1.bf16.msra.mxu1 %v8844_v63  ;;  %7092 = vmatprep.mubr.bf16.mxu1 %v10845_v54  ;;  %v3576_v54 = vld [vmem:[#allocation10 + $0x518] sm:$0xff]  ;;  %v8971_v63 = vcombine.high %v3671_v57, %v3675_v59  ;;  %v3723_v57 = vld [vmem:[#allocation10 + $0x9b0] sm:$0xff] }
 0x4f1   : > { %6916 = vmatprep.subr.bf16.mxu0 %v8923_v0  ;;  %7062 = vmatprep.subr.bf16.mxu1 %v8853_v1  ;;  %v8877_v40 = vcombine.high %v3576_v54, %v3580_v30  ;;  %v8876_v18 = vcombine.low %v3576_v54, %v3580_v30  ;;  %v8901_v0 = vcombine.high %v3600_v60, %v3604_v15  ;;  %v3679_v1 = vld [vmem:[#allocation10 + $0x850] sm:$0xff]  ;;  %v3628_v54 = vld [vmem:[#allocation10 + $0x6b8] sm:$0xff] }
 0x4f2   : > { %v8978_v4 = vcombine.low %v3679_v1, %v3683_v2  ;;  %v3644_v44 = vld [vmem:[#allocation10 + $0x738] sm:$0xff] }
 0x4f3   : > { %6917 = vmatpush1.bf16.msra.mxu0 %v8922_v17  ;;  %v8900_v17 = vcombine.low %v3600_v60, %v3604_v15  ;;  %v3648_v59 = vld [vmem:[#allocation10 + $0x758] sm:$0xff] }
 0x4f4   : > { %7063 = vmatpush1.bf16.msra.mxu1 %v8852_v19  ;;  %6918 = vmatprep.subr.bf16.mxu0 %v8931_v20  ;;  %v8979_v19 = vcombine.high %v3679_v1, %v3683_v2  ;;  %v8909_v20 = vcombine.high %v3608_v5, %v3612_v12  ;;  %v3652_v60 = vld [vmem:[#allocation10 + $0x778] sm:$0xff]  ;;  %v3731_v1 = vld [vmem:[#allocation10 + $0x9f0] sm:$0xff] }
 0x4f5   : > { %7064 = vmatprep.subr.bf16.mxu1 %v8861_v22  ;;  %v3687_v22 = vld [vmem:[#allocation10 + $0x890] sm:$0xff]  ;;  %v3656_v2 = vld [vmem:[#allocation10 + $0x798] sm:$0xff] }
 0x4f6   : > { %v8986_v30 = vcombine.low %v3687_v22, %v3691_v23 }
 0x4f7   : > { %6919 = vmatpush1.bf16.msra.mxu0 %v8930_v25  ;;  %v8908_v25 = vcombine.low %v3608_v5, %v3612_v12  ;;  %v3660_v5 = vld [vmem:[#allocation10 + $0x7b8] sm:$0xff] }
 0x4f8   : > { %7065 = vmatpush1.bf16.msra.mxu1 %v8860_v26  ;;  %6920 = vmatprep.subr.bf16.mxu0 %v8939_v27  ;;  %v8987_v26 = vcombine.high %v3687_v22, %v3691_v23  ;;  %v8917_v27 = vcombine.high %v3616_v24, %v3620_v8  ;;  %v3739_v22 = vld [vmem:[#allocation10 + $0xa30] sm:$0xff]  ;;  %v3664_v23 = vld [vmem:[#allocation10 + $0x7d8] sm:$0xff] }
 0x4f9   : > { %7066 = vmatprep.subr.bf16.mxu1 %v8869_v13  ;;  %v3695_v13 = vld [vmem:[#allocation10 + $0x8d0] sm:$0xff] }
 0x4fa   : > { %v8994_v6 = vcombine.low %v3695_v13, %v3699_v28 }
 0x4fb   : > { %6921 = vmatpush1.bf16.msra.mxu0 %v8938_v31  ;;  %v8916_v31 = vcombine.low %v3616_v24, %v3620_v8  ;;  %v3668_v24 = vld [vmem:[#allocation10 + $0x7f8] sm:$0xff] }
 0x4fc   : > { %7067 = vmatpush1.bf16.msra.mxu1 %v8868_v36  ;;  %6922 = vmatprep.subr.bf16.mxu0 %v8947_v37  ;;  %v8995_v36 = vcombine.high %v3695_v13, %v3699_v28  ;;  %v8925_v37 = vcombine.high %v3624_v29, %v3628_v54  ;;  %v3747_v13 = vld [vmem:[#allocation10 + $0xa70] sm:$0xff]  ;;  %v3672_v28 = vld [vmem:[#allocation10 + $0x818] sm:$0xff] }
 0x4fd   : > { %7068 = vmatprep.subr.bf16.mxu1 %v8877_v40  ;;  %v3703_v40 = vld [vmem:[#allocation10 + $0x910] sm:$0xff] }
 0x4fe   : > { %v9002_v47 = vcombine.low %v3703_v40, %v3707_v33 }
 0x4ff   : > { %6923 = vmatpush1.bf16.msra.mxu0 %v8946_v9  ;;  %v8924_v9 = vcombine.low %v3624_v29, %v3628_v54  ;;  %v3676_v29 = vld [vmem:[#allocation10 + $0x838] sm:$0xff] }
 0x500   : > { %7069 = vmatpush1.bf16.msra.mxu1 %v8876_v18  ;;  %6924 = vmatprep.subr.bf16.mxu0 %v8955_v35  ;;  %v9003_v18 = vcombine.high %v3703_v40, %v3707_v33  ;;  %v8933_v35 = vcombine.high %v3632_v34, %v3636_v41  ;;  %v3755_v40 = vld [vmem:[#allocation10 + $0xab0] sm:$0xff]  ;;  %v3680_v33 = vld [vmem:[#allocation10 + $0x858] sm:$0xff] }
 0x501   : > { %7070 = vmatprep.subr.bf16.mxu1 %v8885_v52  ;;  %v3711_v52 = vld [vmem:[#allocation10 + $0x950] sm:$0xff] }
 0x502   : > { %v9010_v15 = vcombine.low %v3711_v52, %v3715_v43 }
 0x503   : > { %6925 = vmatpush1.bf16.msra.mxu0 %v8954_v45  ;;  %v8932_v45 = vcombine.low %v3632_v34, %v3636_v41  ;;  %v3684_v34 = vld [vmem:[#allocation10 + $0x878] sm:$0xff] }
 0x504   : > { %7071 = vmatpush1.bf16.msra.mxu1 %v8884_v49  ;;  %6926 = vmatprep.subr.bf16.mxu0 %v8963_v50  ;;  %v9011_v49 = vcombine.high %v3711_v52, %v3715_v43  ;;  %v8941_v50 = vcombine.high %v3640_v11, %v3644_v44  ;;  %v3763_v52 = vld [vmem:[#allocation10 + $0xaf0] sm:$0xff]  ;;  %v3688_v43 = vld [vmem:[#allocation10 + $0x898] sm:$0xff] }
 0x505   : > { %7072 = vmatprep.subr.bf16.mxu1 %v8893_v53  ;;  %v3719_v53 = vld [vmem:[#allocation10 + $0x990] sm:$0xff] }
 0x506   : > { %v9018_v12 = vcombine.low %v3719_v53, %v3723_v57 }
 0x507   : > { %6927 = vmatpush1.bf16.msra.mxu0 %v8962_v61  ;;  %v8940_v61 = vcombine.low %v3640_v11, %v3644_v44  ;;  %v3692_v11 = vld [vmem:[#allocation10 + $0x8b8] sm:$0xff] }
 0x508   : > { %7073 = vmatpush1.bf16.msra.mxu1 %v8892_v62  ;;  %6937 = vmatprep.subr.bf16.mxu0 %v8971_v63  ;;  %v9019_v62 = vcombine.high %v3719_v53, %v3723_v57  ;;  %v8949_v63 = vcombine.high %v3648_v59, %v3652_v60  ;;  %v3771_v53 = vld [vmem:[#allocation10 + $0xb30] sm:$0xff]  ;;  %v3696_v57 = vld [vmem:[#allocation10 + $0x8d8] sm:$0xff] }
 0x509   : > { %7074 = vmatprep.subr.bf16.mxu1 %v8901_v0  ;;  %v3727_v0 = vld [vmem:[#allocation10 + $0x9d0] sm:$0xff] }
 0x50a   : > { %6929 = vmatmul.mubr.bf16.vlgmr.msra.gmra.mrb[8].mxu0 %v10847_v21  ;;  %v9026_v8 = vcombine.low %v3727_v0, %v3731_v1 }
 0x50b   : > { %6938 = vmatpush1.bf16.msra.mxu0 %v8970_v14  ;;  %6969 = vmatprep.mubr.bf16.mxu0 %v10849_v7  ;;  %v8948_v14 = vcombine.low %v3648_v59, %v3652_v60  ;;  %v3700_v59 = vld [vmem:[#allocation10 + $0x8f8] sm:$0xff] }
 0x50c   : > { %7075 = vmatpush1.bf16.msra.mxu1 %v8900_v17  ;;  %6939 = vmatprep.subr.bf16.mxu0 %v8979_v19  ;;  %v9027_v17 = vcombine.high %v3727_v0, %v3731_v1  ;;  %v8957_v19 = vcombine.high %v3656_v2, %v3660_v5  ;;  %v3708_v0 = vld [vmem:[#allocation10 + $0x938] sm:$0xff] }
 0x50d   : > { %7076 = vmatprep.subr.bf16.mxu1 %v8909_v20  ;;  %v3735_v20 = vld [vmem:[#allocation10 + $0xa10] sm:$0xff] }
 0x50e   : > { %v9034_v54 = vcombine.low %v3735_v20, %v3739_v22 }
 0x50f   : > { %6940 = vmatpush1.bf16.msra.mxu0 %v8978_v4  ;;  %v8956_v4 = vcombine.low %v3656_v2, %v3660_v5  ;;  %v8996_v2 = vcombine.low %v3696_v57, %v3700_v59 }
 0x510   : > { %7077 = vmatpush1.bf16.msra.mxu1 %v8908_v25  ;;  %6941 = vmatprep.subr.bf16.mxu0 %v8987_v26  ;;  %v9035_v25 = vcombine.high %v3735_v20, %v3739_v22  ;;  %v8965_v26 = vcombine.high %v3664_v23, %v3668_v24  ;;  %v3716_v20 = vld [vmem:[#allocation10 + $0x978] sm:$0xff] }
 0x511   : > { %7078 = vmatprep.subr.bf16.mxu1 %v8917_v27  ;;  %v3743_v27 = vld [vmem:[#allocation10 + $0xa50] sm:$0xff] }
 0x512   : > { %v9042_v41 = vcombine.low %v3743_v27, %v3747_v13 }
 0x513   : > { %6942 = vmatpush1.bf16.msra.mxu0 %v8986_v30  ;;  %v8964_v30 = vcombine.low %v3664_v23, %v3668_v24 }
 0x514   : > { %7079 = vmatpush1.bf16.msra.mxu1 %v8916_v31  ;;  %6943 = vmatprep.subr.bf16.mxu0 %v8995_v36  ;;  %v9043_v31 = vcombine.high %v3743_v27, %v3747_v13  ;;  %v8973_v36 = vcombine.high %v3672_v28, %v3676_v29  ;;  %v3724_v27 = vld [vmem:[#allocation10 + $0x9b8] sm:$0xff] }
 0x515   : > { %7080 = vmatprep.subr.bf16.mxu1 %v8925_v37  ;;  %v3751_v37 = vld [vmem:[#allocation10 + $0xa90] sm:$0xff] }
 0x516   : > { %v9050_v44 = vcombine.low %v3751_v37, %v3755_v40 }
 0x517   : > { %6944 = vmatpush1.bf16.msra.mxu0 %v8994_v6  ;;  %v8972_v6 = vcombine.low %v3672_v28, %v3676_v29 }
 0x518   : > { %7081 = vmatpush1.bf16.msra.mxu1 %v8924_v9  ;;  %6945 = vmatprep.subr.bf16.mxu0 %v9003_v18  ;;  %v9051_v9 = vcombine.high %v3751_v37, %v3755_v40  ;;  %v8981_v18 = vcombine.high %v3680_v33, %v3684_v34  ;;  %v3732_v37 = vld [vmem:[#allocation10 + $0x9f8] sm:$0xff] }
 0x519   : > { %7082 = vmatprep.subr.bf16.mxu1 %v8933_v35  ;;  %v3759_v35 = vld [vmem:[#allocation10 + $0xad0] sm:$0xff] }
 0x51a   : > { %v9058_v60 = vcombine.low %v3759_v35, %v3763_v52 }
 0x51b   : > { %6946 = vmatpush1.bf16.msra.mxu0 %v9002_v47  ;;  %v8980_v47 = vcombine.low %v3680_v33, %v3684_v34 }
 0x51c   : > { %7083 = vmatpush1.bf16.msra.mxu1 %v8932_v45  ;;  %6947 = vmatprep.subr.bf16.mxu0 %v9011_v49  ;;  %v9059_v45 = vcombine.high %v3759_v35, %v3763_v52  ;;  %v8989_v49 = vcombine.high %v3688_v43, %v3692_v11  ;;  %v3740_v35 = vld [vmem:[#allocation10 + $0xa38] sm:$0xff] }
 0x51d   : > { %7084 = vmatprep.subr.bf16.mxu1 %v8941_v50  ;;  %v3767_v50 = vld [vmem:[#allocation10 + $0xb10] sm:$0xff] }
 0x51e   : > { %v9066_v1 = vcombine.low %v3767_v50, %v3771_v53 }
 0x51f   : > { %6948 = vmatpush1.bf16.msra.mxu0 %v9010_v15  ;;  %v8988_v15 = vcombine.low %v3688_v43, %v3692_v11 }
 0x520   : > { %7085 = vmatpush1.bf16.msra.mxu1 %v8940_v61  ;;  %6949 = vmatprep.subr.bf16.mxu0 %v9019_v62  ;;  %v9067_v61 = vcombine.high %v3767_v50, %v3771_v53  ;;  %v3775_v62 = vld [vmem:[#allocation10 + $0xb50] sm:$0xff]  ;;  %v3748_v50 = vld [vmem:[#allocation10 + $0xa78] sm:$0xff] }
 0x521   : > { %7086 = vmatprep.subr.bf16.mxu1 %v8949_v63  ;;  %v3779_v63 = vld [vmem:[#allocation10 + $0xb70] sm:$0xff] }
 0x522   : > { %v9075_v5 = vcombine.high %v3775_v62, %v3779_v63  ;;  %v9074_v22 = vcombine.low %v3775_v62, %v3779_v63  ;;  %v3756_v62 = vld [vmem:[#allocation10 + $0xab8] sm:$0xff] }
 0x523   : > { %6950 = vmatpush1.bf16.msra.mxu0 %v9018_v12 }
 0x524   : > { %7087 = vmatpush1.bf16.msra.mxu1 %v8948_v14  ;;  %6951 = vmatprep.subr.bf16.mxu0 %v9027_v17  ;;  %v3783_v14 = vld [vmem:[#allocation10 + $0xb90] sm:$0xff] }
 0x525   : > { %7088 = vmatprep.subr.bf16.mxu1 %v8957_v19  ;;  %v3787_v17 = vld [vmem:[#allocation10 + $0xbb0] sm:$0xff]  ;;  %v3712_v19 = vld [vmem:[#allocation10 + $0x958] sm:$0xff] }
 0x526   : > { %v9083_v24 = vcombine.high %v3783_v14, %v3787_v17  ;;  %v9082_v13 = vcombine.low %v3783_v14, %v3787_v17  ;;  %v9012_v28 = vcombine.low %v3712_v19, %v3716_v20  ;;  %v3764_v14 = vld [vmem:[#allocation10 + $0xaf8] sm:$0xff] }
 0x527   : > { %6952 = vmatpush1.bf16.msra.mxu0 %v9026_v8  ;;  %v9013_v8 = vcombine.high %v3712_v19, %v3716_v20 }
 0x528   : > { %7089 = vmatpush1.bf16.msra.mxu1 %v8956_v4  ;;  %6953 = vmatprep.subr.bf16.mxu0 %v9035_v25  ;;  %v3791_v4 = vld [vmem:[#allocation10 + $0xbd0] sm:$0xff] }
 0x529   : > { %7090 = vmatprep.subr.bf16.mxu1 %v8965_v26  ;;  %v3795_v25 = vld [vmem:[#allocation10 + $0xbf0] sm:$0xff]  ;;  %v3720_v26 = vld [vmem:[#allocation10 + $0x998] sm:$0xff] }
 0x52a   : > { %v9091_v29 = vcombine.high %v3791_v4, %v3795_v25  ;;  %v9090_v40 = vcombine.low %v3791_v4, %v3795_v25  ;;  %v9020_v33 = vcombine.low %v3720_v26, %v3724_v27  ;;  %v3772_v4 = vld [vmem:[#allocation10 + $0xb38] sm:$0xff] }
 0x52b   : > { %6954 = vmatpush1.bf16.msra.mxu0 %v9034_v54  ;;  %v9021_v54 = vcombine.high %v3720_v26, %v3724_v27 }
 0x52c   : > { %7091 = vmatpush1.bf16.msra.mxu1 %v8964_v30  ;;  %6955 = vmatprep.subr.bf16.mxu0 %v9043_v31  ;;  %v3799_v30 = vld [vmem:[#allocation10 + $0xc10] sm:$0xff] }
 0x52d   : > { %7101 = vmatprep.subr.bf16.mxu1 %v8973_v36  ;;  %v3803_v31 = vld [vmem:[#allocation10 + $0xc30] sm:$0xff]  ;;  %v3728_v36 = vld [vmem:[#allocation10 + $0x9d8] sm:$0xff] }
 0x52e   : > { %v9099_v34 = vcombine.high %v3799_v30, %v3803_v31  ;;  %v9098_v52 = vcombine.low %v3799_v30, %v3803_v31  ;;  %v9028_v43 = vcombine.low %v3728_v36, %v3732_v37  ;;  %v3780_v30 = vld [vmem:[#allocation10 + $0xb78] sm:$0xff] }
 0x52f   : > { %6956 = vmatpush1.bf16.msra.mxu0 %v9042_v41  ;;  %7093 = vmatmul.mubr.bf16.vlgmr.msra.gmra.mrb[16].mxu1 %v10847_v21  ;;  %v8997_v21 = vcombine.high %v3696_v57, %v3700_v59  ;;  %v9029_v41 = vcombine.high %v3728_v36, %v3732_v37 }
 0x530   : > { %7102 = vmatpush1.bf16.msra.mxu1 %v8972_v6  ;;  %7133 = vmatprep.mubr.bf16.mxu1 %v10849_v7  ;;  %v3704_v7 = vld [vmem:[#allocation10 + $0x918] sm:$0xff]  ;;  %v3807_v6 = vld [vmem:[#allocation10 + $0xc50] sm:$0xff] }
 0x531   : > { %6957 = vmatprep.subr.bf16.mxu0 %v9051_v9  ;;  %7103 = vmatprep.subr.bf16.mxu1 %v8981_v18  ;;  %v9005_v12 = vcombine.high %v3704_v7, %v3708_v0  ;;  %v9004_v23 = vcombine.low %v3704_v7, %v3708_v0  ;;  %v3811_v9 = vld [vmem:[#allocation10 + $0xc70] sm:$0xff]  ;;  %v3736_v18 = vld [vmem:[#allocation10 + $0xa18] sm:$0xff] }
 0x532   : > { %v9107_v11 = vcombine.high %v3807_v6, %v3811_v9  ;;  %v9106_v53 = vcombine.low %v3807_v6, %v3811_v9  ;;  %v9036_v57 = vcombine.low %v3736_v18, %v3740_v35  ;;  %v3784_v9 = vld [vmem:[#allocation10 + $0xb98] sm:$0xff] }
 0x533   : > { %6958 = vmatpush1.bf16.msra.mxu0 %v9050_v44  ;;  %v9037_v44 = vcombine.high %v3736_v18, %v3740_v35  ;;  %v3788_v18 = vld [vmem:[#allocation10 + $0xbb8] sm:$0xff] }
 0x534   : > { %7104 = vmatpush1.bf16.msra.mxu1 %v8980_v47  ;;  %6959 = vmatprep.subr.bf16.mxu0 %v9059_v45  ;;  %v3815_v47 = vld [vmem:[#allocation10 + $0xc90] sm:$0xff] }
 0x535   : > { %7105 = vmatprep.subr.bf16.mxu1 %v8989_v49  ;;  %v3819_v45 = vld [vmem:[#allocation10 + $0xcb0] sm:$0xff]  ;;  %v3744_v49 = vld [vmem:[#allocation10 + $0xa58] sm:$0xff] }
 0x536   : > { %v9115_v59 = vcombine.high %v3815_v47, %v3819_v45  ;;  %v9114_v63 = vcombine.low %v3815_v47, %v3819_v45  ;;  %v9044_v7 = vcombine.low %v3744_v49, %v3748_v50  ;;  %v9085_v47 = vcombine.high %v3784_v9, %v3788_v18  ;;  %v3863_v45 = vld [vmem:[#allocation10 + $0xe10] sm:$0xff] }
 0x537   : > { %6960 = vmatpush1.bf16.msra.mxu0 %v9058_v60  ;;  %v9045_v60 = vcombine.high %v3744_v49, %v3748_v50  ;;  %v3867_v49 = vld [vmem:[#allocation10 + $0xe30] sm:$0xff]  ;;  %v3792_v50 = vld [vmem:[#allocation10 + $0xbd8] sm:$0xff] }
 0x538   : > { %7106 = vmatpush1.bf16.msra.mxu1 %v8988_v15  ;;  %6961 = vmatprep.subr.bf16.mxu0 %v9067_v61  ;;  %v3823_v15 = vld [vmem:[#allocation10 + $0xcd0] sm:$0xff] }
 0x539   : > { %7107 = vmatprep.subr.bf16.mxu1 %v8997_v21  ;;  %v3827_v61 = vld [vmem:[#allocation10 + $0xcf0] sm:$0xff]  ;;  %v3752_v21 = vld [vmem:[#allocation10 + $0xa98] sm:$0xff] }
 0x53a   : > { %v9123_v0 = vcombine.high %v3823_v15, %v3827_v61  ;;  %v9122_v17 = vcombine.low %v3823_v15, %v3827_v61  ;;  %v9052_v19 = vcombine.low %v3752_v21, %v3756_v62  ;;  %v3871_v61 = vld [vmem:[#allocation10 + $0xe50] sm:$0xff] }
 0x53b   : > { %6962 = vmatpush1.bf16.msra.mxu0 %v9066_v1  ;;  %v9053_v1 = vcombine.high %v3752_v21, %v3756_v62  ;;  %v3875_v21 = vld [vmem:[#allocation10 + $0xe70] sm:$0xff]  ;;  %v3800_v62 = vld [vmem:[#allocation10 + $0xc18] sm:$0xff] }
 0x53c   : > { %7108 = vmatpush1.bf16.msra.mxu1 %v8996_v2  ;;  %6963 = vmatprep.subr.bf16.mxu0 %v9075_v5  ;;  %v3831_v2 = vld [vmem:[#allocation10 + $0xd10] sm:$0xff] }
 0x53d   : > { %7109 = vmatprep.subr.bf16.mxu1 %v9005_v12  ;;  %v3835_v5 = vld [vmem:[#allocation10 + $0xd30] sm:$0xff]  ;;  %v3760_v12 = vld [vmem:[#allocation10 + $0xad8] sm:$0xff] }
 0x53e   : > { %v9131_v20 = vcombine.high %v3831_v2, %v3835_v5  ;;  %v9130_v25 = vcombine.low %v3831_v2, %v3835_v5  ;;  %v9060_v26 = vcombine.low %v3760_v12, %v3764_v14  ;;  %v3879_v5 = vld [vmem:[#allocation10 + $0xe90] sm:$0xff] }
 0x53f   : > { %6964 = vmatpush1.bf16.msra.mxu0 %v9074_v22  ;;  %v9061_v22 = vcombine.high %v3760_v12, %v3764_v14  ;;  %v3883_v12 = vld [vmem:[#allocation10 + $0xeb0] sm:$0xff]  ;;  %v3808_v14 = vld [vmem:[#allocation10 + $0xc58] sm:$0xff] }
 0x540   : > { %7110 = vmatpush1.bf16.msra.mxu1 %v9004_v23  ;;  %6965 = vmatprep.subr.bf16.mxu0 %v9083_v24  ;;  %v3839_v23 = vld [vmem:[#allocation10 + $0xd50] sm:$0xff] }
 0x541   : > { %7111 = vmatprep.subr.bf16.mxu1 %v9013_v8  ;;  %v3843_v24 = vld [vmem:[#allocation10 + $0xd70] sm:$0xff]  ;;  %v3768_v8 = vld [vmem:[#allocation10 + $0xb18] sm:$0xff] }
 0x542   : > { %v9139_v27 = vcombine.high %v3839_v23, %v3843_v24  ;;  %v9138_v31 = vcombine.low %v3839_v23, %v3843_v24  ;;  %v9068_v36 = vcombine.low %v3768_v8, %v3772_v4  ;;  %v3887_v24 = vld [vmem:[#allocation10 + $0xed0] sm:$0xff] }
 0x543   : > { %6966 = vmatpush1.bf16.msra.mxu0 %v9082_v13  ;;  %v9069_v13 = vcombine.high %v3768_v8, %v3772_v4  ;;  %v3891_v8 = vld [vmem:[#allocation10 + $0xef0] sm:$0xff]  ;;  %v3816_v4 = vld [vmem:[#allocation10 + $0xc98] sm:$0xff] }
 0x544   : > { %7112 = vmatpush1.bf16.msra.mxu1 %v9012_v28  ;;  %6967 = vmatprep.subr.bf16.mxu0 %v9091_v29  ;;  %v3847_v28 = vld [vmem:[#allocation10 + $0xd90] sm:$0xff] }
 0x545   : > { %7113 = vmatprep.subr.bf16.mxu1 %v9021_v54  ;;  %v3851_v29 = vld [vmem:[#allocation10 + $0xdb0] sm:$0xff]  ;;  %v3776_v54 = vld [vmem:[#allocation10 + $0xb58] sm:$0xff] }
 0x546   : > { %v9147_v37 = vcombine.high %v3847_v28, %v3851_v29 }
 0x547   : > { %6968 = vmatpush1.bf16.msra.mxu0 %v9090_v40 }
 0x548   : > { %7114 = vmatpush1.bf16.msra.mxu1 %v9020_v33  ;;  %6978 = vmatprep.subr.bf16.mxu0 %v9099_v34  ;;  %v9077_v33 = vcombine.high %v3776_v54, %v3780_v30  ;;  %v3855_v34 = vld [vmem:[#allocation10 + $0xdd0] sm:$0xff] }
 0x549   : > { %7115 = vmatprep.subr.bf16.mxu1 %v9029_v41  ;;  %v3859_v41 = vld [vmem:[#allocation10 + $0xdf0] sm:$0xff] }
 0x54a   : > { %6970 = vmatmul.mubr.bf16.vlgmr.msra.gmra.mrb[8].mxu0 %v10865_v55 }
 0x54b   : > { %6979 = vmatpush1.bf16.msra.mxu0 %v9098_v52  ;;  %7010 = vmatprep.mubr.bf16.mxu0 %v10875_v39  ;;  %v9146_v52 = vcombine.low %v3847_v28, %v3851_v29  ;;  %v3895_v29 = vld [vmem:[#allocation10 + $0xf10] sm:$0xff] }
 0x54c   : > { %7116 = vmatpush1.bf16.msra.mxu1 %v9028_v43  ;;  %6980 = vmatprep.subr.bf16.mxu0 %v9107_v11  ;;  %v9076_v11 = vcombine.low %v3776_v54, %v3780_v30  ;;  %v3899_v54 = vld [vmem:[#allocation10 + $0xf30] sm:$0xff]  ;;  %v3824_v30 = vld [vmem:[#allocation10 + $0xcd8] sm:$0xff] }
 0x54d   : > { %7117 = vmatprep.subr.bf16.mxu1 %v9037_v44  ;;  %v9155_v44 = vcombine.high %v3855_v34, %v3859_v41 }
 0x54f   : > { %6981 = vmatpush1.bf16.msra.mxu0 %v9106_v53  ;;  %v3796_v53 = vld [vmem:[#allocation10 + $0xbf8] sm:$0xff] }
 0x550   : > { %7118 = vmatpush1.bf16.msra.mxu1 %v9036_v57  ;;  %6982 = vmatprep.subr.bf16.mxu0 %v9115_v59  ;;  %v9154_v57 = vcombine.low %v3855_v34, %v3859_v41  ;;  %v9084_v59 = vcombine.low %v3784_v9, %v3788_v18  ;;  %v9093_v15 = vcombine.high %v3792_v50, %v3796_v53  ;;  %v3903_v34 = vld [vmem:[#allocation10 + $0xf50] sm:$0xff]  ;;  %v3836_v9 = vld [vmem:[#allocation10 + $0xd38] sm:$0xff] }
 0x551   : > { %7119 = vmatprep.subr.bf16.mxu1 %v9045_v60  ;;  %v9163_v60 = vcombine.high %v3863_v45, %v3867_v49  ;;  %v3907_v41 = vld [vmem:[#allocation10 + $0xf70] sm:$0xff]  ;;  %v9194_v18 = vcombine.low %v3895_v29, %v3899_v54 }
 0x553   : > { %6983 = vmatpush1.bf16.msra.mxu0 %v9114_v63  ;;  %v3804_v63 = vld [vmem:[#allocation10 + $0xc38] sm:$0xff] }
 0x554   : > { %7120 = vmatpush1.bf16.msra.mxu1 %v9044_v7  ;;  %6984 = vmatprep.subr.bf16.mxu0 %v9123_v0  ;;  %v9162_v7 = vcombine.low %v3863_v45, %v3867_v49  ;;  %v9092_v0 = vcombine.low %v3792_v50, %v3796_v53  ;;  %v9101_v2 = vcombine.high %v3800_v62, %v3804_v63  ;;  %v3840_v45 = vld [vmem:[#allocation10 + $0xd58] sm:$0xff] }
 0x555   : > { %7121 = vmatprep.subr.bf16.mxu1 %v9053_v1  ;;  %v9171_v1 = vcombine.high %v3871_v61, %v3875_v21  ;;  %v3844_v49 = vld [vmem:[#allocation10 + $0xd78] sm:$0xff]  ;;  %v9202_v50 = vcombine.low %v3903_v34, %v3907_v41 }
 0x557   : > { %6985 = vmatpush1.bf16.msra.mxu0 %v9122_v17  ;;  %v3812_v17 = vld [vmem:[#allocation10 + $0xc78] sm:$0xff] }
 0x558   : > { %7122 = vmatpush1.bf16.msra.mxu1 %v9052_v19  ;;  %6986 = vmatprep.subr.bf16.mxu0 %v9131_v20  ;;  %v9170_v19 = vcombine.low %v3871_v61, %v3875_v21  ;;  %v9100_v20 = vcombine.low %v3800_v62, %v3804_v63  ;;  %v9109_v23 = vcombine.high %v3808_v14, %v3812_v17  ;;  %v3923_v61 = vld [vmem:[#allocation10 + $0xff0] sm:$0xff]  ;;  %v3848_v21 = vld [vmem:[#allocation10 + $0xd98] sm:$0xff] }
 0x559   : > { %7123 = vmatprep.subr.bf16.mxu1 %v9061_v22  ;;  %v9179_v22 = vcombine.high %v3879_v5, %v3883_v12  ;;  %v3852_v62 = vld [vmem:[#allocation10 + $0xdb8] sm:$0xff] }
 0x55b   : > { %6987 = vmatpush1.bf16.msra.mxu0 %v9130_v25  ;;  %v3820_v25 = vld [vmem:[#allocation10 + $0xcb8] sm:$0xff] }
 0x55c   : > { %7124 = vmatpush1.bf16.msra.mxu1 %v9060_v26  ;;  %6988 = vmatprep.subr.bf16.mxu0 %v9139_v27  ;;  %v9178_v26 = vcombine.low %v3879_v5, %v3883_v12  ;;  %v9108_v27 = vcombine.low %v3808_v14, %v3812_v17  ;;  %v9117_v28 = vcombine.high %v3816_v4, %v3820_v25  ;;  %v3856_v12 = vld [vmem:[#allocation10 + $0xdd8] sm:$0xff] }
 0x55d   : > { %v10895_v40 = vpop.f32.mrb[4].mxu0  ;;  %7125 = vmatprep.subr.bf16.mxu1 %v9069_v13  ;;  %v9187_v13 = vcombine.high %v3887_v24, %v3891_v8  ;;  %v3860_v14 = vld [vmem:[#allocation10 + $0xdf8] sm:$0xff] }
 0x55e   : > { %v10897_v6 = vpop.f32.mrb[5].mxu0 }
 0x55f   : > { %6989 = vmatpush1.bf16.msra.mxu0 %v9138_v31  ;;  %v6688_v35 = vpop.f32.mrb[6].mxu0  ;;  %v3828_v31 = vld [vmem:[#allocation10 + $0xcf8] sm:$0xff] }
 0x560   : > { %7126 = vmatpush1.bf16.msra.mxu1 %v9068_v36  ;;  %v6689_v43 = vpop.f32.mrb[7].mxu0  ;;  %6990 = vmatprep.subr.bf16.mxu0 %v9147_v37  ;;  %v9186_v36 = vcombine.low %v3887_v24, %v3891_v8  ;;  %v9116_v37 = vcombine.low %v3816_v4, %v3820_v25  ;;  %v9124_v35 = vcombine.low %v3824_v30, %v3828_v31  ;;  %v3868_v25 = vld [vmem:[#allocation10 + $0xe38] sm:$0xff] }
 0x561   : > { %7127 = vmatprep.subr.bf16.mxu1 %v9077_v33  ;;  %v9195_v33 = vcombine.high %v3895_v29, %v3899_v54  ;;  %v9157_v4 = vcombine.high %v3856_v12, %v3860_v14  ;;  %v3872_v54 = vld [vmem:[#allocation10 + $0xe58] sm:$0xff] }
 0x563   : > { %6991 = vmatpush1.bf16.msra.mxu0 %v9146_v52  ;;  %v9203_v52 = vcombine.high %v3903_v34, %v3907_v41  ;;  %v3884_v34 = vld [vmem:[#allocation10 + $0xeb8] sm:$0xff]  ;;  %v9767_v41 = vld [vmem:[#allocation13 + $0x20] ss:$8 sps:$4 sm:$0xff]  }
 0x564   : > { %7128 = vmatpush1.bf16.msra.mxu1 %v9076_v11  ;;  %6992 = vmatprep.subr.bf16.mxu0 %v9155_v44  ;;  %v3911_v11 = vld [vmem:[#allocation10 + $0xf90] sm:$0xff] }
 0x565   : > { %7129 = vmatprep.subr.bf16.mxu1 %v9085_v47  ;;  %v3915_v44 = vld [vmem:[#allocation10 + $0xfb0] sm:$0xff]  ;;  %v10901_v47 = vld [vmem:[#allocation11] sm:$0xff] }
 0x566   : > { %v9210_v63 = vcombine.low %v3911_v11, %v3915_v44 }
 0x567   : > { %6993 = vmatpush1.bf16.msra.mxu0 %v9154_v57  ;;  %v9211_v57 = vcombine.high %v3911_v11, %v3915_v44  ;;  %v9775_v44 = vld [vmem:[#allocation13 + $0x44] ss:$8 sps:$4 sm:$0xff]  }
 0x568   : > { %7130 = vmatpush1.bf16.msra.mxu1 %v9084_v59  ;;  %6994 = vmatprep.subr.bf16.mxu0 %v9163_v60  ;;  %v3934_v59 = vrot.slane %v10901_v47, %v10754_v51  ;;  %v9141_v60 = vcombine.high %v3840_v45, %v3844_v49 }
 0x569   : > { %7131 = vmatprep.subr.bf16.mxu1 %v9093_v15  ;;  %v3919_v15 = vld [vmem:[#allocation10 + $0xfd0] sm:$0xff] }
 0x56b   : > { %6995 = vmatpush1.bf16.msra.mxu0 %v9162_v7  ;;  %v9140_v7 = vcombine.low %v3840_v45, %v3844_v49  ;;  %v3896_v49 = vld [vmem:[#allocation10 + $0xf18] sm:$0xff] }
 0x56c   : > { %7132 = vmatpush1.bf16.msra.mxu1 %v9092_v0  ;;  %6996 = vmatprep.subr.bf16.mxu0 %v9171_v1  ;;  %v9219_v0 = vcombine.high %v3919_v15, %v3923_v61  ;;  %v9363_v1 = vadd.f32 %v10897_v6, %v3934_v59  ;;  %v3864_v6 = vld [vmem:[#allocation10 + $0xe18] sm:$0xff] }
 0x56d   : > { %7142 = vmatprep.subr.bf16.mxu1 %v9101_v2  ;;  %v9149_v2 = vcombine.high %v3848_v21, %v3852_v62  ;;  %v9165_v29 = vcombine.high %v3864_v6, %v3868_v25  ;;  %v9778_v59 = vld [vmem:[#allocation13 + $0x54] ss:$8 sps:$4 sm:$0xff]  }
 0x56e   : > { %v7184_v24 = vmax.f32 %v9363_v1, 0.0  ;;  %v3916_v1 = vld [vmem:[#allocation10 + $0xfb8] sm:$0xff] }
 0x56f   : > { %6997 = vmatpush1.bf16.msra.mxu0 %v9170_v19  ;;  %7134 = vmatmul.mubr.bf16.vlgmr.msra.gmra.mrb[16].mxu1 %v10865_v55  ;;  %v9125_v55 = vcombine.high %v3824_v30, %v3828_v31  ;;  %v9218_v19 = vcombine.low %v3919_v15, %v3923_v61  ;;  %v3876_v30 = vld [vmem:[#allocation10 + $0xe78] sm:$0xff] }
 0x570   : > { %7143 = vmatpush1.bf16.msra.mxu1 %v9100_v20  ;;  %7174 = vmatprep.mubr.bf16.mxu1 %v10875_v39  ;;  %v3832_v39 = vld [vmem:[#allocation10 + $0xd18] sm:$0xff] }
 0x571   : > { %6998 = vmatprep.subr.bf16.mxu0 %v9179_v22  ;;  %7144 = vmatprep.subr.bf16.mxu1 %v9109_v23  ;;  %v9133_v43 = vcombine.high %v3832_v39, %v3836_v9  ;;  %v9132_v53 = vcombine.low %v3832_v39, %v3836_v9  ;;  %v9148_v22 = vcombine.low %v3848_v21, %v3852_v62  ;;  %v9763_v23 = vld [vmem:[#allocation13 + $0x4] ss:$8 sps:$4 sm:$0xff]   ;;  %v9764_v31 = vld [vmem:[#allocation13 + $0x10] ss:$8 sps:$4 sm:$0xff]   ;;  %v9772_v9 = vld [vmem:[#allocation13 + $0x34] ss:$8 sps:$4 sm:$0xff]  }
 0x572   : > { %v9172_v39 = vcombine.low %v3872_v54, %v3876_v30  ;;  %v3904_v15 = vld [vmem:[#allocation10 + $0xf58] sm:$0xff] }
 0x573   : > { %6999 = vmatpush1.bf16.msra.mxu0 %v9178_v26  ;;  %v9761_v26 = vld [vmem:[#allocation13] ss:$8 sps:$4 sm:$0xff]   ;;  %v3908_v61 = vld [vmem:[#allocation10 + $0xf78] sm:$0xff] }
 0x574   : > { %7145 = vmatpush1.bf16.msra.mxu1 %v9108_v27  ;;  %7000 = vmatprep.subr.bf16.mxu0 %v9187_v13  ;;  %v9156_v27 = vcombine.low %v3856_v12, %v3860_v14  ;;  %v9766_v13 = vld [vmem:[#allocation13 + $0x14] ss:$8 sps:$4 sm:$0xff]   ;;  %v9776_v21 = vld [vmem:[#allocation13 + $0x50] ss:$8 sps:$4 sm:$0xff]   ;;  %v9204_v12 = vcombine.low %v3904_v15, %v3908_v61 }
 0x575   : > { %7146 = vmatprep.subr.bf16.mxu1 %v9117_v28  ;;  %v7192_v28 = vpack.c.bf16 %v7184_v24, %v7184_v24  ;;  %v9784_v14 = vld [vmem:[#allocation13 + $0x74] ss:$8 sps:$4 sm:$0xff]  }
 0x577   : > { %7001 = vmatpush1.bf16.msra.mxu0 %v9186_v36  ;;  %v9164_v36 = vcombine.low %v3864_v6, %v3868_v25  ;;  %v9785_v6 = vld [vmem:[#allocation13 + $0x80] ss:$8 sps:$4 sm:$0xff]  }
 0x578   : > { %7147 = vmatpush1.bf16.msra.mxu1 %v9116_v37  ;;  %7002 = vmatprep.subr.bf16.mxu0 %v9195_v33  ;;  %v9769_v37 = vld [vmem:[#allocation13 + $0x24] ss:$8 sps:$4 sm:$0xff]   ;;  %v9173_v33 = vcombine.high %v3872_v54, %v3876_v30  ;;  %v9794_v54 = vld [vmem:[#allocation13 + $0xb0] ss:$8 sps:$4 sm:$0xff]  }
 0x579   : > { %7148 = vmatprep.subr.bf16.mxu1 %v9125_v55  ;;  %v3880_v55 = vld [vmem:[#allocation10 + $0xe98] sm:$0xff]  ;;  %v9799_v30 = vld [vmem:[#allocation13 + $0xc4] ss:$8 sps:$4 sm:$0xff]  }
 0x57a   : > { %v9180_v11 = vcombine.low %v3880_v55, %v3884_v34 }
 0x57b   : > { %7003 = vmatpush1.bf16.msra.mxu0 %v9194_v18  ;;  %v9181_v18 = vcombine.high %v3880_v55, %v3884_v34  ;;  %v9805_v55 = vld [vmem:[#allocation13 + $0xe4] ss:$8 sps:$4 sm:$0xff]   ;;  %v9803_v34 = vld [vmem:[#allocation13 + $0xe0] ss:$8 sps:$4 sm:$0xff]  }
 0x57c   : > { %7149 = vmatpush1.bf16.msra.mxu1 %v9124_v35  ;;  %7004 = vmatprep.subr.bf16.mxu0 %v9203_v52  ;;  %v3888_v35 = vld [vmem:[#allocation10 + $0xed8] sm:$0xff] }
 0x57d   : > { %7150 = vmatprep.subr.bf16.mxu1 %v9133_v43  ;;  %v3892_v52 = vld [vmem:[#allocation10 + $0xef8] sm:$0xff] }
 0x57e   : > { %v9770_v43 = vld [vmem:[#allocation13 + $0x30] ss:$8 sps:$4 sm:$0xff]   ;;  %v9189_v45 = vcombine.high %v3888_v35, %v3892_v52 }
 0x57f   : > { %7005 = vmatpush1.bf16.msra.mxu0 %v9202_v50  ;;  %v3900_v50 = vld [vmem:[#allocation10 + $0xf38] sm:$0xff] }
 0x580   : > { %7151 = vmatpush1.bf16.msra.mxu1 %v9132_v53  ;;  %7006 = vmatprep.subr.bf16.mxu0 %v9211_v57  ;;  %v9773_v53 = vld [vmem:[#allocation13 + $0x40] ss:$8 sps:$4 sm:$0xff]   ;;  %v9188_v57 = vcombine.low %v3888_v35, %v3892_v52  ;;  %v9196_v62 = vcombine.low %v3896_v49, %v3900_v50  ;;  %v9811_v52 = vld [vmem:[#allocation13 + $0x104] ss:$8 sps:$4 sm:$0xff]  }
 0x581   : > { %7152 = vmatprep.subr.bf16.mxu1 %v9141_v60  ;;  %v9197_v60 = vcombine.high %v3896_v49, %v3900_v50  ;;  %v9817_v49 = vld [vmem:[#allocation13 + $0x124] ss:$8 sps:$4 sm:$0xff]   ;;  %v9820_v50 = vld [vmem:[#allocation13 + $0x134] ss:$8 sps:$4 sm:$0xff]  }
 0x582   : > { %v10906_v5 = vpop.f32.mrb[12].mxu1 }
 0x583   : > { %v10908_v17 = vpop.f32.mrb[13].mxu1  ;;  %7007 = vmatpush1.bf16.msra.mxu0 %v9210_v63  ;;  %v9781_v63 = vld [vmem:[#allocation13 + $0x64] ss:$8 sps:$4 sm:$0xff]  }
 0x584   : > { %v6852_v20 = vpop.f32.mrb[14].mxu1  ;;  %7153 = vmatpush1.bf16.msra.mxu1 %v9140_v7  ;;  %7008 = vmatprep.subr.bf16.mxu0 %v9219_v0  ;;  %v9205_v7 = vcombine.high %v3904_v15, %v3908_v61  ;;  %v3912_v0 = vld [vmem:[#allocation10 + $0xf98] sm:$0xff]  ;;  %v9829_v61 = vld [vmem:[#allocation13 + $0x164] ss:$8 sps:$4 sm:$0xff]  }
 0x585   : > { %v6853_v8 = vpop.f32.mrb[15].mxu1  ;;  %7154 = vmatprep.subr.bf16.mxu1 %v9149_v2  ;;  %v9779_v2 = vld [vmem:[#allocation13 + $0x60] ss:$8 sps:$4 sm:$0xff]   ;;  %v3920_v20 = vld [vmem:[#allocation10 + $0xfd8] sm:$0xff]  ;;  %v9212_v24 = vcombine.low %v3912_v0, %v3916_v1 }
 0x586   : > { %v9787_v8 = vld [vmem:[#allocation13 + $0x84] ss:$8 sps:$4 sm:$0xff]   ;;  %v9824_v15 = vld [vmem:[#allocation13 + $0x150] ss:$8 sps:$4 sm:$0xff]  }
 0x587   : > { %7009 = vmatpush1.bf16.msra.mxu0 %v9218_v19  ;;  %v9213_v19 = vcombine.high %v3912_v0, %v3916_v1  ;;  %v9833_v0 = vld [vmem:[#allocation13 + $0x180] ss:$8 sps:$4 sm:$0xff]   ;;  %v9838_v1 = vld [vmem:[#allocation13 + $0x194] ss:$8 sps:$4 sm:$0xff]  }
 0x588   : > { %7155 = vmatpush1.bf16.msra.mxu1 %v9148_v22  ;;  %7979 = vmatprep.subr.bf16.mxu0 %v9763_v23  ;;  %v3924_v22 = vld [vmem:[#allocation10 + $0xff8] sm:$0xff] }
 0x589   : > { %7156 = vmatprep.subr.bf16.mxu1 %v9157_v4  ;;  %v9782_v23 = vld [vmem:[#allocation13 + $0x70] ss:$8 sps:$4 sm:$0xff]   ;;  %v9221_v4 = vcombine.high %v3920_v20, %v3924_v22  ;;  %v9220_v25 = vcombine.low %v3920_v20, %v3924_v22  ;;  %v9847_v22 = vld [vmem:[#allocation13 + $0x1c4] ss:$8 sps:$4 sm:$0xff]  }
 0x58a   : > { %7011 = vmatmul.mubr.bf16.vlgmr.msra.gmra.mrb[8].mxu0 %v10877_v42  ;;  %v9842_v20 = vld [vmem:[#allocation13 + $0x1b0] ss:$8 sps:$4 sm:$0xff]  }
 0x58b   : > { %7980 = vmatpush1.bf16.msra.mxu0 %v9761_v26  ;;  %8011 = vmatprep.mubr.bf16.mxu0 %v7192_v28  ;;  %v9790_v26 = vld [vmem:[#allocation13 + $0x94] ss:$8 sps:$4 sm:$0xff]   ;;  %v9791_v28 = vld [vmem:[#allocation13 + $0xa0] ss:$8 sps:$4 sm:$0xff]  }
 0x58c   : > { %7157 = vmatpush1.bf16.msra.mxu1 %v9156_v27  ;;  %7981 = vmatprep.subr.bf16.mxu0 %v9766_v13  ;;  %v9788_v27 = vld [vmem:[#allocation13 + $0x90] ss:$8 sps:$4 sm:$0xff]   ;;  %v9793_v13 = vld [vmem:[#allocation13 + $0xa4] ss:$8 sps:$4 sm:$0xff]  }
 0x58d   : > { %7158 = vmatprep.subr.bf16.mxu1 %v9165_v29  ;;  %v9796_v29 = vld [vmem:[#allocation13 + $0xb4] ss:$8 sps:$4 sm:$0xff]  }
 0x58f   : > { %7982 = vmatpush1.bf16.msra.mxu0 %v9764_v31  ;;  %v9797_v31 = vld [vmem:[#allocation13 + $0xc0] ss:$8 sps:$4 sm:$0xff]  }
 0x590   : > { %7159 = vmatpush1.bf16.msra.mxu1 %v9164_v36  ;;  %7983 = vmatprep.subr.bf16.mxu0 %v9769_v37  ;;  %v9802_v36 = vld [vmem:[#allocation13 + $0xd4] ss:$8 sps:$4 sm:$0xff]   ;;  %v9800_v37 = vld [vmem:[#allocation13 + $0xd0] ss:$8 sps:$4 sm:$0xff]  }
 0x591   : > { %7160 = vmatprep.subr.bf16.mxu1 %v9173_v33  ;;  %v3930_v33 = vrot.slane %v10901_v47, %v10765_v3 }
 0x593   : > { %7984 = vmatpush1.bf16.msra.mxu0 %v9767_v41  ;;  %v9362_v41 = vadd.f32 %v10895_v40, %v3930_v33  ;;  %v9812_v40 = vld [vmem:[#allocation13 + $0x110] ss:$8 sps:$4 sm:$0xff]  }
 0x594   : > { %7161 = vmatpush1.bf16.msra.mxu1 %v9172_v39  ;;  %7985 = vmatprep.subr.bf16.mxu0 %v9772_v9  ;;  %v9808_v39 = vld [vmem:[#allocation13 + $0xf4] ss:$8 sps:$4 sm:$0xff]   ;;  %v9866_v33 = vld [vmem:[#allocation13 + $0x230] ss:$8 sps:$4 sm:$0xff]  }
 0x595   : > { %7162 = vmatprep.subr.bf16.mxu1 %v9181_v18  ;;  %v9806_v18 = vld [vmem:[#allocation13 + $0xf0] ss:$8 sps:$4 sm:$0xff]   ;;  %v7183_v35 = vmax.f32 %v9362_v41, 0.0 }
 0x596   : > { %v9872_v41 = vld [vmem:[#allocation13 + $0x250] ss:$8 sps:$4 sm:$0xff]  }
 0x597   : > { %7986 = vmatpush1.bf16.msra.mxu0 %v9770_v43 }
 0x598   : > { %7163 = vmatpush1.bf16.msra.mxu1 %v9180_v11  ;;  %7987 = vmatprep.subr.bf16.mxu0 %v9775_v44  ;;  %v9809_v11 = vld [vmem:[#allocation13 + $0x100] ss:$8 sps:$4 sm:$0xff]   ;;  %v7191_v44 = vpack.c.bf16 %v7183_v35, %v7183_v35  ;;  %v9878_v35 = vld [vmem:[#allocation13 + $0x270] ss:$8 sps:$4 sm:$0xff]  }
 0x599   : > { %7164 = vmatprep.subr.bf16.mxu1 %v9189_v45  ;;  %v9814_v45 = vld [vmem:[#allocation13 + $0x114] ss:$8 sps:$4 sm:$0xff]  }
 0x59b   : > { %7988 = vmatpush1.bf16.msra.mxu0 %v9773_v53  ;;  %v9818_v53 = vld [vmem:[#allocation13 + $0x130] ss:$8 sps:$4 sm:$0xff]  }
 0x59c   : > { %7165 = vmatpush1.bf16.msra.mxu1 %v9188_v57  ;;  %7989 = vmatprep.subr.bf16.mxu0 %v9778_v59  ;;  %v9823_v57 = vld [vmem:[#allocation13 + $0x144] ss:$8 sps:$4 sm:$0xff]   ;;  %v9821_v59 = vld [vmem:[#allocation13 + $0x140] ss:$8 sps:$4 sm:$0xff]  }
 0x59d   : > { %7166 = vmatprep.subr.bf16.mxu1 %v9197_v60  ;;  %v9826_v60 = vld [vmem:[#allocation13 + $0x154] ss:$8 sps:$4 sm:$0xff]  }
 0x59f   : > { %7990 = vmatpush1.bf16.msra.mxu0 %v9776_v21  ;;  %v9827_v21 = vld [vmem:[#allocation13 + $0x160] ss:$8 sps:$4 sm:$0xff]  }
 0x5a0   : > { %7167 = vmatpush1.bf16.msra.mxu1 %v9196_v62  ;;  %7991 = vmatprep.subr.bf16.mxu0 %v9781_v63  ;;  %v9832_v62 = vld [vmem:[#allocation13 + $0x174] ss:$8 sps:$4 sm:$0xff]   ;;  %v9830_v63 = vld [vmem:[#allocation13 + $0x170] ss:$8 sps:$4 sm:$0xff]  }
 0x5a1   : > { %7168 = vmatprep.subr.bf16.mxu1 %v9205_v7  ;;  %v9835_v7 = vld [vmem:[#allocation13 + $0x184] ss:$8 sps:$4 sm:$0xff]  }
 0x5a3   : > { %7992 = vmatpush1.bf16.msra.mxu0 %v9779_v2  ;;  %v9836_v2 = vld [vmem:[#allocation13 + $0x190] ss:$8 sps:$4 sm:$0xff]  }
 0x5a4   : > { %7169 = vmatpush1.bf16.msra.mxu1 %v9204_v12  ;;  %7993 = vmatprep.subr.bf16.mxu0 %v9784_v14  ;;  %v9841_v12 = vld [vmem:[#allocation13 + $0x1a4] ss:$8 sps:$4 sm:$0xff]   ;;  %v9839_v14 = vld [vmem:[#allocation13 + $0x1a0] ss:$8 sps:$4 sm:$0xff]  }
 0x5a5   : > { %7170 = vmatprep.subr.bf16.mxu1 %v9213_v19  ;;  %v9844_v19 = vld [vmem:[#allocation13 + $0x1b4] ss:$8 sps:$4 sm:$0xff]  }
 0x5a7   : > { %7994 = vmatpush1.bf16.msra.mxu0 %v9782_v23  ;;  %v9845_v23 = vld [vmem:[#allocation13 + $0x1c0] ss:$8 sps:$4 sm:$0xff]  }
 0x5a8   : > { %7171 = vmatpush1.bf16.msra.mxu1 %v9212_v24  ;;  %7995 = vmatprep.subr.bf16.mxu0 %v9787_v8  ;;  %v9850_v24 = vld [vmem:[#allocation13 + $0x1d4] ss:$8 sps:$4 sm:$0xff]   ;;  %v9848_v8 = vld [vmem:[#allocation13 + $0x1d0] ss:$8 sps:$4 sm:$0xff]  }
 0x5a9   : > { %7172 = vmatprep.subr.bf16.mxu1 %v9221_v4  ;;  %v3938_v4 = vrot.slane %v10901_v47, %v10783_v32  ;;  %v9860_v32 = vld [vmem:[#allocation13 + $0x210] ss:$8 sps:$4 sm:$0xff]  }
 0x5ab   : > { %7996 = vmatpush1.bf16.msra.mxu0 %v9785_v6  ;;  %v9853_v6 = vld [vmem:[#allocation13 + $0x1e4] ss:$8 sps:$4 sm:$0xff]  }
 0x5ac   : > { %7173 = vmatpush1.bf16.msra.mxu1 %v9220_v25  ;;  %7997 = vmatprep.subr.bf16.mxu0 %v9790_v26  ;;  %v9851_v25 = vld [vmem:[#allocation13 + $0x1e0] ss:$8 sps:$4 sm:$0xff]   ;;  %v9364_v26 = vadd.f32 %v10906_v5, %v3938_v4  ;;  %v9868_v5 = vld [vmem:[#allocation13 + $0x234] ss:$8 sps:$4 sm:$0xff]   ;;  %v9913_v4 = vld [vmem:[#allocation13 + $0x324] ss:$8 sps:$4 sm:$0xff]  }
 0x5af   : > { %7175 = vmatmul.mubr.bf16.vlgmr.msra.gmra.mrb[16].mxu1 %v10877_v42  ;;  %7998 = vmatpush1.bf16.msra.mxu0 %v9788_v27  ;;  %v3942_v42 = vrot.slane %v10901_v47, %v10768_v10  ;;  %v9856_v27 = vld [vmem:[#allocation13 + $0x1f4] ss:$8 sps:$4 sm:$0xff]  }
 0x5b0   : > { %7999 = vmatprep.subr.bf16.mxu0 %v9793_v13  ;;  %v9854_v13 = vld [vmem:[#allocation13 + $0x1f0] ss:$8 sps:$4 sm:$0xff]  }
 0x5b1   : > { %v9365_v9 = vadd.f32 %v10908_v17, %v3942_v42  ;;  %v9815_v17 = vld [vmem:[#allocation13 + $0x120] ss:$8 sps:$4 sm:$0xff]  }
 0x5b2   : > { %v9869_v42 = vld [vmem:[#allocation13 + $0x240] ss:$8 sps:$4 sm:$0xff]  }
 0x5b3   : > { %8000 = vmatpush1.bf16.msra.mxu0 %v9791_v28  ;;  %v7186_v43 = vmax.f32 %v9365_v9, 0.0  ;;  %v7185_v28 = vmax.f32 %v9364_v26, 0.0  ;;  %v9875_v9 = vld [vmem:[#allocation13 + $0x260] ss:$8 sps:$4 sm:$0xff]   ;;  %v9919_v26 = vld [vmem:[#allocation13 + $0x344] ss:$8 sps:$4 sm:$0xff]  }
 0x5b4   : > { %8001 = vmatprep.subr.bf16.mxu0 %v9796_v29  ;;  %v9859_v29 = vld [vmem:[#allocation13 + $0x204] ss:$8 sps:$4 sm:$0xff]  }
 0x5b5   : > { %v7194_v10 = vpack.c.bf16 %v7186_v43, %v7186_v43  ;;  %v9881_v43 = vld [vmem:[#allocation13 + $0x280] ss:$8 sps:$4 sm:$0xff]  }
 0x5b7   : > { %8002 = vmatpush1.bf16.msra.mxu0 %v9794_v54  ;;  %v9857_v54 = vld [vmem:[#allocation13 + $0x200] ss:$8 sps:$4 sm:$0xff]  }
 0x5b8   : > { %8003 = vmatprep.subr.bf16.mxu0 %v9799_v30  ;;  %v7193_v30 = vpack.c.bf16 %v7185_v28, %v7185_v28  ;;  %v9920_v28 = vld [vmem:[#allocation13 + $0x350] ss:$8 sps:$4 sm:$0xff]  }
 0x5bb   : > { %8004 = vmatpush1.bf16.msra.mxu0 %v9797_v31  ;;  %v9862_v31 = vld [vmem:[#allocation13 + $0x214] ss:$8 sps:$4 sm:$0xff]  }
 0x5bc   : > { %8005 = vmatprep.subr.bf16.mxu0 %v9802_v36  ;;  %v9865_v36 = vld [vmem:[#allocation13 + $0x224] ss:$8 sps:$4 sm:$0xff]  }
 0x5bf   : > { %8006 = vmatpush1.bf16.msra.mxu0 %v9800_v37  ;;  %v9863_v37 = vld [vmem:[#allocation13 + $0x220] ss:$8 sps:$4 sm:$0xff]  }
 0x5c0   : > { %8007 = vmatprep.subr.bf16.mxu0 %v9805_v55  ;;  %v9871_v55 = vld [vmem:[#allocation13 + $0x244] ss:$8 sps:$4 sm:$0xff]  }
 0x5c3   : > { %8008 = vmatpush1.bf16.msra.mxu0 %v9803_v34  ;;  %v9874_v34 = vld [vmem:[#allocation13 + $0x254] ss:$8 sps:$4 sm:$0xff]  }
 0x5c4   : > { %8009 = vmatprep.subr.bf16.mxu0 %v9808_v39  ;;  %v9877_v39 = vld [vmem:[#allocation13 + $0x264] ss:$8 sps:$4 sm:$0xff]  }
 0x5c7   : > { %8010 = vmatpush1.bf16.msra.mxu0 %v9806_v18  ;;  %v9880_v18 = vld [vmem:[#allocation13 + $0x274] ss:$8 sps:$4 sm:$0xff]  }
 0x5c8   : > { %8020 = vmatprep.subr.bf16.mxu0 %v9811_v52  ;;  %v9883_v52 = vld [vmem:[#allocation13 + $0x284] ss:$8 sps:$4 sm:$0xff]  }
 0x5ca   : > { %8012 = vmatmul.mubr.bf16.vlgmr.msra.gmra.mrb[12].mxu0 %v7191_v44  ;;  %v9884_v44 = vld [vmem:[#allocation13 + $0x290] ss:$8 sps:$4 sm:$0xff]  }
 0x5cb   : > { %8021 = vmatpush1.bf16.msra.mxu0 %v9809_v11  ;;  %8052 = vmatprep.mubr.bf16.mxu0 %v7194_v10  ;;  %v9886_v11 = vld [vmem:[#allocation13 + $0x294] ss:$8 sps:$4 sm:$0xff]   ;;  %v9887_v10 = vld [vmem:[#allocation13 + $0x2a0] ss:$8 sps:$4 sm:$0xff]  }
 0x5cc   : > { %8022 = vmatprep.subr.bf16.mxu0 %v9814_v45  ;;  %v9889_v45 = vld [vmem:[#allocation13 + $0x2a4] ss:$8 sps:$4 sm:$0xff]  }
 0x5cf   : > { %8023 = vmatpush1.bf16.msra.mxu0 %v9812_v40  ;;  %v9892_v40 = vld [vmem:[#allocation13 + $0x2b4] ss:$8 sps:$4 sm:$0xff]  }
 0x5d0   : > { %8024 = vmatprep.subr.bf16.mxu0 %v9817_v49  ;;  %v9890_v49 = vld [vmem:[#allocation13 + $0x2b0] ss:$8 sps:$4 sm:$0xff]  }
 0x5d3   : > { %8025 = vmatpush1.bf16.msra.mxu0 %v9815_v17  ;;  %v9895_v17 = vld [vmem:[#allocation13 + $0x2c4] ss:$8 sps:$4 sm:$0xff]  }
 0x5d4   : > { %8026 = vmatprep.subr.bf16.mxu0 %v9820_v50  ;;  %v9893_v50 = vld [vmem:[#allocation13 + $0x2c0] ss:$8 sps:$4 sm:$0xff]  }
 0x5d7   : > { %8027 = vmatpush1.bf16.msra.mxu0 %v9818_v53  ;;  %v9898_v53 = vld [vmem:[#allocation13 + $0x2d4] ss:$8 sps:$4 sm:$0xff]  }
 0x5d8   : > { %8028 = vmatprep.subr.bf16.mxu0 %v9823_v57  ;;  %v9896_v57 = vld [vmem:[#allocation13 + $0x2d0] ss:$8 sps:$4 sm:$0xff]  }
 0x5db   : > { %8029 = vmatpush1.bf16.msra.mxu0 %v9821_v59  ;;  %v9901_v59 = vld [vmem:[#allocation13 + $0x2e4] ss:$8 sps:$4 sm:$0xff]  }
 0x5dc   : > { %8030 = vmatprep.subr.bf16.mxu0 %v9826_v60  ;;  %v9899_v60 = vld [vmem:[#allocation13 + $0x2e0] ss:$8 sps:$4 sm:$0xff]  }
 0x5df   : > { %8031 = vmatpush1.bf16.msra.mxu0 %v9824_v15  ;;  %v9904_v15 = vld [vmem:[#allocation13 + $0x2f4] ss:$8 sps:$4 sm:$0xff]  }
 0x5e0   : > { %8032 = vmatprep.subr.bf16.mxu0 %v9829_v61  ;;  %v9902_v61 = vld [vmem:[#allocation13 + $0x2f0] ss:$8 sps:$4 sm:$0xff]  }
 0x5e3   : > { %8033 = vmatpush1.bf16.msra.mxu0 %v9827_v21  ;;  %v9907_v21 = vld [vmem:[#allocation13 + $0x304] ss:$8 sps:$4 sm:$0xff]  }
 0x5e4   : > { %8034 = vmatprep.subr.bf16.mxu0 %v9832_v62  ;;  %v3946_v62 = vrot.slane %v10901_v47, %v1767_v16  ;;  %v9908_v16 = vld [vmem:[#allocation13 + $0x310] ss:$8 sps:$4 sm:$0xff]  }
 0x5e7   : > { %8035 = vmatpush1.bf16.msra.mxu0 %v9830_v63  ;;  %v3950_v63 = vrot.slane %v10901_v47, %v1771_v48  ;;  %v9911_v48 = vld [vmem:[#allocation13 + $0x320] ss:$8 sps:$4 sm:$0xff]  }
 0x5e8   : > { %8036 = vmatprep.subr.bf16.mxu0 %v9835_v7 }
 0x5eb   : > { %8037 = vmatpush1.bf16.msra.mxu0 %v9833_v0 }
 0x5ec   : > { %8038 = vmatprep.subr.bf16.mxu0 %v9838_v1 }
 0x5ef   : > { %8039 = vmatpush1.bf16.msra.mxu0 %v9836_v2 }
 0x5f0   : > { %8040 = vmatprep.subr.bf16.mxu0 %v9841_v12 }
 0x5f3   : > { %8041 = vmatpush1.bf16.msra.mxu0 %v9839_v14 }
 0x5f4   : > { %8042 = vmatprep.subr.bf16.mxu0 %v9844_v19 }
 0x5f7   : > { %8043 = vmatpush1.bf16.msra.mxu0 %v9842_v20 }
 0x5f8   : > { %8044 = vmatprep.subr.bf16.mxu0 %v9847_v22 }
 0x5fb   : > { %8045 = vmatpush1.bf16.msra.mxu0 %v9845_v23  ;;  %v9905_v23 = vld [vmem:[#allocation13 + $0x300] ss:$8 sps:$4 sm:$0xff]  }
 0x5fc   : > { %8046 = vmatprep.subr.bf16.mxu0 %v9850_v24 }
 0x5ff   : > { %8047 = vmatpush1.bf16.msra.mxu0 %v9848_v8  ;;  %v9910_v8 = vld [vmem:[#allocation13 + $0x314] ss:$8 sps:$4 sm:$0xff]  }
 0x600   : > { %8048 = vmatprep.subr.bf16.mxu0 %v9853_v6  ;;  %v9916_v6 = vld [vmem:[#allocation13 + $0x334] ss:$8 sps:$4 sm:$0xff]  }
 0x603   : > { %8049 = vmatpush1.bf16.msra.mxu0 %v9851_v25  ;;  %v9914_v25 = vld [vmem:[#allocation13 + $0x330] ss:$8 sps:$4 sm:$0xff]  }
 0x604   : > { %8050 = vmatprep.subr.bf16.mxu0 %v9856_v27  ;;  %v9917_v27 = vld [vmem:[#allocation13 + $0x340] ss:$8 sps:$4 sm:$0xff]  }
 0x607   : > { %8051 = vmatpush1.bf16.msra.mxu0 %v9854_v13  ;;  %v9922_v13 = vld [vmem:[#allocation13 + $0x354] ss:$8 sps:$4 sm:$0xff]  }
 0x608   : > { %8061 = vmatprep.subr.bf16.mxu0 %v9859_v29  ;;  %v9925_v29 = vld [vmem:[#allocation13 + $0x364] ss:$8 sps:$4 sm:$0xff]  }
 0x60a   : > { %8053 = vmatmul.mubr.bf16.vlgmr.msra.gmra.mrb[12].mxu0 %v7193_v30  ;;  %v9928_v30 = vld [vmem:[#allocation13 + $0x374] ss:$8 sps:$4 sm:$0xff]  }
 0x60b   : > { %8062 = vmatpush1.bf16.msra.mxu0 %v9857_v54  ;;  %v9923_v54 = vld [vmem:[#allocation13 + $0x360] ss:$8 sps:$4 sm:$0xff]  }
 0x60c   : > { %8063 = vmatprep.subr.bf16.mxu0 %v9862_v31  ;;  %v9926_v31 = vld [vmem:[#allocation13 + $0x370] ss:$8 sps:$4 sm:$0xff]  }
 0x60f   : > { %8064 = vmatpush1.bf16.msra.mxu0 %v9860_v32  ;;  %v3958_v32 = vrot.slane %v10901_v47, %v1779_v56  ;;  %v9940_v56 = vld [vmem:[#allocation13 + $0x3b4] ss:$8 sps:$4 sm:$0xff]  }
 0x610   : > { %8065 = vmatprep.subr.bf16.mxu0 %v9865_v36  ;;  %v9931_v36 = vld [vmem:[#allocation13 + $0x384] ss:$8 sps:$4 sm:$0xff]  }
 0x613   : > { %8066 = vmatpush1.bf16.msra.mxu0 %v9863_v37 }
 0x614   : > { %8067 = vmatprep.subr.bf16.mxu0 %v9868_v5 }
 0x617   : > { %8068 = vmatpush1.bf16.msra.mxu0 %v9866_v33  ;;  %v9929_v33 = vld [vmem:[#allocation13 + $0x380] ss:$8 sps:$4 sm:$0xff]  }
 0x618   : > { %8069 = vmatprep.subr.bf16.mxu0 %v9871_v55 }
 0x61b   : > { %8070 = vmatpush1.bf16.msra.mxu0 %v9869_v42 }
 0x61c   : > { %8071 = vmatprep.subr.bf16.mxu0 %v9874_v34  ;;  %v9934_v34 = vld [vmem:[#allocation13 + $0x394] ss:$8 sps:$4 sm:$0xff]  }
 0x61f   : > { %8072 = vmatpush1.bf16.msra.mxu0 %v9872_v41 }
 0x620   : > { %8073 = vmatprep.subr.bf16.mxu0 %v9877_v39 }
 0x623   : > { %8074 = vmatpush1.bf16.msra.mxu0 %v9875_v9  ;;  %v9932_v9 = vld [vmem:[#allocation13 + $0x390] ss:$8 sps:$4 sm:$0xff]  }
 0x624   : > { %8075 = vmatprep.subr.bf16.mxu0 %v9880_v18 }
 0x627   : > { %8076 = vmatpush1.bf16.msra.mxu0 %v9878_v35  ;;  %v9937_v35 = vld [vmem:[#allocation13 + $0x3a4] ss:$8 sps:$4 sm:$0xff]  }
 0x628   : > { %8077 = vmatprep.subr.bf16.mxu0 %v9883_v52  ;;  %v9935_v52 = vld [vmem:[#allocation13 + $0x3a0] ss:$8 sps:$4 sm:$0xff]  }
 0x62b   : > { %8078 = vmatpush1.bf16.msra.mxu0 %v9881_v43  ;;  %v9938_v43 = vld [vmem:[#allocation13 + $0x3b0] ss:$8 sps:$4 sm:$0xff]  }
 0x62c   : > { %8079 = vmatprep.subr.bf16.mxu0 %v9886_v11  ;;  %v9943_v11 = vld [vmem:[#allocation13 + $0x3c4] ss:$8 sps:$4 sm:$0xff]  }
 0x62f   : > { %8080 = vmatpush1.bf16.msra.mxu0 %v9884_v44  ;;  %v9941_v44 = vld [vmem:[#allocation13 + $0x3c0] ss:$8 sps:$4 sm:$0xff]  }
 0x630   : > { %8081 = vmatprep.subr.bf16.mxu0 %v9889_v45  ;;  %v9946_v45 = vld [vmem:[#allocation13 + $0x3d4] ss:$8 sps:$4 sm:$0xff]  }
 0x633   : > { %8082 = vmatpush1.bf16.msra.mxu0 %v9887_v10  ;;  %v9944_v10 = vld [vmem:[#allocation13 + $0x3d0] ss:$8 sps:$4 sm:$0xff]  }
 0x634   : > { %8083 = vmatprep.subr.bf16.mxu0 %v9892_v40  ;;  %v3954_v40 = vrot.slane %v10901_v47, %v1775_v58 }
 0x637   : > { %8084 = vmatpush1.bf16.msra.mxu0 %v9890_v49  ;;  %v9949_v49 = vld [vmem:[#allocation13 + $0x3e4] ss:$8 sps:$4 sm:$0xff]  }
 0x638   : > { %8085 = vmatprep.subr.bf16.mxu0 %v9895_v17  ;;  %v9947_v17 = vld [vmem:[#allocation13 + $0x3e0] ss:$8 sps:$4 sm:$0xff]  }
 0x63b   : > { %8086 = vmatpush1.bf16.msra.mxu0 %v9893_v50 }
 0x63c   : > { %8087 = vmatprep.subr.bf16.mxu0 %v9898_v53  ;;  %v9952_v53 = vld [vmem:[#allocation13 + $0x3f4] ss:$8 sps:$4 sm:$0xff]  }
 0x63f   : > { %8088 = vmatpush1.bf16.msra.mxu0 %v9896_v57  ;;  %v9950_v57 = vld [vmem:[#allocation13 + $0x3f0] ss:$8 sps:$4 sm:$0xff]  }
 0x640   : > { %8089 = vmatprep.subr.bf16.mxu0 %v9901_v59 }
 0x643   : > { %8090 = vmatpush1.bf16.msra.mxu0 %v9899_v60 }
 0x644   : > { %8091 = vmatprep.subr.bf16.mxu0 %v9904_v15  ;;  %v7327_v15 = vld [vmem:[#allocation14] sm:$0x3] }
 0x645   : > { %v7332_v46 = vrot.slane %v7327_v15, %v10765_v3  ;;  %v7336_v58 = vrot.slane %v7327_v15, %v10754_v51 }
 0x647   : > { %8092 = vmatpush1.bf16.msra.mxu0 %v9902_v61  ;;  %v8144_v61 = vand.u32 127, %v1459_v38 }
 0x648   : > { %8102 = vmatprep.subr.bf16.mxu0 %v9907_v21 }
 0x649   : > { %vm8145_vm0 = vcmp.lt.s32.totalorder %v8144_v61, 31  ;;  %vm8158_vm1 = vcmp.lt.s32.totalorder %v8144_v61, 2 }
 0x65d   : > { %v7012_v7 = vpop.f32.mrb[8].mxu0 }
 0x65e   : > { %v9366_v0 = vadd.f32 %v7012_v7, %v3946_v62  ;;  %v7014_v1 = vpop.f32.mrb[9].mxu0 }
 0x65f   : > { %v9367_v2 = vadd.f32 %v7014_v1, %v3950_v63  ;;  %v7016_v12 = vpop.f32.mrb[10].mxu0 }
 0x660   : > { %v7187_v14 = vmax.f32 %v9366_v0, 0.0  ;;  %v7017_v19 = vpop.f32.mrb[11].mxu0 }
 0x661   : > { %v7188_v20 = vmax.f32 %v9367_v2, 0.0 }
 0x662   : > { %v7195_v24 = vpack.c.bf16 %v7187_v14, %v7187_v14 }
 0x663   : > { %v7196_v22 = vpack.c.bf16 %v7188_v20, %v7188_v20 }
 0x665   : > { %8093 = vmatprep.mubr.bf16.mxu0 %v7196_v22 }
 0x666   : > { %8094 = vmatmul.mubr.bf16.vlgmr.msra.gmra.mrb[12].mxu0 %v7195_v24 }
 0x667   : > { %8103 = vmatpush1.bf16.msra.mxu0 %v9905_v23 }
 0x668   : > { %8104 = vmatprep.subr.bf16.mxu0 %v9910_v8 }
 0x66b   : > { %8105 = vmatpush1.bf16.msra.mxu0 %v9908_v16 }
 0x66c   : > { %8106 = vmatprep.subr.bf16.mxu0 %v9913_v4 }
 0x66f   : > { %8107 = vmatpush1.bf16.msra.mxu0 %v9911_v48 }
 0x670   : > { %8108 = vmatprep.subr.bf16.mxu0 %v9916_v6 }
 0x673   : > { %8109 = vmatpush1.bf16.msra.mxu0 %v9914_v25 }
 0x674   : > { %8110 = vmatprep.subr.bf16.mxu0 %v9919_v26 }
 0x677   : > { %8111 = vmatpush1.bf16.msra.mxu0 %v9917_v27 }
 0x678   : > { %8112 = vmatprep.subr.bf16.mxu0 %v9922_v13 }
 0x67b   : > { %8113 = vmatpush1.bf16.msra.mxu0 %v9920_v28 }
 0x67c   : > { %8114 = vmatprep.subr.bf16.mxu0 %v9925_v29 }
 0x67f   : > { %8115 = vmatpush1.bf16.msra.mxu0 %v9923_v54 }
 0x680   : > { %8116 = vmatprep.subr.bf16.mxu0 %v9928_v30 }
 0x682   : > { %v7176_v37 = vpop.f32.mrb[16].mxu1 }
 0x683   : > { %8117 = vmatpush1.bf16.msra.mxu0 %v9926_v31  ;;  %v7178_v5 = vpop.f32.mrb[17].mxu1  ;;  %v9368_v50 = vadd.f32 %v7176_v37, %v3954_v40 }
 0x684   : > { %v9369_v55 = vadd.f32 %v7178_v5, %v3958_v32  ;;  %v7180_v42 = vpop.f32.mrb[18].mxu1  ;;  %8118 = vmatprep.subr.bf16.mxu0 %v9931_v36 }
 0x685   : > { %v7181_v41 = vpop.f32.mrb[19].mxu1  ;;  %v7189_v59 = vmax.f32 %v9368_v50, 0.0 }
 0x686   : > { %v7190_v39 = vmax.f32 %v9369_v55, 0.0 }
 0x687   : > { %8119 = vmatpush1.bf16.msra.mxu0 %v9929_v33  ;;  %v7197_v60 = vpack.c.bf16 %v7189_v59, %v7189_v59 }
 0x688   : > { %v7198_v18 = vpack.c.bf16 %v7190_v39, %v7190_v39  ;;  %8120 = vmatprep.subr.bf16.mxu0 %v9934_v34 }
 0x68a   : > { %8134 = vmatprep.mubr.bf16.mxu0 %v7198_v18 }
 0x68b   : > { %8121 = vmatpush1.bf16.msra.mxu0 %v9932_v9 }
 0x68c   : > { %8122 = vmatprep.subr.bf16.mxu0 %v9937_v35 }
 0x68f   : > { %8123 = vmatpush1.bf16.msra.mxu0 %v9935_v52 }
 0x690   : > { %8124 = vmatprep.subr.bf16.mxu0 %v9940_v56 }
 0x693   : > { %8125 = vmatpush1.bf16.msra.mxu0 %v9938_v43 }
 0x694   : > { %8126 = vmatprep.subr.bf16.mxu0 %v9943_v11 }
 0x697   : > { %8127 = vmatpush1.bf16.msra.mxu0 %v9941_v44 }
 0x698   : > { %8128 = vmatprep.subr.bf16.mxu0 %v9946_v45 }
 0x69b   : > { %8129 = vmatpush1.bf16.msra.mxu0 %v9944_v10 }
 0x69c   : > { %8130 = vmatprep.subr.bf16.mxu0 %v9949_v49 }
 0x69f   : > { %8131 = vmatpush1.bf16.msra.mxu0 %v9947_v17 }
 0x6a0   : > { %8132 = vmatprep.subr.bf16.mxu0 %v9952_v53 }
 0x6a3   : > { %8133 = vmatpush1.bf16.msra.mxu0 %v9950_v57 }
 0x6a6   : > { %8135 = vmatmul.mubr.bf16.vlgmr.msra.gmra.mrb[12].mxu0 %v7197_v60 }
 0x779   : > { %v8136_v47 = vpop.f32.mrb[12].mxu0 }
 0x77a   : > { %v9370_v21 = vadd.f32 %v8136_v47, %v7332_v46  ;;  %v8138_v62 = vpop.f32.mrb[13].mxu0 }
 0x77b   : > { %v8140_v63 = vpop.f32.mrb[14].mxu0  ;;  %v9371_v7 = vadd.f32 %v8138_v62, %v7336_v58 }
 0x77c   : > { %v8141_v0 = vpop.f32.mrb[15].mxu0  ;;  %v8146_v1 = vsel %vm8145_vm0, %v9370_v21, -inf }
 0x77d   : > { %8147 = vmax.xlane.f32.xlu0 %v8146_v1  ;;  %v8159_v2 = vsel %vm8158_vm1, %v9371_v7, -inf }
 0x781   : > { %8160 = vmax.xlane.f32.xlu0 %v8159_v2 }
 0x80a   : > { %v8148_v12 = vpop.xlane.xlu0 %8147 }
 0x80b   : > { %v8149_v14 = vsub.f32 %v8146_v1, %v8148_v12 }
 0x80d   : > { %v8150_v19 = vmul.f32 1.442695, %v8149_v14 }
 0x80e   : > { %v8161_v38 = vpop.xlane.xlu0 %8160 }
 0x80f   : > { %v8162_v20 = vsub.f32 %v8159_v2, %v8161_v38  ;;  %9953 = vpow2.f32 %v8150_v19 }
 0x811   : > { %v8163_v3 = vmul.f32 1.442695, %v8162_v20 }
 0x813   : > { %9955 = vpow2.f32 %v8163_v3 }
 0x819   : > { %v9954_v51 = vpop.eup %9953 }
 0x81a   : > { %8152 = vadd.xlane.f32.xlu1 %v9954_v51 }
 0x81d   : > { %v9956_v22 = vpop.eup %9955 }
 0x81e   : > { %8165 = vadd.xlane.f32.xlu1 %v9956_v22 }
 0x8a7   : > { %v8153_v23 = vpop.xlane.xlu1 %8152 }
 0x8a8   : > { %9957 = vlog2.f32 %v8153_v23 }
 0x8ab   : > { %v8166_v24 = vpop.xlane.xlu1 %8165 }
 0x8ac   : > { %9959 = vlog2.f32 %v8166_v24 }
 0x8b2   : > { %v9958_v8 = vpop.eup %9957 }
 0x8b3   : > { %v8155_v16 = vmul.f32 0.6931472, %v9958_v8 }
 0x8b5   : > { %v8156_v4 = vsub.f32 %v8149_v14, %v8155_v16 }
 0x8b6   : > { %v9960_v48 = vpop.eup %9959 }
 0x8b7   : > { %8157 = vst [vmem:[%s10964_s9] sm:$0xff] %v8156_v4  ;;  %v8168_v6 = vmul.f32 0.6931472, %v9960_v48 }
 0x8b9   : > { %v8169_v25 = vsub.f32 %v8162_v20, %v8168_v6 }
 0x8bb   : > { %8170 = vst [vmem:[%s10987_s21] sm:$0xff] %v8169_v25 }
 0x8bc PF: > { %p25_p8 = scmp.ge.s32.totalorder %s10513_s17, 4   ;;  %s10988_s13 = smov %s10230_s14 }
 0x8bd   : > { %s10989_s14 = smov %s10234_s15  ;;  %s10990_s15 = smov %s10524_s2 }
 0x8be   : > { %s10991_s16 = smov %s10513_s17  ;;  %27 = sbr.rel (!%p25_p8) target bundleno = 10 (0xa), region = 139 }
 0x8c5   :  { %8188 = vsyncpa [#allocation4], 1 }
 0x8c6   :  { %8190 = vsyncpa [#allocation4 + $0x1], 1 }
 0x8c7   :  { %8191 = vsyncpa [#allocation6], 1 }
 0x8c8   :  { %8192 = vsyncpa [#allocation9], 1 }
 0x8c9   :  { %8193 = vsyncpa [#allocation12], 1 }
 0x8ca   :  { %8194 = vsyncpa [#allocation15], 1 }

</bundles_post_ra>
